<compile_context>
chip_gen: v7x
topology: tpu7x:2x2x1
jax: 0.10.0
libtpu: 0.0.40
codegen_flags: <defaults>
</compile_context>

<pallas_src>
import functools

import jax
import jax.numpy as jnp
from jax.experimental import pallas as pl
from jax.experimental.pallas import tpu as pltpu


# ----------------------------------------------------------------------------
# Fused Pallas kernel (one batch element per grid step)
# ----------------------------------------------------------------------------
def fused_colorization_kernel(x_ref, w1_ref, b1_ref, w2_ref, b2_ref,
                              w3_ref, b3_ref, o_ref,
                              r_ref, a2_ref, a3_ref, *, H, W, Wp):
    """Fused conv1+ReLU+maxpool2 -> conv2+ReLU -> conv3 for one image.

    x_ref : (1, H+2, W+2, 1)   zero-padded 1-channel input (NHWC), f32
    w1_ref: (9, 64)            conv1 weights, tap-major (dy*3+dx), f32 (VPU path)
    w2_ref: (576, 128)         conv2 im2col RHS, row = tap*64 + cin, bf16 (MXU)
    w3_ref: (128, 18)          conv3 N-stacked RHS, col = 2*tap + cout, bf16 (MXU)
    b*_ref: (1, Cout)          biases, f32
    o_ref : (1, 2, H2*W2)      lane-dense output, spatial on lanes (== NCHW layout)

    r_ref : (H2, W, 64)  f32   scratch: row-pooled conv1 output
    a2_ref: (H2+4, Wp, 64) f32 scratch: zero-padded, width-padded conv2 input
    a3_ref: (H2+4, Wp, 128) f32 scratch: zero-padded, width-padded conv3 input
    """
    C1 = w1_ref.shape[1]            # 64
    C2 = w2_ref.shape[1]            # 128
    C3 = b3_ref.shape[1]            # 2
    H2, W2 = H // 2, W // 2
    L = H2 * Wp                     # flat rows per (width-padded) conv pass
    F = (H2 + 4) * Wp               # total flat rows of the padded scratches

    # ---- refresh only the pad strips of a2/a3 (interiors are fully rewritten
    # below; the remaining scratch rows/cols only feed discarded outputs).
    a2_ref[0:2, :, :] = jnp.zeros((2, Wp, C1), a2_ref.dtype)
    a2_ref[H2 + 2:H2 + 4, :, :] = jnp.zeros((2, Wp, C1), a2_ref.dtype)
    a2_ref[2:H2 + 2, 0:1, :] = jnp.zeros((H2, 1, C1), a2_ref.dtype)
    a2_ref[2:H2 + 2, W2 + 1:Wp, :] = jnp.zeros((H2, Wp - W2 - 1, C1), a2_ref.dtype)
    a3_ref[0:2, :, :] = jnp.zeros((2, Wp, C2), a3_ref.dtype)
    a3_ref[H2 + 2:H2 + 4, :, :] = jnp.zeros((2, Wp, C2), a3_ref.dtype)
    a3_ref[2:H2 + 2, 0:1, :] = jnp.zeros((H2, 1, C2), a3_ref.dtype)
    a3_ref[2:H2 + 2, W2 + 1:Wp, :] = jnp.zeros((H2, Wp - W2 - 1, C2), a3_ref.dtype)

    # ---- conv1 (1 -> 64): 9 VPU shift-multiply-accumulates + ReLU ------------
    xp = x_ref[0]                                            # (H+2, W+2, 1)
    w1 = w1_ref[...]                                         # (9, 64)
    acc1 = jnp.broadcast_to(b1_ref[...].reshape(1, 1, C1), (H, W, C1))
    for dy in range(3):
        for dx in range(3):
            acc1 = acc1 + xp[dy:dy + H, dx:dx + W, :] * w1[dy * 3 + dx]
    y1 = jnp.maximum(acc1, 0.0)                              # (H, W, 64)

    # ---- 2x2 / stride-2 max pool, stored straight into a2's interior ---------
    y4 = y1.reshape(H2, 2, W, C1)                            # split row pairs (outer dims)
    r_ref[...] = jnp.maximum(y4[:, 0], y4[:, 1])             # (H2, W, 64)
    pooled = jnp.maximum(r_ref[:, pl.ds(0, W2, stride=2), :],
                         r_ref[:, pl.ds(1, W2, stride=2), :])  # (H2, W2, 64)
    a2_ref[2:H2 + 2, 1:W2 + 1, :] = pooled

    # ---- conv2 (64 -> 128): ONE K=576 im2col matmul (bf16 MXU, f32 acc) + ReLU
    # Flat-shift: every 3x3 tap of the padded scratch is a leading-dim slice.
    af2 = a2_ref[...].reshape(F, C1)
    patches2 = jnp.concatenate(
        [af2[(dy + 1) * Wp + dx - 1:(dy + 1) * Wp + dx - 1 + L, :]
         for dy in range(3) for dx in range(3)],
        axis=-1).astype(jnp.bfloat16)                        # (L, 576)
    acc2 = jnp.dot(patches2, w2_ref[...],
                   preferred_element_type=jnp.float32)       # (L, 128)
    h2 = jnp.maximum(acc2 + b2_ref[...], 0.0)
    # interior-only store: the pad columns of a3 are never dirtied.
    a3_ref[2:H2 + 2, 1:W2 + 1, :] = h2.reshape(H2, Wp, C2)[:, 1:W2 + 1, :]

    # ---- conv3 (128 -> 2): ONE N-stacked (F,128)@(128,18) bf16 matmul --------
    # followed by 9 cheap shifted 2-lane VPU adds (instead of nine N=2 MXU drains).
    af3 = a3_ref[...].reshape(F, C2).astype(jnp.bfloat16)
    s3 = jnp.dot(af3, w3_ref[...],
                 preferred_element_type=jnp.float32)         # (F, 18)
    acc3 = s3[Wp - 1:Wp - 1 + L, 0:C3]                       # tap (dy=0, dx=0)
    for t in range(1, 9):
        dy, dx = t // 3, t % 3
        s = (dy + 1) * Wp + dx - 1
        acc3 = acc3 + s3[s:s + L, C3 * t:C3 * (t + 1)]
    acc3 = acc3 + b3_ref[...]                                # bias once, at the end

    # ---- lane-dense final store: (2, H2*W2), spatial on lanes (== NCHW) ------
    real = acc3.reshape(H2, Wp, C3)[:, 1:W2 + 1, :]          # (H2, W2, 2)
    o_ref[0] = jnp.transpose(real.reshape(H2 * W2, C3), (1, 0)).astype(o_ref.dtype)


# ----------------------------------------------------------------------------
# Wrapper: layout glue + pallas_call setup
# ----------------------------------------------------------------------------
def colorization_forward(x_nchw, params):
    """Forward pass equivalent to ColorizationNet.forward (NCHW in / NCHW out)."""
    N, Cin, H, W = x_nchw.shape
    assert Cin == 1 and H % 2 == 0 and W % 2 == 0, (N, Cin, H, W)
    H2, W2 = H // 2, W // 2
    Wp = ((W2 + 2 + 7) // 8) * 8          # width-padded row length, multiple of 8
    C1, C2, C3 = 64, 128, 2

    # tiny 1-channel input is pre-padded NHWC; all big activations are padded in VMEM
    xp = jnp.pad(x_nchw[:, 0], ((0, 0), (1, 1), (1, 1)))[..., None]   # (N, H+2, W+2, 1)

    # HWIO weights -> fused matmul operands
    w1m = params["w1"].reshape(9, C1).astype(jnp.float32)             # (9, 64)  VPU
    w2m = params["w2"].reshape(9 * C1, C2).astype(jnp.bfloat16)       # (576, 128) im2col RHS
    w3s = jnp.transpose(params["w3"].reshape(9, C2, C3),
                        (1, 0, 2)).reshape(C2, 9 * C3).astype(jnp.bfloat16)  # (128, 18)
    b1 = params["b1"].reshape(1, C1).astype(jnp.float32)
    b2 = params["b2"].reshape(1, C2).astype(jnp.float32)
    b3 = params["b3"].reshape(1, C3).astype(jnp.float32)

    kernel = functools.partial(fused_colorization_kernel, H=H, W=W, Wp=Wp)

    out = pl.pallas_call(
        kernel,
        out_shape=jax.ShapeDtypeStruct((N, 2, H2 * W2), jnp.float32),
        grid_spec=pltpu.PrefetchScalarGridSpec(
            num_scalar_prefetch=0,
            grid=(N,),
            in_specs=[
                pl.BlockSpec((1, H + 2, W + 2, 1), lambda n: (n, 0, 0, 0)),
                pl.BlockSpec((9, C1), lambda n: (0, 0)),
                pl.BlockSpec((1, C1), lambda n: (0, 0)),
                pl.BlockSpec((9 * C1, C2), lambda n: (0, 0)),
                pl.BlockSpec((1, C2), lambda n: (0, 0)),
                pl.BlockSpec((C2, 9 * C3), lambda n: (0, 0)),
                pl.BlockSpec((1, C3), lambda n: (0, 0)),
            ],
            out_specs=pl.BlockSpec((1, 2, H2 * W2), lambda n: (n, 0, 0)),
            scratch_shapes=[
                pltpu.VMEM((H2, W, C1), jnp.float32),          # row-pooled conv1 output
                pltpu.VMEM((H2 + 4, Wp, C1), jnp.float32),     # padded conv2 input
                pltpu.VMEM((H2 + 4, Wp, C2), jnp.float32),     # padded conv3 input
            ],
        ),
        compiler_params=pltpu.CompilerParams(
            dimension_semantics=("parallel",),                  # batch is independent
            vmem_limit_bytes=64 * 1024 * 1024,
        ),
    )(xp, w1m, b1, w2m, b2, w3s, b3)

    return out.reshape(N, 2, H2, W2)                            # already NCHW


# ----------------------------------------------------------------------------
# Deterministic parameter init (same shapes/init scale as the PyTorch module)
# ----------------------------------------------------------------------------
def init_params(key):
    ks = jax.random.split(key, 6)

    def conv_init(kw, kb, cout, cin):
        bound = 1.0 / (cin * 9) ** 0.5
        w_oihw = jax.random.uniform(kw, (cout, cin, 3, 3), jnp.float32, -bound, bound)
        b = jax.random.uniform(kb, (cout,), jnp.float32, -bound, bound)
        # OIHW (PyTorch) -> HWIO
        return jnp.transpose(w_oihw, (2, 3, 1, 0)), b

    w1, b1 = conv_init(ks[0], ks[1], 64, 1)
    w2, b2 = conv_init(ks[2], ks[3], 128, 64)
    w3, b3 = conv_init(ks[4], ks[5], 2, 128)
    return dict(w1=w1, b1=b1, w2=w2, b2=b2, w3=w3, b3=b3)


# ----------------------------------------------------------------------------
# Pure-JAX reference (sanity check)
# ----------------------------------------------------------------------------
def reference_forward(x_nchw, params):
    def conv(x, w_hwio, b, relu):
        w_oihw = jnp.transpose(w_hwio, (3, 2, 0, 1))
        y = jax.lax.conv_general_dilated(
            x, w_oihw, window_strides=(1, 1), padding="SAME",
            dimension_numbers=("NCHW", "OIHW", "NCHW"),
            precision=jax.lax.Precision.HIGHEST)
        y = y + b[None, :, None, None]
        return jnp.maximum(y, 0.0) if relu else y

    y = conv(x_nchw, params["w1"], params["b1"], True)
    y = jax.lax.reduce_window(y, -jnp.inf, jax.lax.max,
                              (1, 1, 2, 2), (1, 1, 2, 2), "VALID")
    y = conv(y, params["w2"], params["b2"], True)
    y = conv(y, params["w3"], params["b3"], False)
    return y


if __name__ == "__main__":
    key = jax.random.PRNGKey(0)
    kx, kp = jax.random.split(key)
    x = jax.random.normal(kx, (2, 1, 16, 16), jnp.float32)      # N=2, C=1, H=W=16
    params = init_params(kp)

    out = colorization_forward(x, params)
    out = jax.block_until_ready(out)

    assert out.shape == (2, 2, 8, 8), out.shape
    ref = reference_forward(x, params)
    # tolerance accounts for bf16 MXU operands in conv2/conv3 (f32 accumulation)
    if not jnp.allclose(out, ref, rtol=2e-2, atol=2e-2):
        max_err = float(jnp.max(jnp.abs(out - ref)))
        raise AssertionError(f"Pallas output mismatch vs reference (max abs err {max_err})")

    print("KERNEL_OK")
</pallas_src>

<mosaic_0001>
module attributes {stable_mosaic.version = 11 : i64} {
  func.func @fused_colorization_kernel(%arg0: i32, %arg1: memref<1x18x18x1xf32, #tpu.memory_space<vmem>>, %arg2: memref<9x64xf32, #tpu.memory_space<vmem>>, %arg3: memref<1x64xf32, #tpu.memory_space<vmem>>, %arg4: memref<576x128xbf16, #tpu.memory_space<vmem>>, %arg5: memref<1x128xf32, #tpu.memory_space<vmem>>, %arg6: memref<128x18xbf16, #tpu.memory_space<vmem>>, %arg7: memref<1x2xf32, #tpu.memory_space<vmem>>, %arg8: memref<1x2x64xf32, #tpu.memory_space<vmem>>, %arg9: memref<8x16x64xf32, #tpu.memory_space<vmem>>, %arg10: memref<12x16x64xf32, #tpu.memory_space<vmem>>, %arg11: memref<12x16x128xf32, #tpu.memory_space<vmem>>) attributes {dimension_semantics = [#tpu.dimension_semantics<parallel>], iteration_bounds = array<i64: 2>, scalar_prefetch = 0 : i64, scratch_operands = 3 : i64, tpu.core_type = #tpu.core_type<tc>, window_params = [{transform_indices = @transform_0, window_bounds = array<i64: 1, 18, 18, 1>}, {pipeline_mode = #tpu.pipeline_mode<synchronous>, transform_indices = @transform_1, window_bounds = array<i64: 9, 64>}, {pipeline_mode = #tpu.pipeline_mode<synchronous>, transform_indices = @transform_2, window_bounds = array<i64: 1, 64>}, {pipeline_mode = #tpu.pipeline_mode<synchronous>, transform_indices = @transform_3, window_bounds = array<i64: 576, 128>}, {pipeline_mode = #tpu.pipeline_mode<synchronous>, transform_indices = @transform_4, window_bounds = array<i64: 1, 128>}, {pipeline_mode = #tpu.pipeline_mode<synchronous>, transform_indices = @transform_5, window_bounds = array<i64: 128, 18>}, {pipeline_mode = #tpu.pipeline_mode<synchronous>, transform_indices = @transform_6, window_bounds = array<i64: 1, 2>}, {transform_indices = @transform_7, window_bounds = array<i64: 1, 2, 64>}]} {
    %cst = arith.constant 0.000000e+00 : f32
    %0 = vector.broadcast %cst : f32 to vector<2x16x64xf32>
    %c0 = arith.constant 0 : index
    %c0_0 = arith.constant 0 : index
    %c0_1 = arith.constant 0 : index
    %1 = vector.load %arg10[%c0, %c0_0, %c0_1] : memref<12x16x64xf32, #tpu.memory_space<vmem>>, vector<2x16x64xf32>
    tpu.vector_store %arg10[%c0, %c0_0, %c0_1], %0 {strides = array<i32>} : memref<12x16x64xf32, #tpu.memory_space<vmem>>, vector<2x16x64xf32>,
    %cst_2 = arith.constant 0.000000e+00 : f32
    %2 = vector.broadcast %cst_2 : f32 to vector<2x16x64xf32>
    %c10 = arith.constant 10 : index
    %c0_3 = arith.constant 0 : index
    %c0_4 = arith.constant 0 : index
    %3 = vector.load %arg10[%c10, %c0_3, %c0_4] : memref<12x16x64xf32, #tpu.memory_space<vmem>>, vector<2x16x64xf32>
    tpu.vector_store %arg10[%c10, %c0_3, %c0_4], %2 {strides = array<i32>} : memref<12x16x64xf32, #tpu.memory_space<vmem>>, vector<2x16x64xf32>,
    %cst_5 = arith.constant 0.000000e+00 : f32
    %4 = vector.broadcast %cst_5 : f32 to vector<8x1x64xf32>
    %c2 = arith.constant 2 : index
    %c0_6 = arith.constant 0 : index
    %c0_7 = arith.constant 0 : index
    %5 = vector.load %arg10[%c2, %c0_6, %c0_7] : memref<12x16x64xf32, #tpu.memory_space<vmem>>, vector<8x1x64xf32>
    tpu.vector_store %arg10[%c2, %c0_6, %c0_7], %4 {strides = array<i32>} : memref<12x16x64xf32, #tpu.memory_space<vmem>>, vector<8x1x64xf32>,
    %cst_8 = arith.constant 0.000000e+00 : f32
    %6 = vector.broadcast %cst_8 : f32 to vector<8x7x64xf32>
    %c2_9 = arith.constant 2 : index
    %c9 = arith.constant 9 : index
    %c0_10 = arith.constant 0 : index
    %7 = vector.load %arg10[%c2_9, %c9, %c0_10] : memref<12x16x64xf32, #tpu.memory_space<vmem>>, vector<8x7x64xf32>
    tpu.vector_store %arg10[%c2_9, %c9, %c0_10], %6 {strides = array<i32>} : memref<12x16x64xf32, #tpu.memory_space<vmem>>, vector<8x7x64xf32>,
    %cst_11 = arith.constant 0.000000e+00 : f32
    %8 = vector.broadcast %cst_11 : f32 to vector<2x16x128xf32>
    %c0_12 = arith.constant 0 : index
    %c0_13 = arith.constant 0 : index
    %c0_14 = arith.constant 0 : index
    %9 = vector.load %arg11[%c0_12, %c0_13, %c0_14] : memref<12x16x128xf32, #tpu.memory_space<vmem>>, vector<2x16x128xf32>
    tpu.vector_store %arg11[%c0_12, %c0_13, %c0_14], %8 {strides = array<i32>} : memref<12x16x128xf32, #tpu.memory_space<vmem>>, vector<2x16x128xf32>,
    %cst_15 = arith.constant 0.000000e+00 : f32
    %10 = vector.broadcast %cst_15 : f32 to vector<2x16x128xf32>
    %c10_16 = arith.constant 10 : index
    %c0_17 = arith.constant 0 : index
    %c0_18 = arith.constant 0 : index
    %11 = vector.load %arg11[%c10_16, %c0_17, %c0_18] : memref<12x16x128xf32, #tpu.memory_space<vmem>>, vector<2x16x128xf32>
    tpu.vector_store %arg11[%c10_16, %c0_17, %c0_18], %10 {strides = array<i32>} : memref<12x16x128xf32, #tpu.memory_space<vmem>>, vector<2x16x128xf32>,
    %cst_19 = arith.constant 0.000000e+00 : f32
    %12 = vector.broadcast %cst_19 : f32 to vector<8x1x128xf32>
    %c2_20 = arith.constant 2 : index
    %c0_21 = arith.constant 0 : index
    %c0_22 = arith.constant 0 : index
    %13 = vector.load %arg11[%c2_20, %c0_21, %c0_22] : memref<12x16x128xf32, #tpu.memory_space<vmem>>, vector<8x1x128xf32>
    tpu.vector_store %arg11[%c2_20, %c0_21, %c0_22], %12 {strides = array<i32>} : memref<12x16x128xf32, #tpu.memory_space<vmem>>, vector<8x1x128xf32>,
    %cst_23 = arith.constant 0.000000e+00 : f32
    %14 = vector.broadcast %cst_23 : f32 to vector<8x7x128xf32>
    %c2_24 = arith.constant 2 : index
    %c9_25 = arith.constant 9 : index
    %c0_26 = arith.constant 0 : index
    %15 = vector.load %arg11[%c2_24, %c9_25, %c0_26] : memref<12x16x128xf32, #tpu.memory_space<vmem>>, vector<8x7x128xf32>
    tpu.vector_store %arg11[%c2_24, %c9_25, %c0_26], %14 {strides = array<i32>} : memref<12x16x128xf32, #tpu.memory_space<vmem>>, vector<8x7x128xf32>,
    %c0_27 = arith.constant 0 : index
    %c0_28 = arith.constant 0 : index
    %c0_29 = arith.constant 0 : index
    %c0_30 = arith.constant 0 : index
    %16 = vector.load %arg1[%c0_27, %c0_28, %c0_29, %c0_30] : memref<1x18x18x1xf32, #tpu.memory_space<vmem>>, vector<1x18x18x1xf32>
    %17 = vector.shape_cast %16 : vector<1x18x18x1xf32> to vector<18x18x1xf32>
    %c0_31 = arith.constant 0 : index
    %c0_32 = arith.constant 0 : index
    %18 = vector.load %arg2[%c0_31, %c0_32] : memref<9x64xf32, #tpu.memory_space<vmem>>, vector<9x64xf32>
    %c0_33 = arith.constant 0 : index
    %c0_34 = arith.constant 0 : index
    %19 = vector.load %arg3[%c0_33, %c0_34] : memref<1x64xf32, #tpu.memory_space<vmem>>, vector<1x64xf32>
    %20 = vector.shape_cast %19 : vector<1x64xf32> to vector<1x1x64xf32>
    %21 = vector.shape_cast %20 : vector<1x1x64xf32> to vector<1x1x64xf32>
    %22 = vector.broadcast %21 : vector<1x1x64xf32> to vector<16x16x64xf32>
    %23 = vector.extract_strided_slice %17 {offsets = [0, 0, 0], sizes = [16, 16, 1], strides = [1, 1, 1]} : vector<18x18x1xf32> to vector<16x16x1xf32>
    %24 = vector.extract_strided_slice %18 {offsets = [0, 0], sizes = [1, 64], strides = [1, 1]} : vector<9x64xf32> to vector<1x64xf32>
    %25 = vector.shape_cast %24 : vector<1x64xf32> to vector<64xf32>
    %26 = vector.shape_cast %25 : vector<64xf32> to vector<1x1x64xf32>
    %27 = vector.broadcast %23 : vector<16x16x1xf32> to vector<16x16x64xf32>
    %28 = vector.broadcast %26 : vector<1x1x64xf32> to vector<16x16x64xf32>
    %29 = arith.mulf %27, %28 : vector<16x16x64xf32>
    %30 = arith.addf %22, %29 : vector<16x16x64xf32>
    %31 = vector.extract_strided_slice %17 {offsets = [0, 1, 0], sizes = [16, 16, 1], strides = [1, 1, 1]} : vector<18x18x1xf32> to vector<16x16x1xf32>
    %32 = vector.extract_strided_slice %18 {offsets = [1, 0], sizes = [1, 64], strides = [1, 1]} : vector<9x64xf32> to vector<1x64xf32>
    %33 = vector.shape_cast %32 : vector<1x64xf32> to vector<64xf32>
    %34 = vector.shape_cast %33 : vector<64xf32> to vector<1x1x64xf32>
    %35 = vector.broadcast %31 : vector<16x16x1xf32> to vector<16x16x64xf32>
    %36 = vector.broadcast %34 : vector<1x1x64xf32> to vector<16x16x64xf32>
    %37 = arith.mulf %35, %36 : vector<16x16x64xf32>
    %38 = arith.addf %30, %37 : vector<16x16x64xf32>
    %39 = vector.extract_strided_slice %17 {offsets = [0, 2, 0], sizes = [16, 16, 1], strides = [1, 1, 1]} : vector<18x18x1xf32> to vector<16x16x1xf32>
    %40 = vector.extract_strided_slice %18 {offsets = [2, 0], sizes = [1, 64], strides = [1, 1]} : vector<9x64xf32> to vector<1x64xf32>
    %41 = vector.shape_cast %40 : vector<1x64xf32> to vector<64xf32>
    %42 = vector.shape_cast %41 : vector<64xf32> to vector<1x1x64xf32>
    %43 = vector.broadcast %39 : vector<16x16x1xf32> to vector<16x16x64xf32>
    %44 = vector.broadcast %42 : vector<1x1x64xf32> to vector<16x16x64xf32>
    %45 = arith.mulf %43, %44 : vector<16x16x64xf32>
    %46 = arith.addf %38, %45 : vector<16x16x64xf32>
    %47 = vector.extract_strided_slice %17 {offsets = [1, 0, 0], sizes = [16, 16, 1], strides = [1, 1, 1]} : vector<18x18x1xf32> to vector<16x16x1xf32>
    %48 = vector.extract_strided_slice %18 {offsets = [3, 0], sizes = [1, 64], strides = [1, 1]} : vector<9x64xf32> to vector<1x64xf32>
    %49 = vector.shape_cast %48 : vector<1x64xf32> to vector<64xf32>
    %50 = vector.shape_cast %49 : vector<64xf32> to vector<1x1x64xf32>
    %51 = vector.broadcast %47 : vector<16x16x1xf32> to vector<16x16x64xf32>
    %52 = vector.broadcast %50 : vector<1x1x64xf32> to vector<16x16x64xf32>
    %53 = arith.mulf %51, %52 : vector<16x16x64xf32>
    %54 = arith.addf %46, %53 : vector<16x16x64xf32>
    %55 = vector.extract_strided_slice %17 {offsets = [1, 1, 0], sizes = [16, 16, 1], strides = [1, 1, 1]} : vector<18x18x1xf32> to vector<16x16x1xf32>
    %56 = vector.extract_strided_slice %18 {offsets = [4, 0], sizes = [1, 64], strides = [1, 1]} : vector<9x64xf32> to vector<1x64xf32>
    %57 = vector.shape_cast %56 : vector<1x64xf32> to vector<64xf32>
    %58 = vector.shape_cast %57 : vector<64xf32> to vector<1x1x64xf32>
    %59 = vector.broadcast %55 : vector<16x16x1xf32> to vector<16x16x64xf32>
    %60 = vector.broadcast %58 : vector<1x1x64xf32> to vector<16x16x64xf32>
    %61 = arith.mulf %59, %60 : vector<16x16x64xf32>
    %62 = arith.addf %54, %61 : vector<16x16x64xf32>
    %63 = vector.extract_strided_slice %17 {offsets = [1, 2, 0], sizes = [16, 16, 1], strides = [1, 1, 1]} : vector<18x18x1xf32> to vector<16x16x1xf32>
    %64 = vector.extract_strided_slice %18 {offsets = [5, 0], sizes = [1, 64], strides = [1, 1]} : vector<9x64xf32> to vector<1x64xf32>
    %65 = vector.shape_cast %64 : vector<1x64xf32> to vector<64xf32>
    %66 = vector.shape_cast %65 : vector<64xf32> to vector<1x1x64xf32>
    %67 = vector.broadcast %63 : vector<16x16x1xf32> to vector<16x16x64xf32>
    %68 = vector.broadcast %66 : vector<1x1x64xf32> to vector<16x16x64xf32>
    %69 = arith.mulf %67, %68 : vector<16x16x64xf32>
    %70 = arith.addf %62, %69 : vector<16x16x64xf32>
    %71 = vector.extract_strided_slice %17 {offsets = [2, 0, 0], sizes = [16, 16, 1], strides = [1, 1, 1]} : vector<18x18x1xf32> to vector<16x16x1xf32>
    %72 = vector.extract_strided_slice %18 {offsets = [6, 0], sizes = [1, 64], strides = [1, 1]} : vector<9x64xf32> to vector<1x64xf32>
    %73 = vector.shape_cast %72 : vector<1x64xf32> to vector<64xf32>
    %74 = vector.shape_cast %73 : vector<64xf32> to vector<1x1x64xf32>
    %75 = vector.broadcast %71 : vector<16x16x1xf32> to vector<16x16x64xf32>
    %76 = vector.broadcast %74 : vector<1x1x64xf32> to vector<16x16x64xf32>
    %77 = arith.mulf %75, %76 : vector<16x16x64xf32>
    %78 = arith.addf %70, %77 : vector<16x16x64xf32>
    %79 = vector.extract_strided_slice %17 {offsets = [2, 1, 0], sizes = [16, 16, 1], strides = [1, 1, 1]} : vector<18x18x1xf32> to vector<16x16x1xf32>
    %80 = vector.extract_strided_slice %18 {offsets = [7, 0], sizes = [1, 64], strides = [1, 1]} : vector<9x64xf32> to vector<1x64xf32>
    %81 = vector.shape_cast %80 : vector<1x64xf32> to vector<64xf32>
    %82 = vector.shape_cast %81 : vector<64xf32> to vector<1x1x64xf32>
    %83 = vector.broadcast %79 : vector<16x16x1xf32> to vector<16x16x64xf32>
    %84 = vector.broadcast %82 : vector<1x1x64xf32> to vector<16x16x64xf32>
    %85 = arith.mulf %83, %84 : vector<16x16x64xf32>
    %86 = arith.addf %78, %85 : vector<16x16x64xf32>
    %87 = vector.extract_strided_slice %17 {offsets = [2, 2, 0], sizes = [16, 16, 1], strides = [1, 1, 1]} : vector<18x18x1xf32> to vector<16x16x1xf32>
    %88 = vector.extract_strided_slice %18 {offsets = [8, 0], sizes = [1, 64], strides = [1, 1]} : vector<9x64xf32> to vector<1x64xf32>
    %89 = vector.shape_cast %88 : vector<1x64xf32> to vector<64xf32>
    %90 = vector.shape_cast %89 : vector<64xf32> to vector<1x1x64xf32>
    %91 = vector.broadcast %87 : vector<16x16x1xf32> to vector<16x16x64xf32>
    %92 = vector.broadcast %90 : vector<1x1x64xf32> to vector<16x16x64xf32>
    %93 = arith.mulf %91, %92 : vector<16x16x64xf32>
    %94 = arith.addf %86, %93 : vector<16x16x64xf32>
    %cst_35 = arith.constant 0.000000e+00 : f32
    %95 = vector.broadcast %cst_35 : f32 to vector<16x16x64xf32>
    %96 = arith.maximumf %94, %95 : vector<16x16x64xf32>
    %97 = vector.shape_cast %96 : vector<16x16x64xf32> to vector<8x2x16x64xf32>
    %98 = vector.extract_strided_slice %97 {offsets = [0, 0, 0, 0], sizes = [8, 1, 16, 64], strides = [1, 1, 1, 1]} : vector<8x2x16x64xf32> to vector<8x1x16x64xf32>
    %99 = vector.shape_cast %98 : vector<8x1x16x64xf32> to vector<8x16x64xf32>
    %100 = vector.extract_strided_slice %97 {offsets = [0, 1, 0, 0], sizes = [8, 1, 16, 64], strides = [1, 1, 1, 1]} : vector<8x2x16x64xf32> to vector<8x1x16x64xf32>
    %101 = vector.shape_cast %100 : vector<8x1x16x64xf32> to vector<8x16x64xf32>
    %102 = arith.maximumf %99, %101 : vector<8x16x64xf32>
    %c0_36 = arith.constant 0 : index
    %c0_37 = arith.constant 0 : index
    %c0_38 = arith.constant 0 : index
    %103 = vector.load %arg9[%c0_36, %c0_37, %c0_38] : memref<8x16x64xf32, #tpu.memory_space<vmem>>, vector<8x16x64xf32>
    tpu.vector_store %arg9[%c0_36, %c0_37, %c0_38], %102 {strides = array<i32>} : memref<8x16x64xf32, #tpu.memory_space<vmem>>, vector<8x16x64xf32>,
    %c0_39 = arith.constant 0 : index
    %c0_40 = arith.constant 0 : index
    %c0_41 = arith.constant 0 : index
    %104 = tpu.strided_load %arg9[%c0_39, %c0_40, %c0_41] {strides = array<i32: 1, 2, 1>} : memref<8x16x64xf32, #tpu.memory_space<vmem>>, vector<8x8x64xf32>
    %c0_42 = arith.constant 0 : index
    %c1 = arith.constant 1 : index
    %c0_43 = arith.constant 0 : index
    %105 = tpu.strided_load %arg9[%c0_42, %c1, %c0_43] {strides = array<i32: 1, 2, 1>} : memref<8x16x64xf32, #tpu.memory_space<vmem>>, vector<8x8x64xf32>
    %106 = arith.maximumf %104, %105 : vector<8x8x64xf32>
    %c2_44 = arith.constant 2 : index
    %c1_45 = arith.constant 1 : index
    %c0_46 = arith.constant 0 : index
    %107 = vector.load %arg10[%c2_44, %c1_45, %c0_46] : memref<12x16x64xf32, #tpu.memory_space<vmem>>, vector<8x8x64xf32>
    tpu.vector_store %arg10[%c2_44, %c1_45, %c0_46], %106 {strides = array<i32>} : memref<12x16x64xf32, #tpu.memory_space<vmem>>, vector<8x8x64xf32>,
    %c0_47 = arith.constant 0 : index
    %c0_48 = arith.constant 0 : index
    %c0_49 = arith.constant 0 : index
    %108 = vector.load %arg10[%c0_47, %c0_48, %c0_49] : memref<12x16x64xf32, #tpu.memory_space<vmem>>, vector<12x16x64xf32>
    %109 = vector.shape_cast %108 : vector<12x16x64xf32> to vector<192x64xf32>
    %110 = vector.extract_strided_slice %109 {offsets = [15, 0], sizes = [128, 64], strides = [1, 1]} : vector<192x64xf32> to vector<128x64xf32>
    %111 = vector.extract_strided_slice %109 {offsets = [16, 0], sizes = [128, 64], strides = [1, 1]} : vector<192x64xf32> to vector<128x64xf32>
    %112 = vector.extract_strided_slice %109 {offsets = [17, 0], sizes = [128, 64], strides = [1, 1]} : vector<192x64xf32> to vector<128x64xf32>
    %113 = vector.extract_strided_slice %109 {offsets = [31, 0], sizes = [128, 64], strides = [1, 1]} : vector<192x64xf32> to vector<128x64xf32>
    %114 = vector.extract_strided_slice %109 {offsets = [32, 0], sizes = [128, 64], strides = [1, 1]} : vector<192x64xf32> to vector<128x64xf32>
    %115 = vector.extract_strided_slice %109 {offsets = [33, 0], sizes = [128, 64], strides = [1, 1]} : vector<192x64xf32> to vector<128x64xf32>
    %116 = vector.extract_strided_slice %109 {offsets = [47, 0], sizes = [128, 64], strides = [1, 1]} : vector<192x64xf32> to vector<128x64xf32>
    %117 = vector.extract_strided_slice %109 {offsets = [48, 0], sizes = [128, 64], strides = [1, 1]} : vector<192x64xf32> to vector<128x64xf32>
    %118 = vector.extract_strided_slice %109 {offsets = [49, 0], sizes = [128, 64], strides = [1, 1]} : vector<192x64xf32> to vector<128x64xf32>
    %119 = tpu.concatenate %110, %111, %112, %113, %114, %115, %116, %117, %118 in 1 : vector<128x64xf32>, vector<128x64xf32>, vector<128x64xf32>, vector<128x64xf32>, vector<128x64xf32>, vector<128x64xf32>, vector<128x64xf32>, vector<128x64xf32>, vector<128x64xf32> -> vector<128x576xf32>
    %120 = arith.truncf %119 : vector<128x576xf32> to vector<128x576xbf16>
    %c0_50 = arith.constant 0 : index
    %c0_51 = arith.constant 0 : index
    %121 = vector.load %arg4[%c0_50, %c0_51] : memref<576x128xbf16, #tpu.memory_space<vmem>>, vector<576x128xbf16>
    %cst_52 = arith.constant dense<0.000000e+00> : vector<128x128xf32>
    %122 = tpu.matmul %120, %121, %cst_52 {dimension_numbers = #tpu.dot_dimension_numbers<[1], [0], [0], [1], [0, 0, 1, 1], [], []>} : vector<128x576xbf16>, vector<576x128xbf16>, vector<128x128xf32> -> vector<128x128xf32>
    %c0_53 = arith.constant 0 : index
    %c0_54 = arith.constant 0 : index
    %123 = vector.load %arg5[%c0_53, %c0_54] : memref<1x128xf32, #tpu.memory_space<vmem>>, vector<1x128xf32>
    %124 = vector.broadcast %123 : vector<1x128xf32> to vector<128x128xf32>
    %125 = arith.addf %122, %124 : vector<128x128xf32>
    %cst_55 = arith.constant 0.000000e+00 : f32
    %126 = vector.broadcast %cst_55 : f32 to vector<128x128xf32>
    %127 = arith.maximumf %125, %126 : vector<128x128xf32>
    %128 = vector.shape_cast %127 : vector<128x128xf32> to vector<8x16x128xf32>
    %129 = vector.extract_strided_slice %128 {offsets = [0, 1, 0], sizes = [8, 8, 128], strides = [1, 1, 1]} : vector<8x16x128xf32> to vector<8x8x128xf32>
    %c2_56 = arith.constant 2 : index
    %c1_57 = arith.constant 1 : index
    %c0_58 = arith.constant 0 : index
    %130 = vector.load %arg11[%c2_56, %c1_57, %c0_58] : memref<12x16x128xf32, #tpu.memory_space<vmem>>, vector<8x8x128xf32>
    tpu.vector_store %arg11[%c2_56, %c1_57, %c0_58], %129 {strides = array<i32>} : memref<12x16x128xf32, #tpu.memory_space<vmem>>, vector<8x8x128xf32>,
    %c0_59 = arith.constant 0 : index
    %c0_60 = arith.constant 0 : index
    %c0_61 = arith.constant 0 : index
    %131 = vector.load %arg11[%c0_59, %c0_60, %c0_61] : memref<12x16x128xf32, #tpu.memory_space<vmem>>, vector<12x16x128xf32>
    %132 = vector.shape_cast %131 : vector<12x16x128xf32> to vector<192x128xf32>
    %133 = arith.truncf %132 : vector<192x128xf32> to vector<192x128xbf16>
    %c0_62 = arith.constant 0 : index
    %c0_63 = arith.constant 0 : index
    %134 = vector.load %arg6[%c0_62, %c0_63] : memref<128x18xbf16, #tpu.memory_space<vmem>>, vector<128x18xbf16>
    %cst_64 = arith.constant dense<0.000000e+00> : vector<192x18xf32>
    %135 = tpu.matmul %133, %134, %cst_64 {dimension_numbers = #tpu.dot_dimension_numbers<[1], [0], [0], [1], [0, 0, 1, 1], [], []>} : vector<192x128xbf16>, vector<128x18xbf16>, vector<192x18xf32> -> vector<192x18xf32>
    %136 = vector.extract_strided_slice %135 {offsets = [15, 0], sizes = [128, 2], strides = [1, 1]} : vector<192x18xf32> to vector<128x2xf32>
    %137 = vector.extract_strided_slice %135 {offsets = [16, 2], sizes = [128, 2], strides = [1, 1]} : vector<192x18xf32> to vector<128x2xf32>
    %138 = arith.addf %136, %137 : vector<128x2xf32>
    %139 = vector.extract_strided_slice %135 {offsets = [17, 4], sizes = [128, 2], strides = [1, 1]} : vector<192x18xf32> to vector<128x2xf32>
    %140 = arith.addf %138, %139 : vector<128x2xf32>
    %141 = vector.extract_strided_slice %135 {offsets = [31, 6], sizes = [128, 2], strides = [1, 1]} : vector<192x18xf32> to vector<128x2xf32>
    %142 = arith.addf %140, %141 : vector<128x2xf32>
    %143 = vector.extract_strided_slice %135 {offsets = [32, 8], sizes = [128, 2], strides = [1, 1]} : vector<192x18xf32> to vector<128x2xf32>
    %144 = arith.addf %142, %143 : vector<128x2xf32>
    %145 = vector.extract_strided_slice %135 {offsets = [33, 10], sizes = [128, 2], strides = [1, 1]} : vector<192x18xf32> to vector<128x2xf32>
    %146 = arith.addf %144, %145 : vector<128x2xf32>
    %147 = vector.extract_strided_slice %135 {offsets = [47, 12], sizes = [128, 2], strides = [1, 1]} : vector<192x18xf32> to vector<128x2xf32>
    %148 = arith.addf %146, %147 : vector<128x2xf32>
    %149 = vector.extract_strided_slice %135 {offsets = [48, 14], sizes = [128, 2], strides = [1, 1]} : vector<192x18xf32> to vector<128x2xf32>
    %150 = arith.addf %148, %149 : vector<128x2xf32>
    %151 = vector.extract_strided_slice %135 {offsets = [49, 16], sizes = [128, 2], strides = [1, 1]} : vector<192x18xf32> to vector<128x2xf32>
    %152 = arith.addf %150, %151 : vector<128x2xf32>
    %c0_65 = arith.constant 0 : index
    %c0_66 = arith.constant 0 : index
    %153 = vector.load %arg7[%c0_65, %c0_66] : memref<1x2xf32, #tpu.memory_space<vmem>>, vector<1x2xf32>
    %154 = vector.broadcast %153 : vector<1x2xf32> to vector<128x2xf32>
    %155 = arith.addf %152, %154 : vector<128x2xf32>
    %156 = vector.shape_cast %155 : vector<128x2xf32> to vector<8x16x2xf32>
    %157 = vector.extract_strided_slice %156 {offsets = [0, 1, 0], sizes = [8, 8, 2], strides = [1, 1, 1]} : vector<8x16x2xf32> to vector<8x8x2xf32>
    %158 = vector.shape_cast %157 : vector<8x8x2xf32> to vector<64x2xf32>
    %159 = tpu.transpose %158, [1, 0] : vector<64x2xf32> -> vector<2x64xf32>
    %c0_67 = arith.constant 0 : index
    %c0_68 = arith.constant 0 : index
    %c0_69 = arith.constant 0 : index
    %160 = vector.load %arg8[%c0_67, %c0_68, %c0_69] : memref<1x2x64xf32, #tpu.memory_space<vmem>>, vector<1x2x64xf32>
    %161 = vector.shape_cast %160 : vector<1x2x64xf32> to vector<2x64xf32>
    %162 = vector.shape_cast %159 : vector<2x64xf32> to vector<1x2x64xf32>
    tpu.vector_store %arg8[%c0_67, %c0_68, %c0_69], %162 {strides = array<i32>} : memref<1x2x64xf32, #tpu.memory_space<vmem>>, vector<1x2x64xf32>,
    return
  }
  func.func @transform_0(%arg0: i32) -> (i32, i32, i32, i32) {
    %c0_i32 = arith.constant 0 : i32
    %c0_i32_0 = arith.constant 0 : i32
    %c0_i32_1 = arith.constant 0 : i32
    %c0_i32_2 = arith.constant 0 : i32
    return %arg0, %c0_i32, %c0_i32_0, %c0_i32_1 : i32, i32, i32, i32
  }
  func.func @transform_1(%arg0: i32) -> (i32, i32) {
    %c0_i32 = arith.constant 0 : i32
    %c0_i32_0 = arith.constant 0 : i32
    %c0_i32_1 = arith.constant 0 : i32
    return %c0_i32, %c0_i32_0 : i32, i32
  }
  func.func @transform_2(%arg0: i32) -> (i32, i32) {
    %c0_i32 = arith.constant 0 : i32
    %c0_i32_0 = arith.constant 0 : i32
    %c0_i32_1 = arith.constant 0 : i32
    return %c0_i32, %c0_i32_0 : i32, i32
  }
  func.func @transform_3(%arg0: i32) -> (i32, i32) {
    %c0_i32 = arith.constant 0 : i32
    %c0_i32_0 = arith.constant 0 : i32
    %c0_i32_1 = arith.constant 0 : i32
    return %c0_i32, %c0_i32_0 : i32, i32
  }
  func.func @transform_4(%arg0: i32) -> (i32, i32) {
    %c0_i32 = arith.constant 0 : i32
    %c0_i32_0 = arith.constant 0 : i32
    %c0_i32_1 = arith.constant 0 : i32
    return %c0_i32, %c0_i32_0 : i32, i32
  }
  func.func @transform_5(%arg0: i32) -> (i32, i32) {
    %c0_i32 = arith.constant 0 : i32
    %c0_i32_0 = arith.constant 0 : i32
    %c0_i32_1 = arith.constant 0 : i32
    return %c0_i32, %c0_i32_0 : i32, i32
  }
  func.func @transform_6(%arg0: i32) -> (i32, i32) {
    %c0_i32 = arith.constant 0 : i32
    %c0_i32_0 = arith.constant 0 : i32
    %c0_i32_1 = arith.constant 0 : i32
    return %c0_i32, %c0_i32_0 : i32, i32
  }
  func.func @transform_7(%arg0: i32) -> (i32, i32, i32) {
    %c0_i32 = arith.constant 0 : i32
    %c0_i32_0 = arith.constant 0 : i32
    %c0_i32_1 = arith.constant 0 : i32
    return %arg0, %c0_i32, %c0_i32_0 : i32, i32, i32
  }
}

</mosaic_0001>

<bundles_post_ra>
// kernel: tpu_custom_call.1
= control target key start
LH: loop header
LB: loop body
LE: loop exit
PB: predicated region body
PF: predicated region fallthrough
CT: control target
= control target key end

     0   :  { %s9527_s0 = inlined_call_operand.hbm [shape: f32[2,18,18,1], index: 0, kind: input, shape index: {}]   ;;  %s9528_s1 = inlined_call_operand.hbm [shape: f32[9,64], index: 1, kind: input, shape index: {}]   ;;  %s9529_s2 = inlined_call_operand.hbm [shape: f32[1,64], index: 2, kind: input, shape index: {}]   ;;  %s9530_s3 = inlined_call_operand.hbm [shape: bf16[576,128], index: 3, kind: input, shape index: {}]   ;;  %s9531_s4 = inlined_call_operand.hbm [shape: f32[1,128], index: 4, kind: input, shape index: {}]   ;;  %s9532_s5 = inlined_call_operand.hbm [shape: bf16[128,18], index: 5, kind: input, shape index: {}]   ;;  %s9533_s6 = inlined_call_operand.hbm [shape: f32[1,2], index: 6, kind: input, shape index: {}]   ;;  %s9534_s7 = inlined_call_operand.hbm [shape: f32[2,2,64], index: 7, kind: output, shape index: {}]  }
   0x1   :  { %9564 = sst [smem:[#allocation32_spill]] %s9528_s1 }
   0x2   :  { %12 = vsyncpa [#allocation6], 0 }
   0x3   :  { %14 = vsyncpa [#allocation6 + $0x1], 0 }
   0x4   :  { %15 = vsyncpa [#allocation9], 0 }
   0x5   :  { %16 = vsyncpa [#allocation12], 0 }
   0x6   :  { %17 = vsyncpa [#allocation15], 0 }
   0x7   :  { %18 = vsyncpa [#allocation7], 0 }
   0x8   :  { %20 = vsyncpa [#allocation7 + $0x1], 0  ;;  %s6143_s24 = smov 0   ;;  %s6145_s25 = smov 0  }
   0x9   :  { %s6147_s26 = smov 0   ;;  %s6149_s27 = smov 0  }
   0xa LB: > { %s6080_s28 = smov [#allocation8]   ;;  %s6164_s30 = sadd.s32 4294967295, %s6078_s27   ;;  %s6078_s27 = sphi %s6149_s27, %s9654_s27   ;;  %s6074_s26 = sphi %s6147_s26, %s9653_s26   ;;  %s6070_s25 = sphi %s6145_s25, %s9652_s25   ;;  %s6066_s24 = sphi %s6143_s24, %s9651_s24  }
   0xb   : > { %s221_s29 = sshll.u32 %s6080_s28, 4  ;;  %p5160_p0 = scmp.ge.s32.totalorder %s6078_s27, 1  ;;  %s6169_s29 = int_to_ptr.vmem [resolvable:$true] %s221_s29 }
   0xc   : > { %p9535_p1 = scmp.eq.s32.totalorder %s6164_s30, 0  ;;  %p209_p2 = scmp.lt.s32.totalorder %s6078_s27, 3 }
   0xd   : > { %s6081_s9 = smov [#allocation11]   ;;  %s6082_s12 = smov [#allocation14]  }
   0xe   : > { %p6171_p3 = pnand %p5160_p0, %p209_p2  ;;  %s245_s10 = sshll.u32 %s6081_s9, 4  ;;  %s6184_s10 = int_to_ptr.vmem [resolvable:$true] %s245_s10 }
   0xf   : > { %s6186_s13 = sshll.u32 %s6082_s12, 4  ;;  %s9567_s1 = sld [smem:[#allocation32_spill]]  ;;  %s270_s13 = int_to_ptr.vmem [resolvable:$true] %s6186_s13 }
  0x10   : > { %s9565_s8 = scalar_select %p6171_p3, 1, 0 }
  0x11   : > { %p5508_p5 = pneg %p6171_p3 }
  0x13   : > { %p6180_p6 = pnand %p5508_p5, %p9535_p1 }
  0x15   : > { %s5802_s16 = scalar_lea.hbm %s9567_s1, 256  ;;  %p6196_p8 = pneg %p6180_p6 }
  0x16   : > { %p5803_p7 = scmp.ne.s32.totalorder %s9567_s1, %s5802_s16  ;;  %p5809_p11 = scmp.lt.u32.totalorder %s5802_s16, %s9567_s1 }
  0x18   : > { %p5805_p9 = pnand %p6196_p8, %p5803_p7 }
  0x1a   : > { %p5806_p10 = pneg %p5805_p9 }
  0x1c   : > { %p5811_p12 = pnand %p5809_p11, %p5806_p10 }
  0x1e   : > { %5814 = shalt.err (!%p5811_p12)
}
  0x1f   : > { %s5815_s22 = scalar_lea.vmem %s6169_s29, 256  ;;  %p5823_p5 = scmp.lt.s32.totalorder %s6169_s29, %s6169_s29 }
  0x20   : > { %p5816_p13 = scmp.ne.s32.totalorder %s6169_s29, %s5815_s22  ;;  %p5824_p4 = scmp.lt.s32.totalorder %s5815_s22, %s5815_s22 }
  0x22   : > { %p5818_p0 = pnand %p5816_p13, %p6196_p8  ;;  %p5825_p7 = por %p5824_p4, %p5823_p5 }
  0x24   : > { %p5819_p2 = pneg %p5818_p0 }
  0x26   : > { %p5826_p9 = pnand %p5825_p7, %p5819_p2 }
  0x28   : > { %5829 = shalt.err (!%p5826_p9)
}
  0x29   : > { %s9537_s23 = smov 128   ;;  %s9538_s28 = smov 8  }
  0x2a   : > { %5511 = dma.hbm_to_vmem [thread:$0]  (!%p6180_p6), %s9567_s1, 256, %s6169_s29, [#allocation9], %s9537_s23, %s9537_s23, %s9538_s28  }
  0x2b   : > { %s5830_s16 = scalar_lea.hbm %s9530_s3, 4608 }
  0x2c   : > { %p5831_p4 = scmp.ne.s32.totalorder %s9530_s3, %s5830_s16  ;;  %p5837_p12 = scmp.lt.u32.totalorder %s5830_s16, %s9530_s3 }
  0x2e   : > { %p5833_p10 = pnand %p5831_p4, %p6196_p8 }
  0x30   : > { %p5834_p11 = pneg %p5833_p10 }
  0x32   : > { %p5839_p13 = pnand %p5837_p12, %p5834_p11 }
  0x34   : > { %5842 = shalt.err (!%p5839_p13)
}
  0x35   : > { %s5843_s29 = scalar_lea.vmem %s6184_s10, 4608  ;;  %p5851_p7 = scmp.lt.s32.totalorder %s6184_s10, %s6184_s10 }
  0x36   : > { %p5844_p0 = scmp.ne.s32.totalorder %s6184_s10, %s5843_s29  ;;  %p5852_p9 = scmp.lt.s32.totalorder %s5843_s29, %s5843_s29 }
  0x38   : > { %p5846_p2 = pnand %p5844_p0, %p6196_p8  ;;  %p5853_p4 = por %p5852_p9, %p5851_p7 }
  0x3a   : > { %p5847_p5 = pneg %p5846_p2 }
  0x3c   : > { %p5854_p10 = pnand %p5853_p4, %p5847_p5 }
  0x3e   : > { %5857 = shalt.err (!%p5854_p10)
}
  0x3f   : > { %s6085_s22 = smov 64   ;;  %s6086_s9 = smov 4  }
  0x40   : > { %5517 = dma.hbm_to_vmem [thread:$0]  (!%p6180_p6), %s9530_s3, 4608, %s6184_s10, [#allocation12], %s6085_s22, %s6085_s22, %s6086_s9  }
  0x41   : > { %s5858_s17 = scalar_lea.hbm %s9532_s5, 1024 }
  0x42   : > { %p5859_p11 = scmp.ne.s32.totalorder %s9532_s5, %s5858_s17  ;;  %p5865_p0 = scmp.lt.u32.totalorder %s5858_s17, %s9532_s5 }
  0x44   : > { %p5861_p12 = pnand %p5859_p11, %p6196_p8 }
  0x46   : > { %p5862_p13 = pneg %p5861_p12 }
  0x48   : > { %p5867_p2 = pnand %p5865_p0, %p5862_p13 }
  0x4a   : > { %5870 = shalt.err (!%p5867_p2)
}
  0x4b   : > { %s5871_s12 = scalar_lea.vmem %s270_s13, 1024  ;;  %p5879_p4 = scmp.lt.s32.totalorder %s270_s13, %s270_s13 }
  0x4c   : > { %p5872_p5 = scmp.ne.s32.totalorder %s270_s13, %s5871_s12  ;;  %p5880_p10 = scmp.lt.s32.totalorder %s5871_s12, %s5871_s12 }
  0x4e   : > { %p5874_p7 = pnand %p5872_p5, %p6196_p8  ;;  %p5881_p1 = por %p5880_p10, %p5879_p4 }
  0x50   : > { %p5875_p9 = pneg %p5874_p7 }
  0x52   : > { %p5882_p3 = pnand %p5881_p1, %p5875_p9 }
  0x54   : > { %5885 = shalt.err (!%p5882_p3)
}
  0x55   : > { %5523 = dma.hbm_to_vmem [thread:$0]  (!%p6180_p6), %s9532_s5, 1024, %s270_s13, [#allocation15], %s6085_s22, %s6085_s22, %s6086_s9  }
  0x56   : > { %s6087_s15 = smov [#allocation10]   ;;  %s6088_s17 = smov [#allocation13]  }
  0x57   : > { %s235_s16 = sshll.u32 %s6087_s15, 4  ;;  %s259_s18 = sshll.u32 %s6088_s17, 4  ;;  %s236_s16 = int_to_ptr.vmem [resolvable:$true] %s235_s16  ;;  %s260_s18 = int_to_ptr.vmem [resolvable:$true] %s259_s18 }
  0x58   : > { %s5886_s29 = scalar_lea.hbm %s9529_s2, 16 }
  0x59   : > { %p5887_p1 = scmp.ne.s32.totalorder %s9529_s2, %s5886_s29  ;;  %p5893_p12 = scmp.lt.u32.totalorder %s5886_s29, %s9529_s2 }
  0x5b   : > { %p5889_p3 = pnand %p5887_p1, %p6196_p8 }
  0x5d   : > { %p5890_p11 = pneg %p5889_p3 }
  0x5f   : > { %p5895_p13 = pnand %p5893_p12, %p5890_p11 }
  0x61   : > { %5898 = shalt.err (!%p5895_p13)
}
  0x62   : > { %s5899_s13 = scalar_lea.vmem %s236_s16, 16  ;;  %s5906_s22 = scalar_lea.vmem %s236_s16, 32 }
  0x63   : > { %p5900_p0 = scmp.ne.s32.totalorder %s236_s16, %s5899_s13  ;;  %p5907_p7 = scmp.lt.s32.totalorder %s236_s16, %s236_s16 }
  0x64   : > { %p5908_p9 = scmp.lt.s32.totalorder %s5906_s22, %s5899_s13 }
  0x65   : > { %p5902_p2 = pnand %p5900_p0, %p6196_p8 }
  0x66   : > { %p5909_p4 = por %p5908_p9, %p5907_p7 }
  0x67   : > { %p5903_p5 = pneg %p5902_p2 }
  0x69   : > { %p5910_p10 = pnand %p5909_p4, %p5903_p5 }
  0x6b   : > { %5913 = shalt.err (!%p5910_p10)
}
  0x6c   : > { %5514 = dma.hbm_to_vmem [thread:$0]  (!%p6180_p6), %s9529_s2, 16, %s236_s16, [#allocation9]  }
  0x6d   : > { %s5914_s15 = scalar_lea.hbm %s9531_s4, 16 }
  0x6e   : > { %p5915_p1 = scmp.ne.s32.totalorder %s9531_s4, %s5914_s15  ;;  %p5921_p12 = scmp.lt.u32.totalorder %s5914_s15, %s9531_s4 }
  0x70   : > { %p5917_p3 = pnand %p5915_p1, %p6196_p8 }
  0x72   : > { %p5918_p11 = pneg %p5917_p3 }
  0x74   : > { %p5923_p13 = pnand %p5921_p12, %p5918_p11 }
  0x76   : > { %5926 = shalt.err (!%p5923_p13)
}
  0x77   : > { %s5927_s12 = scalar_lea.vmem %s260_s18, 16  ;;  %s5934_s16 = scalar_lea.vmem %s260_s18, 32 }
  0x78   : > { %p5928_p0 = scmp.ne.s32.totalorder %s260_s18, %s5927_s12  ;;  %p5935_p7 = scmp.lt.s32.totalorder %s260_s18, %s260_s18 }
  0x79   : > { %p5936_p9 = scmp.lt.s32.totalorder %s5934_s16, %s5927_s12 }
  0x7a   : > { %p5930_p2 = pnand %p5928_p0, %p6196_p8 }
  0x7b   : > { %p5937_p4 = por %p5936_p9, %p5935_p7 }
  0x7c   : > { %p5931_p5 = pneg %p5930_p2 }
  0x7e   : > { %p5938_p10 = pnand %p5937_p4, %p5931_p5 }
  0x80   : > { %5941 = shalt.err (!%p5938_p10)
}
  0x81   : > { %5520 = dma.hbm_to_vmem [thread:$0]  (!%p6180_p6), %s9531_s4, 16, %s260_s18, [#allocation12]  }
  0x82   : > { %s6089_s22 = smov [#allocation16]   ;;  %s5942_s14 = scalar_lea.hbm %s9533_s6, 16 }
  0x83   : > { %s283_s23 = sshll.u32 %s6089_s22, 4  ;;  %p5943_p1 = scmp.ne.s32.totalorder %s9533_s6, %s5942_s14  ;;  %s284_s23 = int_to_ptr.vmem [resolvable:$true] %s283_s23 }
  0x84   : > { %p5949_p12 = scmp.lt.u32.totalorder %s5942_s14, %s9533_s6 }
  0x85   : > { %p5945_p3 = pnand %p5943_p1, %p6196_p8 }
  0x87   : > { %p5946_p11 = pneg %p5945_p3 }
  0x89   : > { %p5951_p13 = pnand %p5949_p12, %p5946_p11 }
  0x8b   : > { %5954 = shalt.err (!%p5951_p13)
}
  0x8c   : > { %s5955_s18 = scalar_lea.vmem %s284_s23, 16  ;;  %s5962_s29 = scalar_lea.vmem %s284_s23, 32 }
  0x8d   : > { %p5956_p0 = scmp.ne.s32.totalorder %s284_s23, %s5955_s18  ;;  %p5963_p7 = scmp.lt.s32.totalorder %s284_s23, %s284_s23 }
  0x8e   : > { %p5964_p9 = scmp.lt.s32.totalorder %s5962_s29, %s5955_s18 }
  0x8f   : > { %p5958_p2 = pnand %p5956_p0, %p6196_p8 }
  0x90   : > { %p5965_p4 = por %p5964_p9, %p5963_p7 }
  0x91   : > { %p5959_p5 = pneg %p5958_p2 }
  0x93   : > { %p5966_p10 = pnand %p5965_p4, %p5959_p5 }
  0x95   : > { %5969 = shalt.err (!%p5966_p10)
}
  0x96   : > { %5526 = dma.hbm_to_vmem [thread:$0]  (!%p6180_p6), %s9533_s6, 16, %s284_s23, [#allocation15]  }
  0x97   : > { %s5159_s19 = sadd.s32 4294967294, %s6078_s27   ;;  %s6318_s11 = sadd.s32 1, %s6078_s27  }
  0x98   : > { %s30_s10 = ssub.s32 %s6078_s27, %s6318_s11  ;;  %s33_s13 = sadd.s32 1, %s6074_s26 }
  0x99   : > { %p31_p8 = scmp.eq.s32.totalorder %s30_s10, 0  ;;  %p40_p1 = scmp.ne.s32.totalorder %s6074_s26, %s6070_s25 }
  0x9a   : > { %p41_p3 = scmp.eq.s32.totalorder %s6078_s27, 0  ;;  %p46_p11 = scmp.ne.s32.totalorder %s6070_s25, %s6066_s24 }
  0x9b   : > { %s6329_s22 = scalar_select %p31_p8, %s6074_s26, %s33_s13  }
  0x9c   : > { %p42_p12 = por %p41_p3, %p40_p1  ;;  %p9569_p13 = scmp.eq.s32.totalorder %s6164_s30, 0 }
  0x9d   : > { %p196_p6 = scmp.eq.s32.totalorder %s6164_s30, 1  ;;  %p202_p2 = scmp.eq.s32.totalorder %s5159_s19, 1 }
  0x9e   : > { %p6333_p0 = por %p9569_p13, %p46_p11  ;;  %p5541_p5 = scmp.lt.s32.totalorder %s6078_s27, 2 }
  0x9f   : > { %s294_s23 = sand.u32 1, %s6074_s26   ;;  %p6340_p7 = por %p196_p6, %p40_p1 }
  0xa0   : > { %p6344_p9 = por %p202_p2, %p46_p11  ;;  %s5477_s15 = smul.u32 432, %s294_s23 }
  0xa1   : > { %s9571_s28 = scalar_select %p6340_p7, 1, 0 }
  0xa2   : > { %s9572_s14 = scalar_select %p6344_p9, 1, 0 }
  0xa3   : > { %s5478_s17 = smul.u32 6912, %s6078_s27  ;;  %p6349_p4 = pnand %p5541_p5, %p42_p12 }
  0xa4   : > { %s298_s12 = scalar_lea.vmem [#allocation5], %s5477_s15  ;;  %s6360_s19 = scalar_lea.sflag [#allocation6], %s294_s23 }
  0xa5   : > { %s6356_s29 = scalar_lea.hbm %s9527_s0, %s5478_s17  ;;  %s305_s16 = sshll.u32 %s298_s12, 4  ;;  %s6358_s16 = int_to_ptr.vmem [resolvable:$true] %s305_s16 }
  0xa6   : > { %s5970_s10 = scalar_lea.hbm %s6356_s29, 6912  ;;  %p5972_p8 = pneg %p6349_p4 }
  0xa7   : > { %p5971_p10 = scmp.ne.s32.totalorder %s6356_s29, %s5970_s10  ;;  %s5975_s21 = scalar_lea.hbm %s9527_s0, 13824 }
  0xa8   : > { %p5976_p11 = scmp.lt.u32.totalorder %s6356_s29, %s9527_s0  ;;  %p5977_p12 = scmp.lt.u32.totalorder %s5975_s21, %s5970_s10 }
  0xa9   : > { %p5973_p1 = pnand %p5972_p8, %p5971_p10  ;;  %p5979_p6 = scmp.lt.u32.totalorder %s5970_s10, %s6356_s29 }
  0xaa   : > { %p5978_p13 = por %p5977_p12, %p5976_p11 }
  0xab   : > { %p5974_p3 = pneg %p5973_p1 }
  0xac   : > { %p5980_p2 = por %p5979_p6, %p5978_p13 }
  0xae   : > { %p5981_p5 = pnand %p5980_p2, %p5974_p3 }
  0xb0   : > { %5984 = shalt.err (!%p5981_p5)
}
  0xb1   : > { %s5985_s23 = scalar_lea.vmem %s6358_s16, 6912  ;;  %s6090_s15 = smov [#allocation5]  }
  0xb2   : > { %p5986_p10 = scmp.ne.s32.totalorder %s6358_s16, %s5985_s23  ;;  %s5990_s12 = sshll.u32 %s6090_s15, 4  ;;  %s5991_s12 = int_to_ptr.vmem [resolvable:$false] %s5990_s12 }
  0xb3   : > { %s5992_s1 = scalar_lea.vmem %s5991_s12, 13824  ;;  %p5993_p7 = scmp.lt.s32.totalorder %s6358_s16, %s5991_s12 }
  0xb4   : > { %p5988_p1 = pnand %p5986_p10, %p5972_p8  ;;  %p5994_p11 = scmp.lt.s32.totalorder %s5992_s1, %s5985_s23 }
  0xb6   : > { %p5989_p9 = pneg %p5988_p1  ;;  %p5995_p12 = por %p5994_p11, %p5993_p7 }
  0xb8   : > { %p5996_p13 = pnand %p5995_p12, %p5989_p9 }
  0xba   : > { %5999 = shalt.err (!%p5996_p13)
}
  0xbb   : > { %s9574_s10 = smov 8   ;;  %s9575_s13 = smov 128  }
  0xbc   : > { %5530 = dma.hbm_to_vmem [thread:$0]  (!%p6349_p4), %s6356_s29, 6912, %s6358_s16, %s6360_s19, %s9575_s13, %s9575_s13, %s9574_s10  }
  0xbd   : > { %p9576_p8 = scmp.ne.s32.totalorder %s9565_s8, 0 }
  0xbf   : > { %317 = sbr.rel (%p9576_p8) target bundleno = 1776 (0x6f0), region = 48 }
  0xc6   : > { %s6394_s17 = sand.u32 1, %s6070_s25  }
  0xc7   : > { %s5479_s21 = smul.u32 432, %s6394_s17  ;;  %s320_s18 = scalar_lea.sflag [#allocation6], %s6394_s17 }
  0xc9   : > { %s6398_s23 = scalar_lea.vmem [#allocation5], %s5479_s21 }
  0xca   : > { %6045 = dma.done.wait (%p6333_p0), %s320_s18, 6912  }
  0xcb   : > { %6047 = vsyncadd (%p6333_p0), %s320_s18, 4294960384  ;;  %p9577_p7 = scmp.eq.s32.totalorder %s6164_s30, 0 }
  0xcd   : > { %6049 = dma.done.wait (%p9577_p7), [#allocation9], 272   ;;  %p9578_p9 = pmov %p9577_p7 }
  0xce   : > { %p9579_p4 = pmov %p9577_p7 }
  0xcf   : > { %6051 = vsyncadd (%p9578_p9), [#allocation9], 4294967024 }
  0xd0   : > { %6053 = dma.done.wait (%p9579_p4), [#allocation12], 4624   ;;  %p9580_p3 = pmov %p9579_p4 }
  0xd2   : > { %6055 = vsyncadd (%p9580_p3), [#allocation12], 4294962672  ;;  %p9581_p6 = pmov %p9580_p3 }
  0xd3   : > { %p9582_p2 = pmov %p9580_p3 }
  0xd4   : > { %6057 = dma.done.wait (%p9581_p6), [#allocation15], 1040  }
  0xd5   : > { %6059 = vsyncadd (%p9582_p2), [#allocation15], 4294966256  ;;  %vm379_vm0 = vcmask 523264   ;;  %v6091_v0 = vmov 0.0   ;;  %v6092_v1 = vmov 0   ;;  %v437_v2 = vld [vmem:[%s6398_s23 + $0x18] sm:$0xff]  ;;  %v657_v56 = vlaneseq }
  0xd6   : > { %381 = vst.msk [vmem:[#allocation3 + $0x8] sm:$0xff] %vm379_vm0, %v6091_v0  ;;  %382 = vst.msk [vmem:[#allocation3 + $0x10] sm:$0xff] %vm379_vm0, %v6091_v0  ;;  %5603 = vset.pattern.permute.xlu1 %v6092_v1  ;;  %5602 = vset.pattern.permute.xlu0 %v6092_v1  ;;  %v434_v3 = vld [vmem:[%s6398_s23] sm:$0xff]  ;;  %v435_v5 = vld [vmem:[%s6398_s23 + $0x8] sm:$0xff]  ;;  %vm905_vm1 = vcmask 1046528   ;;  %vm1150_vm2 = vcmask 1045504  }
  0xd7   : > { %383 = vst.msk [vmem:[#allocation3 + $0x18] sm:$0xff] %vm379_vm0, %v6091_v0  ;;  %385 = vst.msk [vmem:[#allocation3 + $0xa0] sm:$0xff] %vm379_vm0, %v6091_v0  ;;  %509 = vperm.xlu1 %5603, %v437_v2   ;;  %499 = vperm.xlu0 %5602, %v434_v3   ;;  %v438_v4 = vld [vmem:[%s6398_s23 + $0x20] sm:$0xff]  ;;  %v439_v6 = vld [vmem:[%s6398_s23 + $0x28] sm:$0x3]  ;;  %v6476_v57 = vshrl.u32 %v657_v56, 7 }
  0xd8   : > { %386 = vst.msk [vmem:[#allocation3 + $0xa8] sm:$0xff] %vm379_vm0, %v6091_v0  ;;  %387 = vst.msk [vmem:[#allocation3 + $0xb0] sm:$0xff] %vm379_vm0, %v6091_v0  ;;  %v436_v7 = vld [vmem:[%s6398_s23 + $0x10] sm:$0x3]  ;;  %v441_v8 = vld [vmem:[%s6398_s23 + $0x38] sm:$0xff]  ;;  %vm390_vm3 = vcmask 516096  }
  0xd9   : > { %408 = vst [vmem:[#allocation4] sm:$0xff] %v6091_v0  ;;  %418 = vst [vmem:[#allocation4 + $0x20] sm:$0x1] %v6091_v0  ;;  %v440_v9 = vld [vmem:[%s6398_s23 + $0x30] sm:$0xff]  ;;  %v443_v11 = vld [vmem:[%s6398_s23 + $0x48] sm:$0xff]  ;;  %v659_v58 = vsub.s32 0, %v6476_v57 }
  0xda   : > { %419 = vst [vmem:[#allocation4 + $0x30] sm:$0x1] %v6091_v0  ;;  %420 = vst [vmem:[#allocation4 + $0x40] sm:$0x1] %v6091_v0  ;;  %v444_v10 = vld [vmem:[%s6398_s23 + $0x50] sm:$0xff]  ;;  %v447_v14 = vld [vmem:[%s6398_s23 + $0x68] sm:$0xff] }
  0xdb   : > { %421 = vst [vmem:[#allocation4 + $0x50] sm:$0x1] %v6091_v0  ;;  %422 = vst [vmem:[#allocation4 + $0x60] sm:$0x1] %v6091_v0  ;;  %514 = vperm.xlu1 %5603, %v438_v4   ;;  %504 = vperm.xlu0 %5602, %v435_v5   ;;  %v445_v12 = vld [vmem:[%s6398_s23 + $0x58] sm:$0x3] }
  0xdc   : > { %423 = vst [vmem:[#allocation4 + $0x70] sm:$0x1] %v6091_v0  ;;  %424 = vst [vmem:[#allocation4 + $0x80] sm:$0x1] %v6091_v0  ;;  %v442_v13 = vld [vmem:[%s6398_s23 + $0x40] sm:$0x3] }
  0xdd   : > { %425 = vst [vmem:[#allocation4 + $0x90] sm:$0x1] %v6091_v0  ;;  %426 = vst [vmem:[#allocation4 + $0x29] sm:$0x7f] %v6091_v0  ;;  %v446_v15 = vld [vmem:[%s6398_s23 + $0x60] sm:$0xff]  ;;  %v449_v16 = vld [vmem:[%s6398_s23 + $0x78] sm:$0xff] }
  0xde   : > { %427 = vst [vmem:[#allocation4 + $0x39] sm:$0x7f] %v6091_v0  ;;  %428 = vst [vmem:[#allocation4 + $0x49] sm:$0x7f] %v6091_v0  ;;  %v448_v17 = vld [vmem:[%s6398_s23 + $0x70] sm:$0x3] }
  0xdf   : > { %429 = vst [vmem:[#allocation4 + $0x59] sm:$0x7f] %v6091_v0  ;;  %430 = vst [vmem:[#allocation4 + $0x69] sm:$0x7f] %v6091_v0  ;;  %732 = vperm.xlu1 %5603, %v439_v6   ;;  %727 = vperm.xlu0 %5602, %v436_v7   ;;  %v451_v18 = vld [vmem:[%s6398_s23 + $0x88] sm:$0x3] }
  0xe0   : > { %431 = vst [vmem:[#allocation4 + $0x79] sm:$0x7f] %v6091_v0  ;;  %432 = vst [vmem:[#allocation4 + $0x89] sm:$0x7f] %v6091_v0  ;;  %v450_v19 = vld [vmem:[%s6398_s23 + $0x80] sm:$0xff]  ;;  %v453_v20 = vld [vmem:[%s6398_s23 + $0x98] sm:$0xff] }
  0xe1   : > { %433 = vst [vmem:[#allocation4 + $0x99] sm:$0x7f] %v6091_v0  ;;  %v452_v21 = vld [vmem:[%s6398_s23 + $0x90] sm:$0xff]  ;;  %v455_v22 = vld [vmem:[%s6398_s23 + $0xa8] sm:$0xff]  ;;  %v454_v23 = vld [vmem:[%s6398_s23 + $0xa0] sm:$0x3] }
  0xe2   : > { %v457_v24 = vld [vmem:[%s6398_s23 + $0xb8] sm:$0x3]  ;;  %v456_v25 = vld [vmem:[%s6398_s23 + $0xb0] sm:$0xff]  ;;  %v459_v26 = vld [vmem:[%s6398_s23 + $0xc8] sm:$0xff]  ;;  %v807_v59 = vsub.s32 1, %v6476_v57  ;;  %v1052_v60 = vsub.s32 2, %v6476_v57 }
  0xe3   : > { %524 = vperm.xlu1 %5603, %v441_v8   ;;  %519 = vperm.xlu0 %5602, %v440_v9   ;;  %v458_v27 = vld [vmem:[%s6398_s23 + $0xc0] sm:$0xff]  ;;  %v461_v28 = vld [vmem:[%s6398_s23 + $0xd8] sm:$0xff]  ;;  %v460_v29 = vld [vmem:[%s6398_s23 + $0xd0] sm:$0x3]  ;;  %v1307_v62 = vsub.s32 3, %v6476_v57  ;;  %v1380_v63 = vsub.s32 4, %v6476_v57 }
  0xe4   : > { %v463_v30 = vld [vmem:[%s6398_s23 + $0xe8] sm:$0x3]  ;;  %v462_v31 = vld [vmem:[%s6398_s23 + $0xe0] sm:$0xff]  ;;  %v465_v32 = vld [vmem:[%s6398_s23 + $0xf8] sm:$0xff]  ;;  %v1624_v0 = vsub.s32 5, %v6476_v57  ;;  %v1878_v6 = vsub.s32 6, %v6476_v57 }
  0xe5   : > { %v464_v33 = vld [vmem:[%s6398_s23 + $0xf0] sm:$0xff]  ;;  %v467_v34 = vld [vmem:[%s6398_s23 + $0x108] sm:$0xff]  ;;  %v466_v35 = vld [vmem:[%s6398_s23 + $0x100] sm:$0x3]  ;;  %s6093_s8 = smov 64   ;;  %vm399_vm4 = vcmask 522240  }
  0xe6   : > { %v469_v36 = vld [vmem:[%s6398_s23 + $0x118] sm:$0x3]  ;;  %v468_v37 = vld [vmem:[%s6398_s23 + $0x110] sm:$0xff]  ;;  %v471_v38 = vld [vmem:[%s6398_s23 + $0x128] sm:$0xff]  ;;  %vm3057_vm5 = vsmask.f32 4352 }
  0xe7   : > { %534 = vperm.xlu1 %5603, %v444_v10   ;;  %529 = vperm.xlu0 %5602, %v443_v11   ;;  %v470_v39 = vld [vmem:[%s6398_s23 + $0x120] sm:$0xff]  ;;  %v473_v40 = vld [vmem:[%s6398_s23 + $0x138] sm:$0xff]  ;;  %v472_v41 = vld [vmem:[%s6398_s23 + $0x130] sm:$0x3]  ;;  %s6094_s9 = smov 126   ;;  %s6095_s20 = smov 124  }
  0xe8   : > { %v475_v42 = vld [vmem:[%s6398_s23 + $0x148] sm:$0x3]  ;;  %v474_v43 = vld [vmem:[%s6398_s23 + $0x140] sm:$0xff]  ;;  %v477_v44 = vld [vmem:[%s6398_s23 + $0x158] sm:$0xff]  ;;  %s6096_s29 = smov 122   ;;  %s6097_s16 = smov 116  }
  0xe9   : > { %v476_v45 = vld [vmem:[%s6398_s23 + $0x150] sm:$0xff]  ;;  %v479_v46 = vld [vmem:[%s6398_s23 + $0x168] sm:$0xff]  ;;  %v478_v47 = vld [vmem:[%s6398_s23 + $0x160] sm:$0x3]  ;;  %s6098_s19 = smov 114   ;;  %s6099_s15 = smov 118  }
  0xea   : > { %v481_v48 = vld [vmem:[%s6398_s23 + $0x178] sm:$0x3]  ;;  %v480_v49 = vld [vmem:[%s6398_s23 + $0x170] sm:$0xff]  ;;  %v483_v50 = vld [vmem:[%s6398_s23 + $0x188] sm:$0xff]  ;;  %s6100_s12 = smov 112   ;;  %s6101_s1 = smov 120  }
  0xeb   : > { %742 = vperm.xlu1 %5603, %v445_v12   ;;  %737 = vperm.xlu0 %5602, %v442_v13   ;;  %v482_v51 = vld [vmem:[%s6398_s23 + $0x180] sm:$0xff]  ;;  %v485_v52 = vld [vmem:[%s6398_s23 + $0x198] sm:$0xff]  ;;  %v484_v53 = vld [vmem:[%s6398_s23 + $0x190] sm:$0x3]  ;;  %vm4918_vm6 = vcmask 1040384   ;;  %s5176_s10 = sshll.u32 %s6394_s17, 1 }
  0xec   : > { %v487_v54 = vld [vmem:[%s6398_s23 + $0x1a8] sm:$0x3]  ;;  %v486_v55 = vld [vmem:[%s6398_s23 + $0x1a0] sm:$0xff]  ;;  %s5234_s13 = sshll.u32 %s6164_s30, 5  ;;  %s377_s21 = scalar_lea.vmem [#allocation17], %s5176_s10  ;;  %vm5016_vm7 = vcmask 517120  }
  0xed   : > { %v6481_v61 = vld [vmem:[#allocation8] sm:$0xff]  ;;  %s5032_s18 = sshll.u32 %s377_s21, 4  ;;  %p9648_p5 = scmp.ne.s32.totalorder %s9571_s28, 0  ;;  %s9485_s18 = int_to_ptr.vmem [resolvable:$true] %s5032_s18 }
  0xee   : > { %v6487_v1 = vrot.slane %v6481_v61, %v659_v58  ;;  %v6490_v2 = vrot.slane %v6481_v61, %v807_v59  ;;  %v6493_v3 = vrot.slane %v6481_v61, %v1052_v60  ;;  %v6497_v7 = vrot.slane %v6481_v61, %v1307_v62  ;;  %s6102_s30 = smov [#allocation17]  }
  0xef   : > { %544 = vperm.xlu1 %5603, %v447_v14   ;;  %539 = vperm.xlu0 %5602, %v446_v15   ;;  %v6500_v8 = vrot.slane %v6481_v61, %v1380_v63  ;;  %v6503_v9 = vrot.slane %v6481_v61, %v1624_v0 }
  0xf3   : > { %549 = vperm.xlu1 %5603, %v449_v16   ;;  %747 = vperm.xlu0 %5602, %v448_v17   ;;  %v6512_v17 = vld [vmem:[#allocation10] ss:$0 sm:$0xff] }
  0xf7   : > { %752 = vperm.xlu1 %5603, %v451_v18   ;;  %554 = vperm.xlu0 %5602, %v450_v19   ;;  %v6517_v19 = vrot.slane %v6481_v61, %v1878_v6 }
  0xfb   : > { %564 = vperm.xlu1 %5603, %v453_v20   ;;  %559 = vperm.xlu0 %5602, %v452_v21   ;;  %v1951_v20 = vsub.s32 7, %v6476_v57 }
  0xff   : > { %569 = vperm.xlu1 %5603, %v455_v22   ;;  %757 = vperm.xlu0 %5602, %v454_v23  }
 0x103   : > { %762 = vperm.xlu1 %5603, %v457_v24   ;;  %574 = vperm.xlu0 %5602, %v456_v25  }
 0x107   : > { %584 = vperm.xlu1 %5603, %v459_v26   ;;  %579 = vperm.xlu0 %5602, %v458_v27  }
 0x10b   : > { %589 = vperm.xlu1 %5603, %v461_v28   ;;  %767 = vperm.xlu0 %5602, %v460_v29  }
 0x10f   : > { %772 = vperm.xlu1 %5603, %v463_v30   ;;  %594 = vperm.xlu0 %5602, %v462_v31  }
 0x113   : > { %604 = vperm.xlu1 %5603, %v465_v32   ;;  %599 = vperm.xlu0 %5602, %v464_v33  }
 0x117   : > { %609 = vperm.xlu1 %5603, %v467_v34   ;;  %777 = vperm.xlu0 %5602, %v466_v35  }
 0x11b   : > { %782 = vperm.xlu1 %5603, %v469_v36   ;;  %614 = vperm.xlu0 %5602, %v468_v37  }
 0x11f   : > { %624 = vperm.xlu1 %5603, %v471_v38   ;;  %619 = vperm.xlu0 %5602, %v470_v39  }
 0x123   : > { %629 = vperm.xlu1 %5603, %v473_v40   ;;  %787 = vperm.xlu0 %5602, %v472_v41  }
 0x127   : > { %792 = vperm.xlu1 %5603, %v475_v42   ;;  %634 = vperm.xlu0 %5602, %v474_v43  }
 0x12b   : > { %644 = vperm.xlu1 %5603, %v477_v44   ;;  %639 = vperm.xlu0 %5602, %v476_v45  }
 0x12f   : > { %649 = vperm.xlu1 %5603, %v479_v46   ;;  %797 = vperm.xlu0 %5602, %v478_v47  }
 0x133   : > { %802 = vperm.xlu1 %5603, %v481_v48   ;;  %654 = vperm.xlu0 %5602, %v480_v49  }
 0x137   : > { %1302 = vperm.xlu1 %5603, %v483_v50   ;;  %1297 = vperm.xlu0 %5602, %v482_v51  }
 0x13b   : > { %1868 = vperm.xlu1 %5603, %v485_v52   ;;  %1375 = vperm.xlu0 %5602, %v484_v53  }
 0x13f   : > { %1946 = vperm.xlu1 %5603, %v487_v54   ;;  %1873 = vperm.xlu0 %5602, %v486_v55  }
 0x156   : > { %v510_v4 = vpop.permute.xlu1 %509  ;;  %v500_v5 = vpop.permute.xlu0 %499 }
 0x157   : > { %v663_v10 = vmul.f32 %v6487_v1, %v510_v4  ;;  %v812_v11 = vmul.f32 %v6490_v2, %v510_v4  ;;  %v661_v12 = vmul.f32 %v6487_v1, %v500_v5  ;;  %v809_v13 = vmul.f32 %v6490_v2, %v500_v5 }
 0x158   : > { %v1054_v14 = vmul.f32 %v6493_v3, %v500_v5  ;;  %v1057_v21 = vmul.f32 %v6493_v3, %v510_v4  ;;  %v1309_v22 = vmul.f32 %v6497_v7, %v510_v4  ;;  %v1382_v23 = vmul.f32 %v6500_v8, %v510_v4 }
 0x159   : > { %v695_v25 = vadd.f32 %v6512_v17, %v663_v10  ;;  %v911_v26 = vrot.slane %v812_v11, 1  ;;  %v1626_v27 = vmul.f32 %v6503_v9, %v510_v4  ;;  %v693_v29 = vadd.f32 %v6512_v17, %v661_v12 }
 0x15a   : > { %v6510_v15 = vpop.permute.xlu1 %514  ;;  %v505_v16 = vpop.permute.xlu0 %504  ;;  %v906_v30 = vrot.slane %v809_v13, 1  ;;  %v1151_v31 = vrot.slane %v1054_v14, 2  ;;  %v1156_v43 = vrot.slane %v1057_v21, 2  ;;  %v1478_v44 = vrot.slane %v1382_v23, 1 }
 0x15b   : > { %v813_v18 = vmul.f32 %v6490_v2, %v6510_v15  ;;  %v810_v24 = vmul.f32 %v6490_v2, %v505_v16  ;;  %v1055_v28 = vmul.f32 %v6493_v3, %v505_v16  ;;  %v6530_v35 = vmul.f32 %v6500_v8, %v6510_v15 }
 0x15c   : > { %v1058_v39 = vmul.f32 %v6493_v3, %v6510_v15  ;;  %v1627_v40 = vmul.f32 %v6503_v9, %v6510_v15  ;;  %v662_v41 = vmul.f32 %v6487_v1, %v505_v16  ;;  %v1722_v45 = vrot.slane %v1626_v27, 2 }
 0x15d   : > { %v907_v32 = vrot.slane %v810_v24, 1  ;;  %v912_v34 = vrot.slane %v813_v18, 1  ;;  %v1152_v36 = vrot.slane %v1055_v28, 2  ;;  %v664_v47 = vmul.f32 %v6487_v1, %v6510_v15 }
 0x15e   : > { %v733_v33 = vpop.permute.xlu1 %732  ;;  %v728_v38 = vpop.permute.xlu0 %727  ;;  %v1479_v52 = vrot.slane %v6530_v35, 1  ;;  %v1157_v55 = vrot.slane %v1058_v39, 2  ;;  %v1723_v56 = vrot.slane %v1627_v40, 2  ;;  %v694_v57 = vadd.f32 %v6512_v17, %v662_v41 }
 0x15f   : > { %v814_v37 = vmul.f32 %v6490_v2, %v733_v33  ;;  %v908_v42 = vsel %vm905_vm1, %v906_v30, %v907_v32  ;;  %v1153_v48 = vsel %vm1150_vm2, %v1151_v31, %v1152_v36  ;;  %v1059_v50 = vmul.f32 %v6493_v3, %v733_v33 }
 0x160   : > { %v1018_v46 = vadd.f32 %v908_v42, %v693_v29  ;;  %v913_v51 = vsel %vm905_vm1, %v911_v26, %v912_v34  ;;  %v811_v54 = vmul.f32 %v6490_v2, %v728_v38  ;;  %v1056_v58 = vmul.f32 %v6493_v3, %v728_v38 }
 0x161   : > { %v914_v49 = vrot.slane %v814_v37, 1  ;;  %v1384_v60 = vmul.f32 %v6500_v8, %v733_v33  ;;  %v1628_v62 = vmul.f32 %v6503_v9, %v733_v33  ;;  %v1020_v5 = vadd.f32 %v913_v51, %v695_v25 }
 0x162   : > { %v1263_v53 = vadd.f32 %v1153_v48, %v1018_v46  ;;  %v909_v63 = vrot.slane %v811_v54, 1  ;;  %v6550_v0 = vpop.permute.xlu1 %524  ;;  %v520_v4 = vpop.permute.xlu0 %519  ;;  %v1159_v10 = vrot.slane %v1059_v50, 2  ;;  %v1154_v11 = vrot.slane %v1056_v58, 2 }
 0x163   : > { %v915_v6 = vsel %vm905_vm1, %v912_v34, %v914_v49  ;;  %v1480_v12 = vsel %vm905_vm1, %v1478_v44, %v1479_v52  ;;  %v696_v13 = vadd.f32 %v6512_v17, %v664_v47  ;;  %v6557_v16 = vrot.slane %v6481_v61, %v1951_v20  ;;  %v6565_v61 = vld [vmem:[#allocation8 + $0x8] ss:$0 sm:$0xff] }
 0x164   : > { %v1341_v59 = vadd.f32 %v1309_v22, %v1263_v53  ;;  %v910_v14 = vsel %vm905_vm1, %v907_v32, %v909_v63  ;;  %v1158_v18 = vsel %vm1150_vm2, %v1156_v43, %v1157_v55  ;;  %v1724_v21 = vsel %vm1150_vm2, %v1722_v45, %v1723_v56 }
 0x165   : > { %v1019_v23 = vadd.f32 %v910_v14, %v694_v57  ;;  %v1021_v24 = vadd.f32 %v915_v6, %v696_v13  ;;  %v1481_v25 = vrot.slane %v1384_v60, 1  ;;  %v1725_v26 = vrot.slane %v1628_v62, 2 }
 0x166   : > { %v1590_v22 = vadd.f32 %v1480_v12, %v1341_v59  ;;  %v1155_v27 = vsel %vm1150_vm2, %v1152_v36, %v1154_v11  ;;  %v1265_v28 = vadd.f32 %v1158_v18, %v1020_v5  ;;  %v1160_v29 = vsel %vm1150_vm2, %v1157_v55, %v1159_v10  ;;  %v6575_v35 = vpop.permute.xlu1 %534  ;;  %v530_v36 = vpop.permute.xlu0 %529 }
 0x167   : > { %v1310_v30 = vmul.f32 %v6497_v7, %v6510_v15  ;;  %v1264_v31 = vadd.f32 %v1155_v27, %v1019_v23  ;;  %v665_v20 = vmul.f32 %v6487_v1, %v520_v4  ;;  %v6569_v32 = vmul.f32 %v6490_v2, %v520_v4 }
 0x168   : > { %v6572_v33 = vmul.f32 %v6493_v3, %v520_v4  ;;  %v1311_v34 = vmul.f32 %v6497_v7, %v520_v4  ;;  %v1834_v37 = vadd.f32 %v1724_v21, %v1590_v22  ;;  %v6578_v38 = vmul.f32 %v6500_v8, %v520_v4 }
 0x169   : > { %v6581_v15 = vmul.f32 %v6503_v9, %v520_v4  ;;  %v6584_v39 = vmul.f32 %v6557_v16, %v520_v4  ;;  %v6586_v40 = vadd.f32 %v1160_v29, %v1021_v24  ;;  %v1482_v41 = vsel %vm905_vm1, %v1479_v52, %v1481_v25 }
 0x16a   : > { %v1726_v42 = vsel %vm1150_vm2, %v1723_v56, %v1725_v26  ;;  %v6591_v43 = vmul.f32 %v6565_v61, %v520_v4  ;;  %v1342_v44 = vadd.f32 %v1310_v30, %v1264_v31  ;;  %v1880_v45 = vmul.f32 %v6517_v19, %v520_v4  ;;  %v743_v60 = vpop.permute.xlu1 %742 }
 0x16b   : > { %v667_v46 = vmul.f32 %v6487_v1, %v530_v36  ;;  %v818_v47 = vmul.f32 %v6490_v2, %v530_v36  ;;  %v6597_v48 = vadd.f32 %v6512_v17, %v665_v20  ;;  %v916_v49 = vrot.slane %v6569_v32, 1 }
 0x16c   : > { %v6601_v51 = vadd.f32 %v1311_v34, %v1265_v28  ;;  %v1483_v52 = vrot.slane %v6578_v38, 1  ;;  %v1727_v53 = vrot.slane %v6581_v15, 2  ;;  %v6605_v54 = vadd.f32 %v1880_v45, %v1834_v37 }
 0x16d   : > { %v2049_v55 = vrot.slane %v6584_v39, 1  ;;  %v2293_v56 = vrot.slane %v6591_v43, 2  ;;  %v1063_v57 = vmul.f32 %v6493_v3, %v530_v36  ;;  %v6611_v58 = vmul.f32 %v6497_v7, %v530_v36 }
 0x16e   : > { %v819_v59 = vmul.f32 %v6490_v2, %v6575_v35  ;;  %v1591_v62 = vadd.f32 %v1482_v41, %v1342_v44  ;;  %v699_v63 = vadd.f32 %v6512_v17, %v667_v46  ;;  %v921_v4 = vrot.slane %v818_v47, 1 }
 0x16f   : > { %v1064_v5 = vmul.f32 %v6493_v3, %v6575_v35  ;;  %v1388_v6 = vmul.f32 %v6500_v8, %v530_v36  ;;  %v1632_v10 = vmul.f32 %v6503_v9, %v530_v36  ;;  %v6622_v12 = vmul.f32 %v6500_v8, %v6575_v35 }
 0x170   : > { %v922_v11 = vrot.slane %v819_v59, 1  ;;  %v1956_v13 = vmul.f32 %v6557_v16, %v530_v36  ;;  %v6627_v14 = vmul.f32 %v6503_v9, %v6575_v35  ;;  %v820_v18 = vmul.f32 %v6490_v2, %v743_v60 }
 0x171   : > { %v1065_v21 = vmul.f32 %v6493_v3, %v743_v60  ;;  %v1166_v22 = vrot.slane %v1063_v57, 2  ;;  %v2200_v23 = vmul.f32 %v6565_v61, %v530_v36  ;;  %v668_v24 = vmul.f32 %v6487_v1, %v6575_v35 }
 0x172   : > { %v6636_v25 = vmul.f32 %v6557_v16, %v6575_v35  ;;  %v6639_v26 = vmul.f32 %v6517_v19, %v530_v36  ;;  %v1167_v27 = vrot.slane %v1064_v5, 2  ;;  %v6643_v28 = vmul.f32 %v6565_v61, %v6575_v35 }
 0x173   : > { %v923_v29 = vsel %vm905_vm1, %v921_v4, %v922_v11  ;;  %v1835_v30 = vadd.f32 %v1726_v42, %v1591_v62  ;;  %v1488_v31 = vrot.slane %v1388_v6, 1  ;;  %v9541_v20 = vrot.slane %v6622_v12, 1 }
 0x174   : > { %v924_v34 = vrot.slane %v820_v18, 1  ;;  %v1732_v37 = vrot.slane %v1632_v10, 2  ;;  %v2054_v41 = vrot.slane %v1956_v13, 1  ;;  %v9540_v44 = vrot.slane %v6627_v14, 2 }
 0x175   : > { %v1169_v45 = vrot.slane %v1065_v21, 2  ;;  %v2298_v46 = vrot.slane %v2200_v23, 2  ;;  %v700_v36 = vadd.f32 %v6512_v17, %v668_v24  ;;  %v9543_v47 = vrot.slane %v6636_v25, 1 }
 0x176   : > { %v1024_v57 = vadd.f32 %v923_v29, %v699_v63  ;;  %v9542_v59 = vrot.slane %v6643_v28, 2  ;;  %v1168_v4 = vsel %vm1150_vm2, %v1166_v22, %v1167_v27  ;;  %v6653_v42 = vmul.f32 %v6500_v8, %v743_v60 }
 0x177   : > { %v6656_v62 = vmul.f32 %v6557_v16, %v743_v60  ;;  %v925_v5 = vsel %vm905_vm1, %v922_v11, %v924_v34  ;;  %v6662_v6 = vsel %vm905_vm1, %v1488_v31, %v9541_v20  ;;  %v6665_v10 = vmul.f32 %v6503_v9, %v743_v60 }
 0x178   : > { %v816_v63 = vmul.f32 %v6490_v2, %v6550_v0  ;;  %v6670_v13 = vsel %vm1150_vm2, %v1167_v27, %v1169_v45  ;;  %v6675_v18 = vsel %vm1150_vm2, %v1732_v37, %v9540_v44  ;;  %v666_v11 = vmul.f32 %v6487_v1, %v6550_v0  ;;  %v738_v45 = vpop.permute.xlu0 %737 }
 0x179   : > { %v1061_v21 = vmul.f32 %v6493_v3, %v6550_v0  ;;  %v6681_v22 = vadd.f32 %v1168_v4, %v1024_v57  ;;  %v1386_v24 = vmul.f32 %v6500_v8, %v6550_v0  ;;  %v1630_v27 = vmul.f32 %v6503_v9, %v6550_v0 }
 0x17a   : > { %v917_v23 = vrot.slane %v816_v63, 1  ;;  %v6687_v29 = vadd.f32 %v925_v5, %v700_v36  ;;  %v2056_v34 = vsel %vm905_vm1, %v2054_v41, %v9543_v47  ;;  %v2057_v37 = vrot.slane %v6656_v62, 1 }
 0x17b   : > { %v6695_v57 = vmul.f32 %v6565_v61, %v743_v60  ;;  %v2300_v4 = vsel %vm1150_vm2, %v2298_v46, %v9542_v59  ;;  %v1484_v63 = vrot.slane %v1386_v24, 1  ;;  %v1728_v44 = vrot.slane %v1630_v27, 2 }
 0x17c   : > { %v698_v36 = vadd.f32 %v6512_v17, %v666_v11  ;;  %v1162_v5 = vrot.slane %v1061_v21, 2  ;;  %v1312_v20 = vmul.f32 %v6497_v7, %v6550_v0  ;;  %v1954_v41 = vmul.f32 %v6557_v16, %v6550_v0 }
 0x17d   : > { %v918_v60 = vsel %vm905_vm1, %v916_v49, %v917_v23  ;;  %v1485_v62 = vsel %vm905_vm1, %v1483_v52, %v1484_v63  ;;  %v2198_v46 = vmul.f32 %v6565_v61, %v6550_v0  ;;  %v817_v11 = vmul.f32 %v6490_v2, %v738_v45 }
 0x17e   : > { %v1592_v21 = vadd.f32 %v1485_v62, %v6601_v51  ;;  %v1729_v24 = vsel %vm1150_vm2, %v1727_v53, %v1728_v44  ;;  %v2050_v27 = vrot.slane %v1954_v41, 1  ;;  %v1062_v32 = vmul.f32 %v6493_v3, %v738_v45 }
 0x17f   : > { %v2294_v59 = vrot.slane %v2198_v46, 2  ;;  %v919_v49 = vrot.slane %v817_v11, 1  ;;  %v1387_v38 = vmul.f32 %v6500_v8, %v738_v45  ;;  %v1631_v52 = vmul.f32 %v6503_v9, %v738_v45 }
 0x180   : > { %v1344_v31 = vadd.f32 %v1312_v20, %v6586_v40  ;;  %v1836_v47 = vadd.f32 %v1729_v24, %v1592_v21  ;;  %v1881_v50 = vmul.f32 %v6517_v19, %v6550_v0  ;;  %v2051_v15 = vsel %vm905_vm1, %v2049_v55, %v2050_v27 }
 0x181   : > { %v1022_v51 = vadd.f32 %v918_v60, %v6597_v48  ;;  %v2161_v53 = vadd.f32 %v2051_v15, %v6605_v54  ;;  %v920_v41 = vsel %vm905_vm1, %v917_v23, %v919_v49  ;;  %v1486_v62 = vrot.slane %v1387_v38, 1 }
 0x182   : > { %v1913_v46 = vadd.f32 %v1881_v50, %v1835_v30  ;;  %v1914_v11 = vadd.f32 %v6639_v26, %v1836_v47  ;;  %v2295_v40 = vsel %vm1150_vm2, %v2293_v56, %v2294_v59  ;;  %v1164_v20 = vrot.slane %v1062_v32, 2 }
 0x183   : > { %v1023_v0 = vadd.f32 %v920_v41, %v698_v36  ;;  %v1487_v39 = vsel %vm905_vm1, %v1484_v63, %v1486_v62  ;;  %v1730_v21 = vrot.slane %v1631_v52, 2  ;;  %v1955_v55 = vmul.f32 %v6557_v16, %v738_v45 }
 0x184   : > { %v2163_v48 = vadd.f32 %v2056_v34, %v1914_v11  ;;  %v2405_v60 = vadd.f32 %v2295_v40, %v2161_v53  ;;  %v1593_v54 = vadd.f32 %v1487_v39, %v1344_v31  ;;  %v2199_v23 = vmul.f32 %v6565_v61, %v738_v45  ;;  %v6744_v34 = vpop.permute.xlu1 %544  ;;  %v540_v53 = vpop.permute.xlu0 %539 }
 0x185   : > { %v9583_v50 = vrot.slane %v6572_v33, 2  ;;  %v1883_v43 = vmul.f32 %v6517_v19, %v6575_v35  ;;  %v1731_v56 = vsel %vm1150_vm2, %v1728_v44, %v1730_v21  ;;  %v2052_v30 = vrot.slane %v1955_v55, 1 }
 0x186   : > { %v2407_v47 = vadd.f32 %v2300_v4, %v2163_v48  ;;  %v1165_v63 = vsel %vm1150_vm2, %v1162_v5, %v1164_v20  ;;  %v1837_v36 = vadd.f32 %v1731_v56, %v1593_v54  ;;  %v2296_v24 = vrot.slane %v2199_v23, 2 }
 0x187   : > { %v1163_v26 = vsel %vm1150_vm2, %v9583_v50, %v1162_v5  ;;  %v2301_v31 = vrot.slane %v6695_v57, 2  ;;  %v1268_v32 = vadd.f32 %v1165_v63, %v1023_v0  ;;  %v2053_v33 = vsel %vm905_vm1, %v2050_v27, %v2052_v30 }
 0x188   : > { %v1267_v45 = vadd.f32 %v1163_v26, %v1022_v51  ;;  %v2437_v49 = vmax.f32 %v2405_v60, 0.0  ;;  %v2439_v38 = vmax.f32 %v2407_v47, 0.0  ;;  %v1915_v52 = vadd.f32 %v1883_v43, %v1837_v36 }
 0x189   : > { %v2162_v15 = vadd.f32 %v2053_v33, %v1913_v46  ;;  %v1735_v44 = vrot.slane %v6665_v10, 2  ;;  %v9584_v4 = vrot.slane %v6636_v25, 1  ;;  %v1314_v41 = vmul.f32 %v6497_v7, %v6575_v35 }
 0x18a   : > { %v2297_v57 = vsel %vm1150_vm2, %v2294_v59, %v2296_v24  ;;  %v9585_v51 = vrot.slane %v6653_v42, 1  ;;  %v9586_v27 = vrot.slane %v6622_v12, 1  ;;  %v2469_v11 = vmax.f32 %v2437_v49, %v2439_v38 }
 0x18b   : > { %v2058_v5 = vsel %vm905_vm1, %v9584_v4, %v2057_v37  ;;  %v2406_v40 = vadd.f32 %v2297_v57, %v2162_v15  ;;  %v9587_v10 = vrot.slane %v6643_v28, 2  ;;  %v1345_v37 = vadd.f32 %v6611_v58, %v1267_v45  ;;  %v6774_v28 = vpop.permute.xlu1 %549 }
 0x18c   : > { %v1492_v62 = vsel %vm905_vm1, %v9586_v27, %v9585_v51  ;;  %v2164_v46 = vadd.f32 %v2058_v5, %v1915_v52  ;;  %v1346_v20 = vadd.f32 %v1314_v41, %v1268_v32  ;;  %v669_v35 = vmul.f32 %v6487_v1, %v540_v53  ;;  %2485 = vst.msk [vmem:[#allocation2] sm:$0xff] %vm379_vm0, %v2469_v11  ;;  %v748_v27 = vpop.permute.xlu0 %747 }
 0x18d   : > { %v2302_v25 = vsel %vm1150_vm2, %v9587_v10, %v2301_v31  ;;  %v6767_v59 = vadd.f32 %v6670_v13, %v6687_v29  ;;  %v821_v42 = vmul.f32 %v6490_v2, %v540_v53  ;;  %v6772_v0 = vmul.f32 %v6493_v3, %v540_v53 }
 0x18e   : > { %v2408_v12 = vadd.f32 %v2302_v25, %v2164_v46  ;;  %v9588_v39 = vrot.slane %v6627_v14, 2  ;;  %v1315_v21 = vmul.f32 %v6497_v7, %v540_v53  ;;  %v1391_v13 = vmul.f32 %v6500_v8, %v540_v53 }
 0x18f   : > { %v6784_v29 = vmul.f32 %v6503_v9, %v540_v53  ;;  %v2438_v55 = vmax.f32 %v2406_v40, 0.0  ;;  %v1959_v60 = vmul.f32 %v6557_v16, %v540_v53  ;;  %v6788_v54 = vmul.f32 %v6565_v61, %v540_v53 }
 0x190   : > { %v6779_v58 = vsel %vm1150_vm2, %v9588_v39, %v1735_v44  ;;  %v2440_v48 = vmax.f32 %v2408_v12, 0.0  ;;  %v1594_v23 = vadd.f32 %v6662_v6, %v1345_v37  ;;  %v1595_v14 = vadd.f32 %v1492_v62, %v1346_v20 }
 0x191   : > { %v701_v50 = vadd.f32 %v6512_v17, %v669_v35  ;;  %v671_v26 = vmul.f32 %v6487_v1, %v6774_v28  ;;  %v926_v56 = vrot.slane %v821_v42, 1  ;;  %v1171_v30 = vrot.slane %v6772_v0, 2 }
 0x192   : > { %v2470_v43 = vmax.f32 %v2438_v55, %v2440_v48  ;;  %v6797_v47 = vmul.f32 %v6490_v2, %v6774_v28  ;;  %v1347_v63 = vadd.f32 %v1315_v21, %v6681_v22  ;;  %v1493_v36 = vrot.slane %v1391_v13, 1 }
 0x193   : > { %v1884_v24 = vmul.f32 %v6517_v19, %v540_v53  ;;  %v6803_v6 = vmul.f32 %v6493_v3, %v6774_v28  ;;  %v1737_v31 = vrot.slane %v6784_v29, 2  ;;  %v2059_v45 = vrot.slane %v1959_v60, 1 }
 0x194   : > { %2486 = vst.msk [vmem:[#allocation2 + $0x8] sm:$0xff] %vm379_vm0, %v2470_v43  ;;  %v2303_v32 = vrot.slane %v6788_v54, 2  ;;  %v822_v33 = vmul.f32 %v6490_v2, %v6744_v34  ;;  %v6811_v49 = vadd.f32 %v6512_v17, %v671_v26  ;;  %v6815_v22 = vmul.f32 %v6497_v7, %v6774_v28 }
 0x195   : > { %v6819_v38 = vmul.f32 %v6493_v3, %v6744_v34  ;;  %v1392_v52 = vmul.f32 %v6500_v8, %v6744_v34  ;;  %v931_v15 = vrot.slane %v6797_v47, 1  ;;  %v6826_v53 = vmul.f32 %v6500_v8, %v6774_v28 }
 0x196   : > { %v927_v44 = vrot.slane %v822_v33, 1  ;;  %v1838_v4 = vadd.f32 %v6675_v18, %v1594_v23  ;;  %v1176_v5 = vrot.slane %v6803_v6, 2  ;;  %v6832_v41 = vmul.f32 %v6503_v9, %v6774_v28 }
 0x197   : > { %v1494_v57 = vrot.slane %v1392_v52, 1  ;;  %v1636_v51 = vmul.f32 %v6503_v9, %v6744_v34  ;;  %v6838_v62 = vmul.f32 %v6557_v16, %v6774_v28  ;;  %v6842_v11 = vmul.f32 %v6565_v61, %v6774_v28 }
 0x198   : > { %v928_v18 = vsel %vm905_vm1, %v926_v56, %v927_v44  ;;  %v1960_v46 = vmul.f32 %v6557_v16, %v6744_v34  ;;  %v670_v40 = vmul.f32 %v6487_v1, %v6744_v34  ;;  %v1172_v10 = vrot.slane %v6819_v38, 2 }
 0x199   : > { %v1316_v25 = vmul.f32 %v6497_v7, %v6744_v34  ;;  %v1916_v37 = vadd.f32 %v1884_v24, %v1838_v4  ;;  %v1495_v20 = vsel %vm905_vm1, %v1493_v36, %v1494_v57  ;;  %v6855_v12 = vmul.f32 %v6565_v61, %v6744_v34 }
 0x19a   : > { %v2060_v35 = vrot.slane %v1960_v46, 1  ;;  %v823_v42 = vmul.f32 %v6490_v2, %v748_v27  ;;  %v1026_v0 = vadd.f32 %v928_v18, %v701_v50  ;;  %v1738_v39 = vrot.slane %v1636_v51, 2  ;;  %v753_v18 = vpop.permute.xlu1 %752 }
 0x19b   : > { %v1068_v21 = vmul.f32 %v6493_v3, %v748_v27  ;;  %v1393_v13 = vmul.f32 %v6500_v8, %v748_v27  ;;  %v2304_v55 = vrot.slane %v6855_v12, 2  ;;  %v1637_v60 = vmul.f32 %v6503_v9, %v748_v27 }
 0x19c   : > { %v2061_v29 = vsel %vm905_vm1, %v2059_v45, %v2060_v35  ;;  %v929_v48 = vrot.slane %v823_v42, 1  ;;  %v702_v54 = vadd.f32 %v6512_v17, %v670_v40  ;;  %v1596_v23 = vadd.f32 %v1495_v20, %v1347_v63  ;;  %v6883_v20 = vpop.permute.xlu0 %554 }
 0x19d   : > { %v2165_v26 = vadd.f32 %v2061_v29, %v1916_v37  ;;  %v1496_v43 = vrot.slane %v1393_v13, 1  ;;  %v1173_v56 = vsel %vm1150_vm2, %v1171_v30, %v1172_v10  ;;  %v1348_v50 = vadd.f32 %v1316_v25, %v6767_v59 }
 0x19e   : > { %v1839_v36 = vadd.f32 %v6779_v58, %v1595_v14  ;;  %v930_v24 = vsel %vm905_vm1, %v927_v44, %v929_v48  ;;  %v1271_v33 = vadd.f32 %v1173_v56, %v1026_v0  ;;  %v1739_v45 = vsel %vm1150_vm2, %v1737_v31, %v1738_v39 }
 0x19f   : > { %v1885_v38 = vmul.f32 %v6517_v19, %v6744_v34  ;;  %v1497_v52 = vsel %vm905_vm1, %v1494_v57, %v1496_v43  ;;  %v2305_v63 = vsel %vm1150_vm2, %v2303_v32, %v2304_v55  ;;  %v1174_v4 = vrot.slane %v1068_v21, 2 }
 0x1a0   : > { %v1740_v51 = vrot.slane %v1637_v60, 2  ;;  %v1961_v30 = vmul.f32 %v6557_v16, %v748_v27  ;;  %v1840_v59 = vadd.f32 %v1739_v45, %v1596_v23  ;;  %v6874_v46 = vadd.f32 %v2305_v63, %v2165_v26 }
 0x1a1   : > { %v1027_v58 = vadd.f32 %v930_v24, %v702_v54  ;;  %v1597_v14 = vadd.f32 %v1497_v52, %v1348_v50  ;;  %v1498_v44 = vrot.slane %v6826_v53, 1  ;;  %v1886_v31 = vmul.f32 %v6517_v19, %v6774_v28 }
 0x1a2   : > { %v2062_v34 = vrot.slane %v1961_v30, 1  ;;  %v2205_v57 = vmul.f32 %v6565_v61, %v748_v27  ;;  %v1742_v32 = vrot.slane %v6832_v41, 2  ;;  %v2064_v40 = vrot.slane %v6838_v62, 1 }
 0x1a3   : > { %v1917_v25 = vadd.f32 %v1885_v38, %v1839_v36  ;;  %v1964_v37 = vmul.f32 %v6557_v16, %v753_v18  ;;  %v2308_v12 = vrot.slane %v6842_v11, 2  ;;  %v1349_v42 = vadd.f32 %v6815_v22, %v1271_v33 }
 0x1a4   : > { %v1175_v53 = vsel %vm1150_vm2, %v1172_v10, %v1174_v4  ;;  %v1741_v28 = vsel %vm1150_vm2, %v1738_v39, %v1740_v51  ;;  %v1918_v0 = vadd.f32 %v1886_v31, %v1840_v59  ;;  %v2441_v27 = vmax.f32 %v6874_v46, 0.0  ;;  %v6939_v46 = vpop.permute.xlu1 %564 }
 0x1a5   : > { %v6890_v21 = vadd.f32 %v1175_v53, %v1027_v58  ;;  %v1841_v41 = vadd.f32 %v1741_v28, %v1597_v14  ;;  %v2063_v62 = vsel %vm905_vm1, %v2060_v35, %v2062_v34  ;;  %v2306_v13 = vrot.slane %v2205_v57, 2 }
 0x1a6   : > { %v2208_v29 = vmul.f32 %v6565_v61, %v753_v18  ;;  %v6896_v11 = vmul.f32 %v6490_v2, %v6883_v20  ;;  %v2166_v22 = vadd.f32 %v2063_v62, %v1917_v25  ;;  %v2067_v48 = vrot.slane %v1964_v37, 1  ;;  %v560_v25 = vpop.permute.xlu0 %559 }
 0x1a7   : > { %v6900_v10 = vmul.f32 %v6500_v8, %v6883_v20  ;;  %v1887_v39 = vmul.f32 %v6517_v19, %v6883_v20  ;;  %v6907_v35 = vmul.f32 %v6493_v3, %v6883_v20  ;;  %v1963_v54 = vmul.f32 %v6557_v16, %v6883_v20 }
 0x1a8   : > { %v932_v60 = vrot.slane %v6896_v11, 1  ;;  %v2207_v23 = vmul.f32 %v6565_v61, %v6883_v20  ;;  %v6914_v26 = vmul.f32 %v6490_v2, %v753_v18  ;;  %v6919_v56 = vmul.f32 %v6503_v9, %v6883_v20 }
 0x1a9   : > { %v1499_v43 = vrot.slane %v6900_v10, 1  ;;  %v1919_v50 = vadd.f32 %v1887_v39, %v1841_v41  ;;  %v6922_v36 = vmul.f32 %v6493_v3, %v753_v18  ;;  %v2311_v24 = vrot.slane %v2208_v29, 2 }
 0x1aa   : > { %v2065_v33 = vrot.slane %v1963_v54, 1  ;;  %v2309_v45 = vrot.slane %v2207_v23, 2  ;;  %v2307_v38 = vsel %vm1150_vm2, %v2304_v55, %v2306_v13  ;;  %v6926_v52 = vmul.f32 %v6500_v8, %v753_v18  ;;  %v570_v54 = vpop.permute.xlu1 %569 }
 0x1ab   : > { %v933_v63 = vsel %vm905_vm1, %v931_v15, %v932_v60  ;;  %v1500_v4 = vsel %vm905_vm1, %v1498_v44, %v1499_v43  ;;  %v2410_v51 = vadd.f32 %v2307_v38, %v2166_v22  ;;  %v1177_v30 = vrot.slane %v6907_v35, 2 }
 0x1ac   : > { %v2066_v59 = vsel %vm905_vm1, %v2064_v40, %v2065_v33  ;;  %v2068_v55 = vsel %vm905_vm1, %v2065_v33, %v2067_v48  ;;  %v934_v58 = vrot.slane %v6914_v26, 1  ;;  %v1743_v14 = vrot.slane %v6919_v56, 2 }
 0x1ad   : > { %v2167_v47 = vadd.f32 %v2066_v59, %v1918_v0  ;;  %v2168_v31 = vadd.f32 %v2068_v55, %v1919_v50  ;;  %v2310_v15 = vsel %vm1150_vm2, %v2308_v12, %v2309_v45  ;;  %v2312_v34 = vsel %vm1150_vm2, %v2309_v45, %v2311_v24 }
 0x1ae   : > { %v1028_v44 = vadd.f32 %v933_v63, %v6811_v49  ;;  %v1598_v57 = vadd.f32 %v1500_v4, %v1349_v42  ;;  %v1179_v40 = vrot.slane %v6922_v36, 2  ;;  %v6948_v37 = vmul.f32 %v6503_v9, %v753_v18 }
 0x1af   : > { %v2411_v53 = vadd.f32 %v2310_v15, %v2167_v47  ;;  %v2412_v28 = vadd.f32 %v2312_v34, %v2168_v31  ;;  %v2442_v41 = vmax.f32 %v2410_v51, 0.0  ;;  %v1501_v62 = vrot.slane %v6926_v52, 1 }
 0x1b0   : > { %v672_v0 = vmul.f32 %v6487_v1, %v6883_v20  ;;  %v1178_v49 = vsel %vm1150_vm2, %v1176_v5, %v1177_v30  ;;  %v1744_v18 = vsel %vm1150_vm2, %v1742_v32, %v1743_v14  ;;  %v673_v13 = vmul.f32 %v6487_v1, %v560_v25 }
 0x1b1   : > { %v2443_v12 = vmax.f32 %v2411_v53, 0.0  ;;  %v2444_v42 = vmax.f32 %v2412_v28, 0.0  ;;  %v1273_v29 = vadd.f32 %v1178_v49, %v1028_v44  ;;  %v1842_v22 = vadd.f32 %v1744_v18, %v1598_v57 }
 0x1b2   : > { %v827_v48 = vmul.f32 %v6490_v2, %v560_v25  ;;  %v6964_v39 = vmul.f32 %v6493_v3, %v560_v25  ;;  %v1397_v5 = vmul.f32 %v6500_v8, %v560_v25  ;;  %v6968_v26 = vmul.f32 %v6503_v9, %v560_v25 }
 0x1b3   : > { %v2471_v23 = vmax.f32 %v2441_v27, %v2443_v12  ;;  %v2472_v6 = vmax.f32 %v2442_v41, %v2444_v42  ;;  %v1745_v50 = vrot.slane %v6948_v37, 2  ;;  %v1318_v32 = vmul.f32 %v6497_v7, %v6883_v20 }
 0x1b4   : > { %v1319_v24 = vmul.f32 %v6497_v7, %v560_v25  ;;  %v1965_v33 = vmul.f32 %v6557_v16, %v560_v25  ;;  %v1888_v27 = vmul.f32 %v6517_v19, %v560_v25  ;;  %v6979_v45 = vmul.f32 %v6565_v61, %v560_v25 }
 0x1b5   : > { %2487 = vst.msk [vmem:[#allocation2 + $0x10] sm:$0xff] %vm379_vm0, %v2471_v23  ;;  %2488 = vst.msk [vmem:[#allocation2 + $0x18] sm:$0xff] %vm379_vm0, %v2472_v6  ;;  %v675_v38 = vmul.f32 %v6487_v1, %v570_v54  ;;  %v6983_v52 = vmul.f32 %v6490_v2, %v570_v54  ;;  %v705_v20 = vadd.f32 %v6512_v17, %v673_v13  ;;  %v936_v63 = vrot.slane %v827_v48, 1 }
 0x1b6   : > { %v1181_v4 = vrot.slane %v6964_v39, 2  ;;  %v1351_v51 = vadd.f32 %v1319_v24, %v1273_v29  ;;  %v1503_v59 = vrot.slane %v1397_v5, 1  ;;  %v1747_v55 = vrot.slane %v6968_v26, 2  ;;  %v758_v5 = vpop.permute.xlu0 %757 }
 0x1b7   : > { %v1920_v47 = vadd.f32 %v1888_v27, %v1842_v22  ;;  %v704_v31 = vadd.f32 %v6512_v17, %v672_v0  ;;  %v2069_v15 = vrot.slane %v1965_v33, 1  ;;  %v6990_v34 = vmul.f32 %v6493_v3, %v570_v54 }
 0x1b8   : > { %v828_v44 = vmul.f32 %v6490_v2, %v6939_v46  ;;  %v935_v57 = vsel %vm905_vm1, %v932_v60, %v934_v58  ;;  %v2313_v25 = vrot.slane %v6979_v45, 2  ;;  %v6999_v53 = vadd.f32 %v6512_v17, %v675_v38 }
 0x1b9   : > { %v941_v28 = vrot.slane %v6983_v52, 1  ;;  %v674_v41 = vmul.f32 %v6487_v1, %v6939_v46  ;;  %v7005_v0 = vmul.f32 %v6497_v7, %v570_v54  ;;  %v7008_v49 = vmul.f32 %v6500_v8, %v570_v54 }
 0x1ba   : > { %v937_v12 = vrot.slane %v828_v44, 1  ;;  %v1398_v11 = vmul.f32 %v6500_v8, %v6939_v46  ;;  %v7013_v60 = vmul.f32 %v6503_v9, %v570_v54  ;;  %v1029_v58 = vadd.f32 %v935_v57, %v704_v31 }
 0x1bb   : > { %v7017_v42 = vmul.f32 %v6493_v3, %v6939_v46  ;;  %v1350_v18 = vadd.f32 %v1318_v32, %v6890_v21  ;;  %v1186_v13 = vrot.slane %v6990_v34, 2  ;;  %v1890_v29 = vmul.f32 %v6517_v19, %v570_v54 }
 0x1bc   : > { %v1504_v22 = vrot.slane %v1398_v11, 1  ;;  %v1642_v48 = vmul.f32 %v6503_v9, %v6939_v46  ;;  %v7025_v39 = vmul.f32 %v6557_v16, %v570_v54  ;;  %v7028_v23 = vmul.f32 %v6565_v61, %v570_v54 }
 0x1bd   : > { %v706_v6 = vadd.f32 %v6512_v17, %v674_v41  ;;  %v1180_v21 = vsel %vm1150_vm2, %v1177_v30, %v1179_v40  ;;  %v938_v26 = vsel %vm905_vm1, %v936_v63, %v937_v12  ;;  %v1320_v32 = vmul.f32 %v6497_v7, %v6939_v46 }
 0x1be   : > { %v1502_v24 = vsel %vm905_vm1, %v1499_v43, %v1501_v62  ;;  %v1966_v54 = vmul.f32 %v6557_v16, %v6939_v46  ;;  %v1182_v17 = vrot.slane %v7017_v42, 2  ;;  %v1274_v36 = vadd.f32 %v1180_v21, %v1029_v58 }
 0x1bf   : > { %v1599_v33 = vadd.f32 %v1502_v24, %v1350_v18  ;;  %v7047_v35 = vmul.f32 %v6565_v61, %v6939_v46  ;;  %v1505_v30 = vsel %vm905_vm1, %v1503_v59, %v1504_v22  ;;  %v1748_v40 = vrot.slane %v1642_v48, 2 }
 0x1c0   : > { %v2070_v27 = vrot.slane %v1966_v54, 1  ;;  %v829_v45 = vmul.f32 %v6490_v2, %v758_v5  ;;  %v1030_v10 = vadd.f32 %v938_v26, %v705_v20  ;;  %v1600_v38 = vadd.f32 %v1505_v30, %v1351_v51 }
 0x1c1   : > { %v1074_v43 = vmul.f32 %v6493_v3, %v758_v5  ;;  %v1399_v62 = vmul.f32 %v6500_v8, %v758_v5  ;;  %v2314_v31 = vrot.slane %v7047_v35, 2  ;;  %v1643_v57 = vmul.f32 %v6503_v9, %v758_v5 }
 0x1c2   : > { %v2071_v63 = vsel %vm905_vm1, %v2069_v15, %v2070_v27  ;;  %v939_v44 = vrot.slane %v829_v45, 1  ;;  %v1183_v41 = vsel %vm1150_vm2, %v1181_v4, %v1182_v17  ;;  %v1746_v20 = vsel %vm1150_vm2, %v1743_v14, %v1745_v50 }
 0x1c3   : > { %v2169_v51 = vadd.f32 %v2071_v63, %v1920_v47  ;;  %v1506_v59 = vrot.slane %v1399_v62, 1  ;;  %v1352_v11 = vadd.f32 %v1320_v32, %v1274_v36  ;;  %v1749_v58 = vsel %vm1150_vm2, %v1747_v55, %v1748_v40 }
 0x1c4   : > { %v940_v15 = vsel %vm905_vm1, %v937_v12, %v939_v44  ;;  %v1967_v42 = vmul.f32 %v6557_v16, %v758_v5  ;;  %v1275_v18 = vadd.f32 %v1183_v41, %v1030_v10  ;;  %v1843_v48 = vadd.f32 %v1746_v20, %v1599_v33  ;;  %v763_v12 = vpop.permute.xlu1 %762 }
 0x1c5   : > { %v1844_v21 = vadd.f32 %v1749_v58, %v1600_v38  ;;  %v1507_v4 = vsel %vm905_vm1, %v1504_v22, %v1506_v59  ;;  %v2315_v37 = vsel %vm1150_vm2, %v2313_v25, %v2314_v31  ;;  %v1184_v26 = vrot.slane %v1074_v43, 2  ;;  %v575_v25 = vpop.permute.xlu0 %574 }
 0x1c6   : > { %v1750_v56 = vrot.slane %v1643_v57, 2  ;;  %v2072_v24 = vrot.slane %v1967_v42, 1  ;;  %v1508_v14 = vrot.slane %v7008_v49, 1  ;;  %v1889_v50 = vmul.f32 %v6517_v19, %v6939_v46 }
 0x1c7   : > { %v7070_v55 = vadd.f32 %v2315_v37, %v2169_v51  ;;  %v1031_v47 = vadd.f32 %v940_v15, %v706_v6  ;;  %v1752_v32 = vrot.slane %v7013_v60, 2  ;;  %v2074_v54 = vrot.slane %v7025_v39, 1 }
 0x1c8   : > { %v1601_v36 = vadd.f32 %v1507_v4, %v1352_v11  ;;  %v2211_v22 = vmul.f32 %v6565_v61, %v758_v5  ;;  %v2318_v33 = vrot.slane %v7028_v23, 2  ;;  %v1353_v35 = vadd.f32 %v7005_v0, %v1275_v18 }
 0x1c9   : > { %v1921_v49 = vadd.f32 %v1889_v50, %v1843_v48  ;;  %v1922_v30 = vadd.f32 %v1890_v29, %v1844_v21  ;;  %v1185_v46 = vsel %vm1150_vm2, %v1182_v17, %v1184_v26  ;;  %v1751_v45 = vsel %vm1150_vm2, %v1748_v40, %v1750_v56  ;;  %v580_v56 = vpop.permute.xlu0 %579 }
 0x1ca   : > { %v2073_v6 = vsel %vm905_vm1, %v2070_v27, %v2072_v24  ;;  %v1970_v10 = vmul.f32 %v6557_v16, %v763_v12  ;;  %v2445_v39 = vmax.f32 %v7070_v55, 0.0  ;;  %v7082_v38 = vadd.f32 %v1185_v46, %v1031_v47 }
 0x1cb   : > { %v7085_v5 = vmul.f32 %v6490_v2, %v763_v12  ;;  %v7088_v23 = vmul.f32 %v6490_v2, %v575_v25  ;;  %v1845_v0 = vadd.f32 %v1751_v45, %v1601_v36  ;;  %v2316_v29 = vrot.slane %v2211_v22, 2 }
 0x1cc   : > { %v2214_v17 = vmul.f32 %v6565_v61, %v763_v12  ;;  %v7092_v40 = vmul.f32 %v6500_v8, %v575_v25  ;;  %v2170_v27 = vadd.f32 %v2073_v6, %v1921_v49  ;;  %v7095_v43 = vmul.f32 %v6493_v3, %v763_v12 }
 0x1cd   : > { %v942_v62 = vrot.slane %v7088_v23, 1  ;;  %v7099_v63 = vmul.f32 %v6493_v3, %v575_v25  ;;  %v2077_v44 = vrot.slane %v1970_v10, 1  ;;  %v1891_v57 = vmul.f32 %v6517_v19, %v575_v25 }
 0x1ce   : > { %v1969_v41 = vmul.f32 %v6557_v16, %v575_v25  ;;  %v2213_v20 = vmul.f32 %v6565_v61, %v575_v25  ;;  %v944_v51 = vrot.slane %v7085_v5, 1  ;;  %v7106_v59 = vmul.f32 %v6500_v8, %v763_v12 }
 0x1cf   : > { %v1509_v11 = vrot.slane %v7092_v40, 1  ;;  %v7110_v58 = vmul.f32 %v6503_v9, %v575_v25  ;;  %v2321_v15 = vrot.slane %v2214_v17, 2  ;;  %v1923_v42 = vadd.f32 %v1891_v57, %v1845_v0 }
 0x1d0   : > { %v2075_v18 = vrot.slane %v1969_v41, 1  ;;  %v2319_v48 = vrot.slane %v2213_v20, 2  ;;  %v2317_v21 = vsel %vm1150_vm2, %v2314_v31, %v2316_v29  ;;  %v1189_v4 = vrot.slane %v7095_v43, 2  ;;  %v7125_v31 = vpop.permute.xlu1 %584  ;;  %v7150_v20 = vld [vmem:[#allocation10] ss:$0 sm:$0xff] }
 0x1d1   : > { %v7115_v37 = vmul.f32 %v6503_v9, %v763_v12  ;;  %v943_v26 = vsel %vm905_vm1, %v941_v28, %v942_v62  ;;  %v2414_v24 = vadd.f32 %v2317_v21, %v2170_v27  ;;  %v1187_v50 = vrot.slane %v7099_v63, 2 }
 0x1d2   : > { %v2076_v55 = vsel %vm905_vm1, %v2074_v54, %v2075_v18  ;;  %v2078_v47 = vsel %vm905_vm1, %v2075_v18, %v2077_v44  ;;  %v1510_v12 = vsel %vm905_vm1, %v1508_v14, %v1509_v11  ;;  %v1753_v36 = vrot.slane %v7110_v58, 2 }
 0x1d3   : > { %v2171_v22 = vadd.f32 %v2076_v55, %v1922_v30  ;;  %v2172_v52 = vadd.f32 %v2078_v47, %v1923_v42  ;;  %v2320_v28 = vsel %vm1150_vm2, %v2318_v33, %v2319_v48  ;;  %v2322_v49 = vsel %vm1150_vm2, %v2319_v48, %v2321_v15 }
 0x1d4   : > { %v1032_v46 = vadd.f32 %v943_v26, %v6999_v53  ;;  %v677_v54 = vmul.f32 %v6487_v1, %v580_v56  ;;  %v1511_v45 = vrot.slane %v7106_v59, 1  ;;  %v676_v6 = vmul.f32 %v6487_v1, %v575_v25  ;;  %v590_v15 = vpop.permute.xlu1 %589 }
 0x1d5   : > { %v2415_v10 = vadd.f32 %v2320_v28, %v2171_v22  ;;  %v2416_v0 = vadd.f32 %v2322_v49, %v2172_v52  ;;  %v2446_v29 = vmax.f32 %v2414_v24, 0.0  ;;  %v1755_v14 = vrot.slane %v7115_v37, 2 }
 0x1d6   : > { %v1322_v30 = vmul.f32 %v6497_v7, %v575_v25  ;;  %v1602_v17 = vadd.f32 %v1510_v12, %v1353_v35  ;;  %v1188_v53 = vsel %vm1150_vm2, %v1186_v13, %v1187_v50  ;;  %v833_v44 = vmul.f32 %v6490_v2, %v580_v56 }
 0x1d7   : > { %v2447_v27 = vmax.f32 %v2415_v10, 0.0  ;;  %v2448_v33 = vmax.f32 %v2416_v0, 0.0  ;;  %v1277_v57 = vadd.f32 %v1188_v53, %v1032_v46  ;;  %v1754_v41 = vsel %vm1150_vm2, %v1752_v32, %v1753_v36 }
 0x1d8   : > { %v709_v25 = vadd.f32 %v7150_v20, %v677_v54  ;;  %v7154_v35 = vmul.f32 %v6493_v3, %v580_v56  ;;  %v1403_v13 = vmul.f32 %v6500_v8, %v580_v56  ;;  %v7158_v18 = vmul.f32 %v6503_v9, %v580_v56 }
 0x1d9   : > { %v2473_v34 = vmax.f32 %v2445_v39, %v2447_v27  ;;  %v2474_v42 = vmax.f32 %v2446_v29, %v2448_v33  ;;  %v1846_v48 = vadd.f32 %v1754_v41, %v1602_v17  ;;  %v1323_v60 = vmul.f32 %v6497_v7, %v580_v56 }
 0x1da   : > { %v1971_v32 = vmul.f32 %v6557_v16, %v580_v56  ;;  %v7163_v21 = vmul.f32 %v6565_v61, %v580_v56  ;;  %v946_v26 = vrot.slane %v833_v44, 1  ;;  %v1892_v39 = vmul.f32 %v6517_v19, %v580_v56 }
 0x1db   : > { %2489 = vst.msk [vmem:[#allocation2 + $0x20] sm:$0xff] %vm379_vm0, %v2473_v34  ;;  %2490 = vst.msk [vmem:[#allocation2 + $0x28] sm:$0xff] %vm379_vm0, %v2474_v42  ;;  %v679_v24 = vmul.f32 %v6487_v1, %v590_v15  ;;  %v7170_v55 = vmul.f32 %v6490_v2, %v590_v15  ;;  %v1191_v47 = vrot.slane %v7154_v35, 2  ;;  %v1355_v12 = vadd.f32 %v1323_v60, %v1277_v57 }
 0x1dc   : > { %v7174_v22 = vmul.f32 %v6493_v3, %v590_v15  ;;  %v708_v52 = vadd.f32 %v7150_v20, %v676_v6  ;;  %v1513_v28 = vrot.slane %v1403_v13, 1  ;;  %v1757_v49 = vrot.slane %v7158_v18, 2  ;;  %v768_v18 = vpop.permute.xlu0 %767 }
 0x1dd   : > { %v834_v46 = vmul.f32 %v6490_v2, %v7125_v31  ;;  %v945_v56 = vsel %vm905_vm1, %v942_v62, %v944_v51  ;;  %v1924_v54 = vadd.f32 %v1892_v39, %v1846_v48  ;;  %v2079_v10 = vrot.slane %v1971_v32, 1 }
 0x1de   : > { %v2323_v0 = vrot.slane %v7163_v21, 2  ;;  %v7187_v29 = vmul.f32 %v6497_v7, %v590_v15  ;;  %v7190_v6 = vadd.f32 %v7150_v20, %v679_v24  ;;  %v951_v17 = vrot.slane %v7170_v55, 1 }
 0x1df   : > { %v947_v27 = vrot.slane %v834_v46, 1  ;;  %v1033_v33 = vadd.f32 %v945_v56, %v708_v52  ;;  %v1196_v5 = vrot.slane %v7174_v22, 2  ;;  %v7195_v23 = vmul.f32 %v6500_v8, %v590_v15 }
 0x1e0   : > { %v7198_v62 = vmul.f32 %v6503_v9, %v590_v15  ;;  %v1404_v51 = vmul.f32 %v6500_v8, %v7125_v31  ;;  %v1894_v53 = vmul.f32 %v6517_v19, %v590_v15  ;;  %v7204_v44 = vmul.f32 %v6557_v16, %v590_v15 }
 0x1e1   : > { %v7207_v57 = vmul.f32 %v6565_v61, %v590_v15  ;;  %v7211_v41 = vmul.f32 %v6493_v3, %v7125_v31  ;;  %v1190_v35 = vsel %vm1150_vm2, %v1187_v50, %v1189_v4  ;;  %v1354_v34 = vadd.f32 %v1322_v30, %v7082_v38  ;;  %v7234_v50 = vld [vmem:[#allocation8 + $0x8] ss:$0 sm:$0xff] }
 0x1e2   : > { %v1514_v42 = vrot.slane %v1404_v51, 1  ;;  %v1648_v13 = vmul.f32 %v6503_v9, %v7125_v31  ;;  %v678_v61 = vmul.f32 %v6487_v1, %v7125_v31  ;;  %v948_v15 = vsel %vm905_vm1, %v946_v26, %v947_v27 }
 0x1e3   : > { %v1278_v48 = vadd.f32 %v1190_v35, %v1033_v33  ;;  %v1972_v43 = vmul.f32 %v6557_v16, %v7125_v31  ;;  %v1518_v63 = vrot.slane %v7195_v23, 1  ;;  %v1324_v4 = vmul.f32 %v6497_v7, %v7125_v31 }
 0x1e4   : > { %v1512_v38 = vsel %vm905_vm1, %v1509_v11, %v1511_v45  ;;  %v7238_v30 = vmul.f32 %v7234_v50, %v7125_v31  ;;  %v1192_v60 = vrot.slane %v7211_v41, 2  ;;  %v1756_v32 = vsel %vm1150_vm2, %v1753_v36, %v1755_v14 }
 0x1e5   : > { %v2080_v21 = vrot.slane %v1972_v43, 1  ;;  %v835_v59 = vmul.f32 %v6490_v2, %v768_v18  ;;  %v1034_v40 = vadd.f32 %v948_v15, %v709_v25  ;;  %v1515_v11 = vsel %vm905_vm1, %v1513_v28, %v1514_v42 }
 0x1e6   : > { %v1603_v45 = vadd.f32 %v1512_v38, %v1354_v34  ;;  %v1758_v26 = vrot.slane %v1648_v13, 2  ;;  %v1356_v39 = vadd.f32 %v1324_v4, %v1278_v48  ;;  %v1604_v24 = vadd.f32 %v1515_v11, %v1355_v12  ;;  %v773_v4 = vpop.permute.xlu1 %772 }
 0x1e7   : > { %v2324_v52 = vrot.slane %v7238_v30, 2  ;;  %v1405_v46 = vmul.f32 %v6500_v8, %v768_v18  ;;  %v2081_v37 = vsel %vm905_vm1, %v2079_v10, %v2080_v21  ;;  %v949_v56 = vrot.slane %v835_v59, 1 }
 0x1e8   : > { %v1080_v58 = vmul.f32 %v6493_v3, %v768_v18  ;;  %v1649_v36 = vmul.f32 %v6503_v9, %v768_v18  ;;  %v1193_v14 = vsel %vm1150_vm2, %v1191_v47, %v1192_v60  ;;  %v2173_v25 = vadd.f32 %v2081_v37, %v1924_v54 }
 0x1e9   : > { %v1516_v33 = vrot.slane %v1405_v46, 1  ;;  %v1973_v28 = vmul.f32 %v6557_v16, %v768_v18  ;;  %v1279_v51 = vadd.f32 %v1193_v14, %v1034_v40  ;;  %v1759_v12 = vsel %vm1150_vm2, %v1757_v49, %v1758_v26 }
 0x1ea   : > { %v1847_v41 = vadd.f32 %v1756_v32, %v1603_v45  ;;  %v1893_v35 = vmul.f32 %v6517_v19, %v7125_v31  ;;  %v1848_v34 = vadd.f32 %v1759_v12, %v1604_v24  ;;  %v2325_v10 = vsel %vm1150_vm2, %v2323_v0, %v2324_v52 }
 0x1eb   : > { %v1517_v13 = vsel %vm905_vm1, %v1514_v42, %v1516_v33  ;;  %v2082_v15 = vrot.slane %v1973_v28, 1  ;;  %v950_v48 = vsel %vm905_vm1, %v947_v27, %v949_v56  ;;  %v1194_v47 = vrot.slane %v1080_v58, 2  ;;  %v7269_v27 = vpop.permute.xlu0 %594 }
 0x1ec   : > { %v1760_v54 = vrot.slane %v1649_v36, 2  ;;  %v2217_v43 = vmul.f32 %v7234_v50, %v768_v18  ;;  %v1762_v38 = vrot.slane %v7198_v62, 2  ;;  %v710_v49 = vadd.f32 %v7150_v20, %v678_v61 }
 0x1ed   : > { %v7264_v30 = vadd.f32 %v2325_v10, %v2173_v25  ;;  %v1605_v31 = vadd.f32 %v1517_v13, %v1356_v39  ;;  %v2084_v32 = vrot.slane %v7204_v44, 1  ;;  %v2328_v0 = vrot.slane %v7207_v57, 2 }
 0x1ee   : > { %v1357_v42 = vadd.f32 %v7187_v29, %v1279_v51  ;;  %v1925_v59 = vadd.f32 %v1893_v35, %v1847_v41  ;;  %v1926_v40 = vadd.f32 %v1894_v53, %v1848_v34  ;;  %v1035_v11 = vadd.f32 %v950_v48, %v710_v49 }
 0x1ef   : > { %v2083_v18 = vsel %vm905_vm1, %v2080_v21, %v2082_v15  ;;  %v1976_v62 = vmul.f32 %v6557_v16, %v773_v4  ;;  %v1195_v61 = vsel %vm1150_vm2, %v1192_v60, %v1194_v47  ;;  %v1761_v45 = vsel %vm1150_vm2, %v1758_v26, %v1760_v54 }
 0x1f0   : > { %v2326_v39 = vrot.slane %v2217_v43, 2  ;;  %v7276_v44 = vmul.f32 %v6490_v2, %v773_v4  ;;  %v2449_v57 = vmax.f32 %v7264_v30, 0.0  ;;  %v1849_v29 = vadd.f32 %v1761_v45, %v1605_v31  ;;  %v7324_v43 = vpop.permute.xlu1 %604  ;;  %v600_v31 = vpop.permute.xlu0 %599  ;;  %v2501_v45 = vld [vmem:[#allocation2] ss:$2 sm:$0xff] }
 0x1f1   : > { %v2220_v24 = vmul.f32 %v7234_v50, %v773_v4  ;;  %v7282_v53 = vmul.f32 %v6490_v2, %v7269_v27  ;;  %v2174_v21 = vadd.f32 %v2083_v18, %v1925_v59  ;;  %v2087_v46 = vrot.slane %v1976_v62, 1 }
 0x1f2   : > { %v7286_v60 = vmul.f32 %v6493_v3, %v7269_v27  ;;  %v7290_v26 = vmul.f32 %v6500_v8, %v7269_v27  ;;  %v7295_v56 = vmul.f32 %v6503_v9, %v7269_v27  ;;  %v1895_v58 = vmul.f32 %v6517_v19, %v7269_v27 }
 0x1f3   : > { %v952_v37 = vrot.slane %v7282_v53, 1  ;;  %v1975_v36 = vmul.f32 %v6557_v16, %v7269_v27  ;;  %v7301_v14 = vadd.f32 %v1195_v61, %v1035_v11  ;;  %v2327_v25 = vsel %vm1150_vm2, %v2324_v52, %v2326_v39  ;;  %v2517_v39 = vld [vmem:[#allocation2 + $0x1] ss:$2 sm:$0xff] }
 0x1f4   : > { %v1519_v33 = vrot.slane %v7290_v26, 1  ;;  %v2219_v28 = vmul.f32 %v7234_v50, %v7269_v27  ;;  %v2331_v51 = vrot.slane %v2220_v24, 2  ;;  %v1927_v41 = vadd.f32 %v1895_v58, %v1849_v29 }
 0x1f5   : > { %v953_v12 = vsel %vm905_vm1, %v951_v17, %v952_v37  ;;  %v2085_v35 = vrot.slane %v1975_v36, 1  ;;  %v2418_v34 = vadd.f32 %v2327_v25, %v2174_v21  ;;  %v7313_v10 = vmul.f32 %v6493_v3, %v773_v4 }
 0x1f6   : > { %v1520_v52 = vsel %vm905_vm1, %v1518_v63, %v1519_v33  ;;  %v2329_v13 = vrot.slane %v2219_v28, 2  ;;  %v1197_v15 = vrot.slane %v7286_v60, 2  ;;  %v1763_v48 = vrot.slane %v7295_v56, 2  ;;  %v610_v28 = vpop.permute.xlu1 %609 }
 0x1f7   : > { %v2086_v55 = vsel %vm905_vm1, %v2084_v32, %v2085_v35  ;;  %v2088_v17 = vsel %vm905_vm1, %v2085_v35, %v2087_v46  ;;  %v1036_v49 = vadd.f32 %v953_v12, %v7190_v6  ;;  %v1606_v30 = vadd.f32 %v1520_v52, %v1357_v42 }
 0x1f8   : > { %v2175_v47 = vadd.f32 %v2086_v55, %v1926_v40  ;;  %v2176_v54 = vadd.f32 %v2088_v17, %v1927_v41  ;;  %v954_v23 = vrot.slane %v7276_v44, 1  ;;  %v7329_v63 = vmul.f32 %v6500_v8, %v773_v4 }
 0x1f9   : > { %v2330_v59 = vsel %vm1150_vm2, %v2328_v0, %v2329_v13  ;;  %v2332_v11 = vsel %vm1150_vm2, %v2329_v13, %v2331_v51  ;;  %v1199_v32 = vrot.slane %v7313_v10, 2  ;;  %v7335_v40 = vmul.f32 %v6503_v9, %v773_v4 }
 0x1fa   : > { %v2419_v18 = vadd.f32 %v2330_v59, %v2175_v47  ;;  %v2420_v62 = vadd.f32 %v2332_v11, %v2176_v54  ;;  %v2450_v61 = vmax.f32 %v2418_v34, 0.0  ;;  %v1198_v6 = vsel %vm1150_vm2, %v1196_v5, %v1197_v15  ;;  %v7363_v34 = vld [vmem:[#allocation4] sm:$0xff] }
 0x1fb   : > { %v1764_v0 = vsel %vm1150_vm2, %v1762_v38, %v1763_v48  ;;  %v681_v42 = vmul.f32 %v6487_v1, %v600_v31  ;;  %v1281_v24 = vadd.f32 %v1198_v6, %v1036_v49  ;;  %v839_v46 = vmul.f32 %v6490_v2, %v600_v31  ;;  %391 = vst.msk [vmem:[#allocation3 + $0x20] sm:$0x1] %vm390_vm3, %v7363_v34 }
 0x1fc   : > { %v2451_v29 = vmax.f32 %v2419_v18, 0.0  ;;  %v2452_v4 = vmax.f32 %v2420_v62, 0.0  ;;  %v1850_v21 = vadd.f32 %v1764_v0, %v1606_v30  ;;  %v7348_v58 = vmul.f32 %v6493_v3, %v600_v31  ;;  %392 = vst.msk [vmem:[#allocation3 + $0x30] sm:$0x1] %vm390_vm3, %v7363_v34  ;;  %393 = vst.msk [vmem:[#allocation3 + $0x40] sm:$0x1] %vm390_vm3, %v7363_v34 }
 0x1fd   : > { %v7351_v22 = vmul.f32 %v6500_v8, %v600_v31  ;;  %v7354_v5 = vmul.f32 %v6503_v9, %v600_v31  ;;  %v2532_v25 = vmax.f32 %v2501_v45, %v2517_v39  ;;  %v1521_v51 = vrot.slane %v7329_v63, 1  ;;  %394 = vst.msk [vmem:[#allocation3 + $0x50] sm:$0x1] %vm390_vm3, %v7363_v34  ;;  %395 = vst.msk [vmem:[#allocation3 + $0x60] sm:$0x1] %vm390_vm3, %v7363_v34  ;;  %v7407_v39 = vld [vmem:[#allocation3 + $0x18] sm:$0xff] }
 0x1fe   : > { %v2475_v38 = vmax.f32 %v2449_v57, %v2451_v29  ;;  %v2476_v36 = vmax.f32 %v2450_v61, %v2452_v4  ;;  %v1765_v12 = vrot.slane %v7335_v40, 2  ;;  %v680_v41 = vmul.f32 %v6487_v1, %v7269_v27  ;;  %396 = vst.msk [vmem:[#allocation3 + $0x70] sm:$0x1] %vm390_vm3, %v7363_v34  ;;  %397 = vst.msk [vmem:[#allocation3 + $0x80] sm:$0x1] %vm390_vm3, %v7363_v34 }
 0x1ff   : > { %v7361_v35 = vmul.f32 %v6557_v16, %v600_v31  ;;  %398 = vst.msk [vmem:[#allocation3 + $0x90] sm:$0x1] %vm390_vm3, %v7363_v34  ;;  %v1326_v57 = vmul.f32 %v6497_v7, %v7269_v27  ;;  %v1327_v52 = vmul.f32 %v6497_v7, %v600_v31  ;;  %v1896_v13 = vmul.f32 %v6517_v19, %v600_v31 }
 0x200   : > { %2491 = vst.msk [vmem:[#allocation2 + $0x30] sm:$0xff] %vm379_vm0, %v2475_v38  ;;  %2492 = vst.msk [vmem:[#allocation2 + $0x38] sm:$0xff] %vm379_vm0, %v2476_v36  ;;  %v7380_v55 = vmul.f32 %v7234_v50, %v600_v31  ;;  %v713_v17 = vadd.f32 %v7150_v20, %v681_v42  ;;  %v956_v47 = vrot.slane %v839_v46, 1  ;;  %v1201_v54 = vrot.slane %v7348_v58, 2 }
 0x201   : > { %2540 = vst.msk [vmem:[#allocation3 + $0x21] sm:$0xff] %vm379_vm0, %v2532_v25  ;;  %v683_v27 = vmul.f32 %v6487_v1, %v610_v28  ;;  %v1359_v49 = vadd.f32 %v1327_v52, %v1281_v24  ;;  %v1523_v30 = vrot.slane %v7351_v22, 1  ;;  %v1767_v59 = vrot.slane %v7354_v5, 2 }
 0x202   : > { %v1928_v11 = vadd.f32 %v1896_v13, %v1850_v21  ;;  %v2089_v18 = vrot.slane %v7361_v35, 1  ;;  %v7390_v31 = vmul.f32 %v6490_v2, %v610_v28  ;;  %v7393_v62 = vmul.f32 %v6493_v3, %v610_v28  ;;  %400 = vst.msk [vmem:[#allocation3 + $0x29] sm:$0x7f] %vm399_vm4, %v7363_v34  ;;  %401 = vst.msk [vmem:[#allocation3 + $0x39] sm:$0x7f] %vm399_vm4, %v7363_v34 }
 0x203   : > { %v712_v61 = vadd.f32 %v7150_v20, %v680_v41  ;;  %v2333_v6 = vrot.slane %v7380_v55, 2  ;;  %v7398_v0 = vmul.f32 %v6497_v7, %v610_v28  ;;  %v840_v42 = vmul.f32 %v6490_v2, %v7324_v43  ;;  %402 = vst.msk [vmem:[#allocation3 + $0x49] sm:$0x7f] %vm399_vm4, %v7363_v34  ;;  %403 = vst.msk [vmem:[#allocation3 + $0x59] sm:$0x7f] %vm399_vm4, %v7363_v34 }
 0x204   : > { %v955_v45 = vsel %vm905_vm1, %v952_v37, %v954_v23  ;;  %v7410_v29 = vadd.f32 %v7150_v20, %v683_v27  ;;  %v7413_v4 = vmul.f32 %v6500_v8, %v610_v28  ;;  %v7416_v24 = vmul.f32 %v6503_v9, %v610_v28  ;;  %404 = vst.msk [vmem:[#allocation3 + $0x69] sm:$0x7f] %vm399_vm4, %v7363_v34 }
 0x205   : > { %v682_v21 = vmul.f32 %v6487_v1, %v7324_v43  ;;  %v7421_v44 = vmul.f32 %v6517_v19, %v610_v28  ;;  %v7424_v53 = vmul.f32 %v6557_v16, %v610_v28  ;;  %v957_v37 = vrot.slane %v840_v42, 1  ;;  %v778_v42 = vpop.permute.xlu0 %777  ;;  %405 = vst.msk [vmem:[#allocation3 + $0x79] sm:$0x7f] %vm399_vm4, %v7363_v34  ;;  %406 = vst.msk [vmem:[#allocation3 + $0x89] sm:$0x7f] %vm399_vm4, %v7363_v34 }
 0x206   : > { %v1410_v23 = vmul.f32 %v6500_v8, %v7324_v43  ;;  %v961_v58 = vrot.slane %v7390_v31, 1  ;;  %v1037_v5 = vadd.f32 %v955_v45, %v712_v61  ;;  %v7434_v38 = vmul.f32 %v6493_v3, %v7324_v43  ;;  %407 = vst.msk [vmem:[#allocation3 + $0x99] sm:$0x7f] %vm399_vm4, %v7363_v34 }
 0x207   : > { %v958_v25 = vsel %vm905_vm1, %v956_v47, %v957_v37  ;;  %v7441_v35 = vmul.f32 %v6503_v9, %v7324_v43  ;;  %v7445_v13 = vmul.f32 %v7234_v50, %v610_v28  ;;  %v714_v27 = vadd.f32 %v7150_v20, %v682_v21 }
 0x208   : > { %v7428_v46 = vld [vmem:[#allocation3 + $0x20] sm:$0xff]  ;;  %v1524_v41 = vrot.slane %v1410_v23, 1  ;;  %v1358_v61 = vadd.f32 %v1326_v57, %v7301_v14  ;;  %v1200_v47 = vsel %vm1150_vm2, %v1197_v15, %v1199_v32  ;;  %v1328_v45 = vmul.f32 %v6497_v7, %v7324_v43 }
 0x209   : > { %v5604_v36 = vpack.i.bf16 %v7428_v46, %v7407_v39  ;;  %v1978_v28 = vmul.f32 %v6557_v16, %v7324_v43  ;;  %v2222_v21 = vmul.f32 %v7234_v50, %v7324_v43  ;;  %v1038_v14 = vadd.f32 %v958_v25, %v713_v17 }
 0x20a   : > { %v1202_v57 = vrot.slane %v7434_v38, 2  ;;  %v1282_v23 = vadd.f32 %v1200_v47, %v1037_v5  ;;  %v1522_v60 = vsel %vm905_vm1, %v1519_v33, %v1521_v51  ;;  %v1525_v10 = vsel %vm905_vm1, %v1523_v30, %v1524_v41 }
 0x20b   : > { %5605 = vrot.lane.b32.xlu0 %v5604_v36, %s6093_s8  ;;  %v1768_v15 = vrot.slane %v7441_v35, 2  ;;  %v2090_v32 = vrot.slane %v1978_v28, 1  ;;  %v841_v36 = vmul.f32 %v6490_v2, %v778_v42  ;;  %v1607_v22 = vadd.f32 %v1522_v60, %v1358_v61 }
 0x20c   : > { %v1608_v52 = vadd.f32 %v1525_v10, %v1359_v49  ;;  %v1766_v17 = vsel %vm1150_vm2, %v1763_v48, %v1765_v12  ;;  %v1411_v63 = vmul.f32 %v6500_v8, %v778_v42  ;;  %v2334_v33 = vrot.slane %v2222_v21, 2 }
 0x20d   : > { %v2091_v26 = vsel %vm905_vm1, %v2089_v18, %v2090_v32  ;;  %v959_v51 = vrot.slane %v841_v36, 1  ;;  %v1086_v30 = vmul.f32 %v6493_v3, %v778_v42  ;;  %v1203_v5 = vsel %vm1150_vm2, %v1201_v54, %v1202_v57 }
 0x20e   : > { %v2177_v38 = vadd.f32 %v2091_v26, %v1928_v11  ;;  %v1526_v25 = vrot.slane %v1411_v63, 1  ;;  %v1655_v49 = vmul.f32 %v6503_v9, %v778_v42  ;;  %v1283_v35 = vadd.f32 %v1203_v5, %v1038_v14  ;;  %v2519_v5 = vld [vmem:[#allocation2 + $0x11] ss:$2 sm:$0xff] }
 0x20f   : > { %v1769_v40 = vsel %vm1150_vm2, %v1767_v59, %v1768_v15  ;;  %v1979_v56 = vmul.f32 %v6557_v16, %v778_v42  ;;  %v2223_v48 = vmul.f32 %v7234_v50, %v778_v42  ;;  %v1851_v12 = vadd.f32 %v1766_v17, %v1607_v22  ;;  %v7493_v42 = vpop.permute.xlu0 %614 }
 0x210   : > { %v1852_v61 = vadd.f32 %v1769_v40, %v1608_v52  ;;  %v960_v18 = vsel %vm905_vm1, %v957_v37, %v959_v51  ;;  %v1527_v47 = vsel %vm905_vm1, %v1524_v41, %v1526_v25  ;;  %v1360_v28 = vadd.f32 %v1328_v45, %v1282_v23  ;;  %v783_v52 = vpop.permute.xlu1 %782 }
 0x211   : > { %v2335_v54 = vsel %vm1150_vm2, %v2333_v6, %v2334_v33  ;;  %v1204_v11 = vrot.slane %v1086_v30, 2  ;;  %v2092_v21 = vrot.slane %v1979_v56, 1  ;;  %v1772_v14 = vrot.slane %v7416_v24, 2  ;;  %v2503_v30 = vld [vmem:[#allocation2 + $0x10] ss:$2 sm:$0xff] }
 0x212   : > { %v1897_v59 = vmul.f32 %v6517_v19, %v7324_v43  ;;  %v7491_v60 = vadd.f32 %v2335_v54, %v2177_v38  ;;  %v1770_v22 = vrot.slane %v1655_v49, 2  ;;  %v2094_v37 = vrot.slane %v7424_v53, 1 }
 0x213   : > { %v1039_v41 = vadd.f32 %v960_v18, %v714_v27  ;;  %v1609_v45 = vadd.f32 %v1527_v47, %v1360_v28  ;;  %v2336_v55 = vrot.slane %v2223_v48, 2  ;;  %v2338_v6 = vrot.slane %v7445_v13, 2 }
 0x214   : > { %v7498_v23 = vadd.f32 %v7398_v0, %v1283_v35  ;;  %v1929_v10 = vadd.f32 %v1897_v59, %v1851_v12  ;;  %v1930_v36 = vadd.f32 %v7421_v44, %v1852_v61  ;;  %v1205_v43 = vsel %vm1150_vm2, %v1202_v57, %v1204_v11 }
 0x215   : > { %v2093_v17 = vsel %vm905_vm1, %v2090_v32, %v2092_v21  ;;  %v1982_v63 = vmul.f32 %v6557_v16, %v783_v52  ;;  %v7506_v53 = vmul.f32 %v6490_v2, %v7493_v42  ;;  %v2453_v27 = vmax.f32 %v7491_v60, 0.0 }
 0x216   : > { %v1771_v13 = vsel %vm1150_vm2, %v1768_v15, %v1770_v22  ;;  %v7511_v0 = vmul.f32 %v6490_v2, %v783_v52  ;;  %v2226_v26 = vmul.f32 %v7234_v50, %v783_v52  ;;  %v7514_v44 = vadd.f32 %v1205_v43, %v1039_v41 }
 0x217   : > { %v1853_v57 = vadd.f32 %v1771_v13, %v1609_v45  ;;  %v2337_v32 = vsel %vm1150_vm2, %v2334_v33, %v2336_v55  ;;  %v7518_v51 = vmul.f32 %v6493_v3, %v783_v52  ;;  %v2178_v38 = vadd.f32 %v2093_v17, %v1929_v10  ;;  %v620_v10 = vpop.permute.xlu0 %619 }
 0x218   : > { %v962_v25 = vrot.slane %v7506_v53, 1  ;;  %v7523_v15 = vmul.f32 %v6493_v3, %v7493_v42  ;;  %v7527_v49 = vmul.f32 %v6500_v8, %v7493_v42  ;;  %v2097_v35 = vrot.slane %v1982_v63, 1 }
 0x219   : > { %v1899_v33 = vmul.f32 %v6517_v19, %v7493_v42  ;;  %v1981_v40 = vmul.f32 %v6557_v16, %v7493_v42  ;;  %v2225_v56 = vmul.f32 %v7234_v50, %v7493_v42  ;;  %v2341_v48 = vrot.slane %v2226_v26, 2 }
 0x21a   : > { %v7537_v12 = vmul.f32 %v6503_v9, %v7493_v42  ;;  %v2533_v61 = vmax.f32 %v2503_v30, %v2519_v5  ;;  %v1529_v18 = vrot.slane %v7527_v49, 1  ;;  %v964_v11 = vrot.slane %v7511_v0, 1 }
 0x21b   : > { %v1931_v47 = vadd.f32 %v1899_v33, %v1853_v57  ;;  %v2095_v28 = vrot.slane %v1981_v40, 1  ;;  %v2339_v54 = vrot.slane %v2225_v56, 2  ;;  %v1209_v21 = vrot.slane %v7518_v51, 2  ;;  %v7585_v56 = vld [vmem:[#allocation3 + $0x28] sm:$0xff] }
 0x21c   : > { %v7551_v59 = vmul.f32 %v6500_v8, %v783_v52  ;;  %v963_v22 = vsel %vm905_vm1, %v961_v58, %v962_v25  ;;  %2541 = vst.msk [vmem:[#allocation3 + $0x31] sm:$0xff] %vm379_vm0, %v2533_v61  ;;  %v2422_v41 = vadd.f32 %v2337_v32, %v2178_v38  ;;  %v7560_v45 = vmul.f32 %v6503_v9, %v783_v52 }
 0x21d   : > { %v2096_v34 = vsel %vm905_vm1, %v2094_v37, %v2095_v28  ;;  %v2098_v55 = vsel %vm905_vm1, %v2095_v28, %v2097_v35  ;;  %v1207_v43 = vrot.slane %v7523_v15, 2  ;;  %v1773_v17 = vrot.slane %v7537_v12, 2  ;;  %v7573_v37 = vpop.permute.xlu1 %624 }
 0x21e   : > { %v2179_v63 = vadd.f32 %v2096_v34, %v1930_v36  ;;  %v2180_v13 = vadd.f32 %v2098_v55, %v1931_v47  ;;  %v9589_v31 = vrot.slane %v7413_v4, 1  ;;  %v2340_v52 = vsel %vm1150_vm2, %v2338_v6, %v2339_v54 }
 0x21f   : > { %v2342_v26 = vsel %vm1150_vm2, %v2339_v54, %v2341_v48  ;;  %v1040_v57 = vadd.f32 %v963_v22, %v7410_v29  ;;  %v684_v32 = vmul.f32 %v6487_v1, %v7493_v42  ;;  %v685_v5 = vmul.f32 %v6487_v1, %v620_v10 }
 0x220   : > { %v1530_v58 = vsel %vm905_vm1, %v9589_v31, %v1529_v18  ;;  %v2423_v30 = vadd.f32 %v2340_v52, %v2179_v63  ;;  %v2424_v36 = vadd.f32 %v2342_v26, %v2180_v13  ;;  %v2454_v38 = vmax.f32 %v2422_v41, 0.0  ;;  %v2549_v41 = vld [vmem:[#allocation3 + $0x10] sm:$0xff] }
 0x221   : > { %v1531_v4 = vrot.slane %v7551_v59, 1  ;;  %v1775_v35 = vrot.slane %v7560_v45, 2  ;;  %v7583_v6 = vmul.f32 %v6497_v7, %v7493_v42  ;;  %v9590_v29 = vrot.slane %v7393_v62, 2  ;;  %v630_v13 = vpop.permute.xlu1 %629 }
 0x222   : > { %v2455_v33 = vmax.f32 %v2423_v30, 0.0  ;;  %v2456_v40 = vmax.f32 %v2424_v36, 0.0  ;;  %v1610_v61 = vadd.f32 %v1530_v58, %v7498_v23  ;;  %v1774_v42 = vsel %vm1150_vm2, %v1772_v14, %v1773_v17 }
 0x223   : > { %v1208_v48 = vsel %vm1150_vm2, %v9590_v29, %v1207_v43  ;;  %v7593_v47 = vld [vmem:[#allocation3 + $0x30] sm:$0xff]  ;;  %v845_v54 = vmul.f32 %v6490_v2, %v620_v10  ;;  %v2587_v22 = vrot.slane %v7407_v39, 1  ;;  %v7607_v55 = vadd.f32 %v7150_v20, %v685_v5 }
 0x224   : > { %v1285_v28 = vadd.f32 %v1208_v48, %v1040_v57  ;;  %v2477_v62 = vmax.f32 %v2453_v27, %v2455_v33  ;;  %v2478_v34 = vmax.f32 %v2454_v38, %v2456_v40  ;;  %v5614_v23 = vpack.i.bf16 %v7593_v47, %v7585_v56 }
 0x225   : > { %v7610_v63 = vmul.f32 %v6493_v3, %v620_v10  ;;  %v1331_v24 = vmul.f32 %v6497_v7, %v620_v10  ;;  %v7614_v14 = vrot.slane %v7428_v46, 1  ;;  %v2591_v39 = vrot.slane %v7585_v56, 1 }
 0x226   : > { %2493 = vst.msk [vmem:[#allocation2 + $0x40] sm:$0xff] %vm379_vm0, %v2477_v62  ;;  %2494 = vst.msk [vmem:[#allocation2 + $0x48] sm:$0xff] %vm379_vm0, %v2478_v34  ;;  %5615 = vrot.lane.b32.xlu1 %v5614_v23, %s6093_s8  ;;  %v1854_v60 = vadd.f32 %v1774_v42, %v1610_v61  ;;  %v7621_v27 = vmul.f32 %v6500_v8, %v620_v10  ;;  %v7624_v31 = vmul.f32 %v6503_v9, %v620_v10 }
 0x227   : > { %v2586_v58 = vrot.slane %v2549_v41, 1  ;;  %v966_v52 = vrot.slane %v845_v54, 1  ;;  %v7627_v46 = vmul.f32 %v6557_v16, %v620_v10  ;;  %v2590_v26 = vsel %vm905_vm1, %v2587_v22, %v7614_v14 }
 0x228   : > { %v7635_v57 = vsel %vm905_vm1, %v7614_v14, %v2591_v39  ;;  %v7638_v30 = vmul.f32 %v7234_v50, %v620_v10  ;;  %v687_v38 = vmul.f32 %v6487_v1, %v630_v13  ;;  %v1211_v33 = vrot.slane %v7610_v63, 2 }
 0x229   : > { %v5619_v36 = vpack.i.bf16 %v7635_v57, %v2590_v26  ;;  %v2588_v5 = vsel %vm905_vm1, %v2586_v58, %v2587_v22  ;;  %v1363_v40 = vadd.f32 %v1331_v24, %v1285_v28  ;;  %v1900_v29 = vmul.f32 %v6517_v19, %v620_v10 }
 0x22a   : > { %v5609_v48 = vpack.i.bf16 %v2588_v5, %v2586_v58  ;;  %v1533_v61 = vrot.slane %v7621_v27, 1  ;;  %v1777_v42 = vrot.slane %v7624_v31, 2  ;;  %v7649_v54 = vmul.f32 %v6490_v2, %v630_v13 }
 0x22b   : > { %5620 = vrot.lane.b32.xlu1 %v5619_v36, %s6093_s8  ;;  %v7652_v41 = vmul.f32 %v6493_v3, %v630_v13  ;;  %v1932_v22 = vadd.f32 %v1900_v29, %v1854_v60  ;;  %v2099_v62 = vrot.slane %v7627_v46, 1  ;;  %v716_v10 = vadd.f32 %v7150_v20, %v684_v32 }
 0x22c   : > { %5610 = vrot.lane.b32.xlu0 %v5609_v48, %s6093_s8  ;;  %v846_v28 = vmul.f32 %v6490_v2, %v7573_v37  ;;  %v2343_v34 = vrot.slane %v7638_v30, 2  ;;  %v7661_v23 = vadd.f32 %v7150_v20, %v687_v38  ;;  %v7664_v63 = vmul.f32 %v6497_v7, %v630_v13 }
 0x22d   : > { %v965_v24 = vsel %vm905_vm1, %v962_v25, %v964_v11  ;;  %v7672_v60 = vmul.f32 %v6500_v8, %v630_v13  ;;  %v7676_v58 = vmul.f32 %v6493_v3, %v7573_v37  ;;  %v971_v46 = vrot.slane %v7649_v54, 1 }
 0x22e   : > { %v967_v32 = vrot.slane %v846_v28, 1  ;;  %v1041_v27 = vadd.f32 %v965_v24, %v716_v10  ;;  %v1216_v26 = vrot.slane %v7652_v41, 2  ;;  %v686_v0 = vmul.f32 %v6487_v1, %v7573_v37  ;;  %v788_v28 = vpop.permute.xlu0 %787  ;;  %v5754_v41 = vld [vmem:[#allocation11 + $0x68] sm:$0xff]  }
 0x22f   : > { %v1416_v53 = vmul.f32 %v6500_v8, %v7573_v37  ;;  %v7685_v25 = vmul.f32 %v6503_v9, %v630_v13  ;;  %v7688_v11 = vmul.f32 %v6517_v19, %v630_v13  ;;  %v1210_v36 = vsel %vm1150_vm2, %v1207_v43, %v1209_v21 }
 0x230   : > { %v1362_v5 = vadd.f32 %v7583_v6, %v7514_v44  ;;  %v7698_v38 = vmul.f32 %v6557_v16, %v630_v13  ;;  %v968_v29 = vsel %vm905_vm1, %v966_v52, %v967_v32  ;;  %v1212_v48 = vrot.slane %v7676_v58, 2 }
 0x231   : > { %v1286_v10 = vadd.f32 %v1210_v36, %v1041_v27  ;;  %v1538_v24 = vrot.slane %v7672_v60, 1  ;;  %v7704_v51 = vmul.f32 %v7234_v50, %v630_v13  ;;  %v1534_v15 = vrot.slane %v1416_v53, 1 }
 0x232   : > { %v7708_v21 = vmul.f32 %v6503_v9, %v7573_v37  ;;  %v718_v44 = vadd.f32 %v7150_v20, %v686_v0  ;;  %v1332_v43 = vmul.f32 %v6497_v7, %v7573_v37  ;;  %v1532_v6 = vsel %vm905_vm1, %v1529_v18, %v1531_v4 }
 0x233   : > { %v1984_v13 = vmul.f32 %v6557_v16, %v7573_v37  ;;  %v1042_v52 = vadd.f32 %v968_v29, %v7607_v55  ;;  %v1611_v27 = vadd.f32 %v1532_v6, %v1362_v5  ;;  %v7723_v53 = vmul.f32 %v7234_v50, %v7573_v37 }
 0x234   : > { %v847_v20 = vmul.f32 %v6490_v2, %v788_v28  ;;  %v1213_v59 = vsel %vm1150_vm2, %v1211_v33, %v1212_v48  ;;  %v1364_v0 = vadd.f32 %v1332_v43, %v1286_v10  ;;  %v1776_v49 = vsel %vm1150_vm2, %v1773_v17, %v1775_v35 }
 0x235   : > { %v2100_v18 = vrot.slane %v1984_v13, 1  ;;  %v1535_v4 = vsel %vm905_vm1, %v1533_v61, %v1534_v15  ;;  %v1778_v55 = vrot.slane %v7708_v21, 2  ;;  %v1417_v5 = vmul.f32 %v6500_v8, %v788_v28  ;;  %v7744_v61 = vld [vmem:[#allocation3 + $0x38] sm:$0xff] }
 0x236   : > { %v969_v36 = vrot.slane %v847_v20, 1  ;;  %v1612_v29 = vadd.f32 %v1535_v4, %v1363_v40  ;;  %v1901_v6 = vmul.f32 %v6517_v19, %v7573_v37  ;;  %v1092_v33 = vmul.f32 %v6493_v3, %v788_v28 }
 0x237   : > { %v1985_v45 = vmul.f32 %v6557_v16, %v788_v28  ;;  %v1855_v10 = vadd.f32 %v1776_v49, %v1611_v27  ;;  %v2101_v12 = vsel %vm905_vm1, %v2099_v62, %v2100_v18  ;;  %v2344_v17 = vrot.slane %v7723_v53, 2 }
 0x238   : > { %v1661_v35 = vmul.f32 %v6503_v9, %v788_v28  ;;  %v1287_v21 = vadd.f32 %v1213_v59, %v1042_v52  ;;  %v2181_v43 = vadd.f32 %v2101_v12, %v1932_v22  ;;  %v970_v40 = vsel %vm905_vm1, %v967_v32, %v969_v36  ;;  %v5745_v36 = vld [vmem:[#allocation11] sm:$0xff]  }
 0x239   : > { %v1536_v13 = vrot.slane %v1417_v5, 1  ;;  %v1779_v37 = vsel %vm1150_vm2, %v1777_v42, %v1778_v55  ;;  %v2102_v20 = vrot.slane %v1985_v45, 1  ;;  %v2229_v27 = vmul.f32 %v7234_v50, %v788_v28  ;;  %v5744_v42 = vld [vmem:[#allocation11 + $0x40] sm:$0xff]   ;;  %v5746_v5 = vld [vmem:[#allocation11 + $0x48] sm:$0xff]  }
 0x23a   : > { %v7752_v62 = vrot.slane %v7593_v47, 1  ;;  %v1856_v53 = vadd.f32 %v1779_v37, %v1612_v29  ;;  %v1214_v49 = vrot.slane %v1092_v33, 2  ;;  %v2595_v52 = vrot.slane %v7744_v61, 1  ;;  %v7777_v33 = vpop.permute.xlu0 %634  ;;  %5237 = vmatprep.subr.bf16.mxu0 %v5744_v42  ;;  %v2505_v37 = vld [vmem:[#allocation2 + $0x20] ss:$2 sm:$0xff] }
 0x23b   : > { %v1537_v4 = vsel %vm905_vm1, %v1534_v15, %v1536_v13  ;;  %v1933_v22 = vadd.f32 %v1901_v6, %v1855_v10  ;;  %v2345_v32 = vsel %vm1150_vm2, %v2343_v34, %v2344_v17  ;;  %v1043_v31 = vadd.f32 %v970_v40, %v718_v44  ;;  %v793_v34 = vpop.permute.xlu1 %792  ;;  %5238 = vmatpush3.bf16.msra.mxu0 %v5745_v36 }
 0x23c   : > { %v1780_v59 = vrot.slane %v1661_v35, 2  ;;  %v7759_v28 = vadd.f32 %v2345_v32, %v2181_v43  ;;  %v1613_v45 = vadd.f32 %v1537_v4, %v1364_v0  ;;  %v7765_v15 = vsel %vm905_vm1, %v2591_v39, %v7752_v62  ;;  %5239 = vmatprep.subr.bf16.mxu0 %v5746_v5  ;;  %v5750_v5 = vld [vmem:[#allocation11 + $0x58] sm:$0xff]  }
 0x23d   : > { %v7771_v30 = vsel %vm905_vm1, %v7752_v62, %v2595_v52  ;;  %v1782_v44 = vrot.slane %v7685_v25, 2  ;;  %v2103_v29 = vsel %vm905_vm1, %v2100_v18, %v2102_v20  ;;  %v2346_v6 = vrot.slane %v2229_v27, 2  ;;  %v5747_v18 = vld [vmem:[#allocation11 + $0x8] sm:$0xff]  }
 0x23e   : > { %9591 = vst [vmem:[#allocation23_spill] sm:$0xff] %v7771_v30  ;;  %v5629_v0 = vpack.i.bf16 %v7771_v30, %v7765_v15  ;;  %v2104_v39 = vrot.slane %v7698_v38, 1  ;;  %v7781_v10 = vadd.f32 %v7664_v63, %v1287_v21  ;;  %v1934_v12 = vadd.f32 %v7688_v11, %v1856_v53  ;;  %v5748_v63 = vld [vmem:[#allocation11 + $0x50] sm:$0xff]  }
 0x23f   : > { %v1215_v35 = vsel %vm1150_vm2, %v1212_v48, %v1214_v49  ;;  %v2348_v43 = vrot.slane %v7704_v51, 2  ;;  %v1781_v13 = vsel %vm1150_vm2, %v1778_v55, %v1780_v59  ;;  %v1988_v38 = vmul.f32 %v6557_v16, %v793_v34  ;;  %v2521_v51 = vld [vmem:[#allocation2 + $0x21] ss:$2 sm:$0xff]  ;;  %5240 = vmatpush3.bf16.msra.mxu0 %v5747_v18 }
 0x240   : > { %v7788_v40 = vadd.f32 %v1215_v35, %v1043_v31  ;;  %5630 = vrot.lane.b32.xlu1 %v5629_v0, %s6093_s8  ;;  %v2457_v11 = vmax.f32 %v7759_v28, 0.0  ;;  %v1857_v21 = vadd.f32 %v1781_v13, %v1613_v45  ;;  %v2182_v58 = vadd.f32 %v2103_v29, %v1933_v22  ;;  %5241 = vmatprep.subr.bf16.mxu0 %v5748_v63 }
 0x241   : > { %v7796_v48 = vmul.f32 %v6490_v2, %v7777_v33  ;;  %v2347_v20 = vsel %vm1150_vm2, %v2344_v17, %v2346_v6  ;;  %v7800_v55 = vmul.f32 %v6490_v2, %v793_v34  ;;  %v2107_v27 = vrot.slane %v1988_v38, 1  ;;  %v5749_v17 = vld [vmem:[#allocation11 + $0x10] sm:$0xff]  }
 0x242   : > { %v2232_v53 = vmul.f32 %v7234_v50, %v793_v34  ;;  %v7806_v4 = vmul.f32 %v6493_v3, %v7777_v33  ;;  %v7810_v22 = vmul.f32 %v6500_v8, %v7777_v33  ;;  %v1903_v32 = vmul.f32 %v6517_v19, %v7777_v33 }
 0x243   : > { %v972_v49 = vrot.slane %v7796_v48, 1  ;;  %v7816_v31 = vmul.f32 %v6503_v9, %v7777_v33  ;;  %v1987_v59 = vmul.f32 %v6557_v16, %v7777_v33  ;;  %v2231_v42 = vmul.f32 %v7234_v50, %v7777_v33  ;;  %5242 = vmatpush3.bf16.msra.mxu0 %v5749_v17 }
 0x244   : > { %v2534_v36 = vmax.f32 %v2505_v37, %v2521_v51  ;;  %v2426_v45 = vadd.f32 %v2347_v20, %v2182_v58  ;;  %v7823_v29 = vmul.f32 %v6493_v3, %v793_v34  ;;  %v9544_v6 = vrot.slane %v7810_v22, 1  ;;  %v5751_v37 = vld [vmem:[#allocation11 + $0x18] sm:$0xff]   ;;  %5243 = vmatprep.subr.bf16.mxu0 %v5750_v5 }
 0x245   : > { %v1935_v0 = vadd.f32 %v1903_v32, %v1857_v21  ;;  %v2351_v35 = vrot.slane %v2232_v53, 2  ;;  %v973_v18 = vsel %vm905_vm1, %v971_v46, %v972_v49  ;;  %v2105_v13 = vrot.slane %v1987_v59, 1  ;;  %v5752_v53 = vld [vmem:[#allocation11 + $0x60] sm:$0xff]  }
 0x246   : > { %v2349_v38 = vrot.slane %v2231_v42, 2  ;;  %2542 = vst.msk [vmem:[#allocation3 + $0x41] sm:$0xff] %vm379_vm0, %v2534_v36  ;;  %v974_v50 = vrot.slane %v7800_v55, 1  ;;  %v7834_v63 = vmul.f32 %v6500_v8, %v793_v34  ;;  %v7837_v58 = vmul.f32 %v6503_v9, %v793_v34 }
 0x247   : > { %v1217_v21 = vrot.slane %v7806_v4, 2  ;;  %v1540_v54 = vsel %vm905_vm1, %v1538_v24, %v9544_v6  ;;  %v9546_v46 = vrot.slane %v7816_v31, 2  ;;  %v2106_v51 = vsel %vm905_vm1, %v2104_v39, %v2105_v13  ;;  %v7854_v6 = vpop.permute.xlu1 %644  ;;  %v640_v39 = vpop.permute.xlu0 %639  ;;  %5244 = vmatpush3.bf16.msra.mxu0 %v5751_v37 }
 0x248   : > { %v2108_v20 = vsel %vm905_vm1, %v2105_v13, %v2107_v27  ;;  %v1219_v34 = vrot.slane %v7823_v29, 2  ;;  %v2183_v32 = vadd.f32 %v2106_v51, %v1934_v12  ;;  %v1044_v17 = vadd.f32 %v973_v18, %v7661_v23  ;;  %5245 = vmatprep.subr.bf16.mxu0 %v5752_v53 }
 0x249   : > { %v2184_v59 = vadd.f32 %v2108_v20, %v1935_v0  ;;  %v2458_v42 = vmax.f32 %v2426_v45, 0.0  ;;  %v688_v60 = vmul.f32 %v6487_v1, %v7777_v33  ;;  %v2350_v24 = vsel %vm1150_vm2, %v2348_v43, %v2349_v38  ;;  %v5753_v0 = vld [vmem:[#allocation11 + $0x20] sm:$0xff]  }
 0x24a   : > { %v2352_v36 = vsel %vm1150_vm2, %v2349_v38, %v2351_v35  ;;  %v1541_v27 = vrot.slane %v7834_v63, 1  ;;  %v2427_v5 = vadd.f32 %v2350_v24, %v2183_v32  ;;  %v1614_v12 = vadd.f32 %v1540_v54, %v7781_v10 }
 0x24b   : > { %v2428_v13 = vadd.f32 %v2352_v36, %v2184_v59  ;;  %v1334_v45 = vmul.f32 %v6497_v7, %v7777_v33  ;;  %v1218_v43 = vsel %vm1150_vm2, %v1216_v26, %v1217_v21  ;;  %v1784_v35 = vsel %vm1150_vm2, %v1782_v44, %v9546_v46  ;;  %5246 = vmatpush3.bf16.msra.mxu0 %v5753_v0 }
 0x24c   : > { %v2459_v10 = vmax.f32 %v2427_v5, 0.0  ;;  %v1289_v33 = vadd.f32 %v1218_v43, %v1044_v17  ;;  %v7876_v54 = vmul.f32 %v6490_v2, %v640_v39  ;;  %v7883_v44 = vmul.f32 %v6493_v3, %v640_v39  ;;  %v5755_v17 = vld [vmem:[#allocation11 + $0x28] sm:$0xff]   ;;  %v5756_v5 = vld [vmem:[#allocation11 + $0x70] sm:$0xff]   ;;  %5247 = vmatprep.subr.bf16.mxu0 %v5754_v41 }
 0x24d   : > { %v2460_v18 = vmax.f32 %v2428_v13, 0.0  ;;  %v7871_v38 = vld [vmem:[#allocation3 + $0x40] sm:$0xff]  ;;  %v7873_v37 = vld [vmem:[#allocation3 + $0x48] sm:$0xff]  ;;  %v1858_v32 = vadd.f32 %v1784_v35, %v1614_v12  ;;  %v1421_v59 = vmul.f32 %v6500_v8, %v640_v39  ;;  %v7900_v28 = vmul.f32 %v6503_v9, %v640_v39 }
 0x24e   : > { %v5624_v26 = vpack.i.bf16 %v7871_v38, %v7744_v61  ;;  %v2597_v51 = vrot.slane %v7871_v38, 1  ;;  %v9545_v25 = vrot.slane %v7873_v37, 1  ;;  %v2479_v20 = vmax.f32 %v2457_v11, %v2459_v10  ;;  %v7918_v10 = vld [vmem:[#allocation8 + $0x8] ss:$0 sm:$0xff] }
 0x24f   : > { %v2480_v53 = vmax.f32 %v2458_v42, %v2460_v18  ;;  %v7903_v11 = vmul.f32 %v6557_v16, %v640_v39  ;;  %v7905_v42 = vpop.permute.xlu1 %649  ;;  %v7912_v13 = vmul.f32 %v6487_v1, %v640_v39  ;;  %v1335_v0 = vmul.f32 %v6497_v7, %v640_v39  ;;  %5248 = vmatpush3.bf16.msra.mxu0 %v5755_v17 }
 0x250   : > { %5625 = vrot.lane.b32.xlu0 %v5624_v26, %s6093_s8  ;;  %v7892_v24 = vsel %vm905_vm1, %v2595_v52, %v2597_v51  ;;  %v7897_v36 = vsel %vm905_vm1, %v2597_v51, %v9545_v25  ;;  %2495 = vst.msk [vmem:[#allocation2 + $0x50] sm:$0xff] %vm379_vm0, %v2479_v20  ;;  %v1904_v35 = vmul.f32 %v6517_v19, %v640_v39  ;;  %v7923_v26 = vld [vmem:[#allocation10] ss:$0 sm:$0xff]  ;;  %v1787_v43 = vrot.slane %v7900_v28, 2 }
 0x251   : > { %9592 = vst [vmem:[#allocation24_spill] sm:$0xff] %v7892_v24  ;;  %9593 = vst [vmem:[#allocation25_spill] sm:$0xff] %v7897_v36  ;;  %v5639_v52 = vpack.i.bf16 %v7897_v36, %v7892_v24  ;;  %v7921_v18 = vmul.f32 %v7918_v10, %v640_v39  ;;  %v720_v51 = vadd.f32 %v7923_v26, %v688_v60  ;;  %v5757_v39 = vld [vmem:[#allocation11 + $0x30] sm:$0xff]   ;;  %v2109_v60 = vrot.slane %v7903_v11, 1 }
 0x252   : > { %2496 = vst.msk [vmem:[#allocation2 + $0x58] sm:$0xff] %vm379_vm0, %v2480_v53  ;;  %v1367_v20 = vadd.f32 %v1335_v0, %v1289_v33  ;;  %v1543_v53 = vrot.slane %v1421_v59, 1  ;;  %v7929_v41 = vmul.f32 %v6557_v16, %v7905_v42  ;;  %v975_v25 = vsel %vm905_vm1, %v972_v49, %v974_v50  ;;  %5249 = vmatprep.subr.bf16.mxu0 %v5756_v5  ;;  %v5758_v59 = vld [vmem:[#allocation11 + $0x78] sm:$0xff]   ;;  %v798_v50 = vpop.permute.xlu0 %797 }
 0x253   : > { %5640 = vrot.lane.b32.xlu1 %v5639_v52, %s6093_s8  ;;  %v1936_v12 = vadd.f32 %v1904_v35, %v1858_v32  ;;  %v1366_v33 = vadd.f32 %v1334_v45, %v7788_v40  ;;  %v7941_v52 = vmul.f32 %v6517_v19, %v7905_v42  ;;  %v7945_v48 = vmul.f32 %v6490_v2, %v7854_v6 }
 0x254   : > { %v1422_v55 = vmul.f32 %v6500_v8, %v7854_v6  ;;  %v1666_v49 = vmul.f32 %v6503_v9, %v7854_v6  ;;  %v2353_v32 = vrot.slane %v7921_v18, 2  ;;  %v7954_v40 = vmul.f32 %v7918_v10, %v7905_v42  ;;  %5250 = vmatpush3.bf16.msra.mxu0 %v5757_v39  ;;  %v5759_v18 = vld [vmem:[#allocation11 + $0x38] sm:$0xff]  }
 0x255   : > { %v690_v45 = vmul.f32 %v6487_v1, %v7854_v6  ;;  %v1045_v17 = vadd.f32 %v975_v25, %v720_v51  ;;  %v9594_v11 = vrot.slane %v7810_v22, 1  ;;  %v1990_v35 = vmul.f32 %v6557_v16, %v7854_v6  ;;  %5251 = vmatprep.subr.bf16.mxu0 %v5758_v59 }
 0x256   : > { %v1544_v0 = vrot.slane %v1422_v55, 1  ;;  %v7968_v46 = vmul.f32 %v6493_v3, %v7854_v6  ;;  %v1788_v25 = vrot.slane %v1666_v49, 2  ;;  %v853_v51 = vmul.f32 %v6490_v2, %v798_v50 }
 0x257   : > { %v1542_v5 = vsel %vm905_vm1, %v9594_v11, %v1541_v27  ;;  %v977_v63 = vrot.slane %v7945_v48, 1  ;;  %v1220_v22 = vsel %vm1150_vm2, %v1217_v21, %v1219_v34  ;;  %v7980_v39 = vmul.f32 %v7918_v10, %v7854_v6 }
 0x258   : > { %v1615_v23 = vadd.f32 %v1542_v5, %v1366_v33  ;;  %v1545_v27 = vsel %vm905_vm1, %v1543_v53, %v1544_v0  ;;  %v1290_v55 = vadd.f32 %v1220_v22, %v1045_v17  ;;  %v2110_v49 = vrot.slane %v1990_v35, 1  ;;  %5252 = vmatpush3.bf16.msra.mxu0 %v5759_v18 }
 0x259   : > { %v1616_v33 = vadd.f32 %v1545_v27, %v1367_v20  ;;  %v1098_v11 = vmul.f32 %v6493_v3, %v798_v50  ;;  %v9595_v59 = vrot.slane %v7837_v58, 2  ;;  %v9596_v5 = vrot.slane %v7816_v31, 2 }
 0x25a   : > { %v979_v4 = vrot.slane %v853_v51, 1  ;;  %v1423_v21 = vmul.f32 %v6500_v8, %v798_v50  ;;  %v1667_v34 = vmul.f32 %v6503_v9, %v798_v50  ;;  %v1336_v53 = vmul.f32 %v6497_v7, %v7854_v6 }
 0x25b   : > { %v1786_v29 = vsel %vm1150_vm2, %v9596_v5, %v9595_v59  ;;  %v1789_v20 = vsel %vm1150_vm2, %v1787_v43, %v1788_v25  ;;  %v1905_v35 = vmul.f32 %v6517_v19, %v7854_v6  ;;  %v2354_v58 = vrot.slane %v7980_v39, 2  ;;  %v803_v6 = vpop.permute.xlu1 %802 }
 0x25c   : > { %v1859_v17 = vadd.f32 %v1786_v29, %v1615_v23  ;;  %v1546_v31 = vrot.slane %v1423_v21, 1  ;;  %v1790_v22 = vrot.slane %v1667_v34, 2  ;;  %v1991_v51 = vmul.f32 %v6557_v16, %v798_v50 }
 0x25d   : > { %v1368_v27 = vadd.f32 %v1336_v53, %v1290_v55  ;;  %v1860_v59 = vadd.f32 %v1789_v20, %v1616_v33  ;;  %v2111_v5 = vsel %vm905_vm1, %v2109_v60, %v2110_v49  ;;  %v1224_v18 = vrot.slane %v1098_v11, 2  ;;  %v8008_v53 = vpop.permute.xlu0 %654 }
 0x25e   : > { %v2185_v28 = vadd.f32 %v2111_v5, %v1936_v12  ;;  %v980_v43 = vsel %vm905_vm1, %v977_v63, %v979_v4  ;;  %v1547_v23 = vsel %vm905_vm1, %v1544_v0, %v1546_v31  ;;  %v2112_v29 = vrot.slane %v1991_v51, 1  ;;  %v2507_v31 = vld [vmem:[#allocation2 + $0x30] ss:$2 sm:$0xff] }
 0x25f   : > { %v2358_v39 = vrot.slane %v7954_v40, 2  ;;  %v722_v21 = vadd.f32 %v7923_v26, %v690_v45  ;;  %v1617_v34 = vadd.f32 %v1547_v23, %v1368_v27  ;;  %v2235_v55 = vmul.f32 %v7918_v10, %v798_v50  ;;  %v2523_v45 = vld [vmem:[#allocation2 + $0x31] ss:$2 sm:$0xff] }
 0x260   : > { %v1222_v33 = vrot.slane %v7968_v46, 2  ;;  %v1937_v60 = vadd.f32 %v1905_v35, %v1859_v17  ;;  %v2355_v12 = vsel %vm1150_vm2, %v2353_v32, %v2354_v58  ;;  %v1791_v11 = vsel %vm1150_vm2, %v1788_v25, %v1790_v22 }
 0x261   : > { %v1047_v4 = vadd.f32 %v980_v43, %v722_v21  ;;  %v1861_v0 = vadd.f32 %v1791_v11, %v1617_v34  ;;  %v2113_v20 = vsel %vm905_vm1, %v2110_v49, %v2112_v29  ;;  %v1994_v40 = vmul.f32 %v6557_v16, %v803_v6 }
 0x262   : > { %v1938_v51 = vadd.f32 %v7941_v52, %v1860_v59  ;;  %v2429_v50 = vadd.f32 %v2355_v12, %v2185_v28  ;;  %v1225_v17 = vsel %vm1150_vm2, %v1222_v33, %v1224_v18  ;;  %v2238_v32 = vmul.f32 %v7918_v10, %v803_v6  ;;  %v5761_v12 = vld [vmem:[#allocation11 + $0x80] sm:$0xff]  }
 0x263   : > { %v2356_v25 = vrot.slane %v2235_v55, 2  ;;  %v2117_v35 = vrot.slane %v1994_v40, 1  ;;  %v1907_v22 = vmul.f32 %v6517_v19, %v8008_v53  ;;  %v1993_v49 = vmul.f32 %v6557_v16, %v8008_v53 }
 0x264   : > { %v2186_v27 = vadd.f32 %v2113_v20, %v1937_v60  ;;  %v8022_v5 = vmul.f32 %v6490_v2, %v803_v6  ;;  %v2237_v52 = vmul.f32 %v7918_v10, %v8008_v53  ;;  %v2535_v28 = vmax.f32 %v2507_v31, %v2523_v45  ;;  %v5760_v60 = vld [vmem:[#allocation11 + $0xc0] sm:$0xff]  }
 0x265   : > { %v8026_v59 = vadd.f32 %v1225_v17, %v1047_v4  ;;  %v2361_v18 = vrot.slane %v2238_v32, 2  ;;  %v1939_v43 = vadd.f32 %v1907_v22, %v1861_v0  ;;  %v2115_v23 = vrot.slane %v1993_v49, 1  ;;  %v1303_v32 = vpop.permute.xlu1 %1302  ;;  %5301 = vmatprep.subr.bf16.mxu1 %v5760_v60 }
 0x266   : > { %v2461_v29 = vmax.f32 %v2429_v50, 0.0  ;;  %v8029_v21 = vmul.f32 %v6493_v3, %v803_v6  ;;  %v8032_v34 = vmul.f32 %v6500_v8, %v803_v6  ;;  %v2359_v55 = vrot.slane %v2237_v52, 2  ;;  %2543 = vst.msk [vmem:[#allocation3 + $0x51] sm:$0xff] %vm379_vm0, %v2535_v28  ;;  %5302 = vmatpush3.bf16.msra.mxu1 %v5761_v12  ;;  %v5762_v52 = vld [vmem:[#allocation11 + $0xc8] sm:$0xff]  }
 0x267   : > { %v2357_v11 = vsel %vm1150_vm2, %v2354_v58, %v2356_v25  ;;  %v8037_v4 = vmul.f32 %v6503_v9, %v803_v6  ;;  %v9597_v0 = vrot.slane %v7929_v41, 1  ;;  %v2118_v40 = vsel %vm905_vm1, %v2115_v23, %v2117_v35  ;;  %5303 = vmatprep.subr.bf16.mxu1 %v5762_v52 }
 0x268   : > { %v2430_v31 = vadd.f32 %v2357_v11, %v2186_v27  ;;  %v2188_v17 = vadd.f32 %v2118_v40, %v1939_v43  ;;  %v2360_v22 = vsel %vm1150_vm2, %v2358_v39, %v2359_v55  ;;  %v2362_v58 = vsel %vm1150_vm2, %v2359_v55, %v2361_v18  ;;  %v5763_v39 = vld [vmem:[#allocation11 + $0x88] sm:$0xff]  }
 0x269   : > { %v2116_v20 = vsel %vm905_vm1, %v9597_v0, %v2115_v23  ;;  %v721_v6 = vadd.f32 %v7923_v26, %v7912_v13  ;;  %v9598_v41 = vrot.slane %v7876_v54, 1  ;;  %v8057_v18 = vmul.f32 %v6497_v7, %v1303_v32 }
 0x26a   : > { %v2187_v50 = vadd.f32 %v2116_v20, %v1938_v51  ;;  %v2432_v27 = vadd.f32 %v2362_v58, %v2188_v17  ;;  %v8061_v54 = vmul.f32 %v6500_v8, %v8008_v53  ;;  %v2462_v48 = vmax.f32 %v2430_v31, 0.0  ;;  %5304 = vmatpush3.bf16.msra.mxu1 %v5763_v39  ;;  %v5764_v31 = vld [vmem:[#allocation11 + $0xd0] sm:$0xff]  }
 0x26b   : > { %v978_v25 = vsel %vm905_vm1, %v9598_v41, %v977_v63  ;;  %v1424_v23 = vmul.f32 %v6500_v8, %v7905_v42  ;;  %v8070_v12 = vmul.f32 %v6500_v8, %v1303_v32  ;;  %v8073_v11 = vmul.f32 %v6557_v16, %v1303_v32  ;;  %5305 = vmatprep.subr.bf16.mxu1 %v5764_v31  ;;  %v8122_v31 = vld [vmem:[#allocation3 + $0x20] sm:$0xff] }
 0x26c   : > { %v2431_v49 = vadd.f32 %v2360_v22, %v2187_v50  ;;  %v1046_v13 = vadd.f32 %v978_v25, %v721_v6  ;;  %v2464_v43 = vmax.f32 %v2432_v27, 0.0  ;;  %v9599_v0 = vrot.slane %v7883_v44, 2  ;;  %v5765_v6 = vld [vmem:[#allocation11 + $0x90] sm:$0xff]  }
 0x26d   : > { %v8065_v55 = vld [vmem:[#allocation3 + $0x50] sm:$0xff]  ;;  %v8067_v60 = vld [vmem:[#allocation3 + $0x58] sm:$0xff]  ;;  %v9548_v40 = vrot.slane %v8061_v54, 1  ;;  %v8086_v46 = vmul.f32 %v6503_v9, %v1303_v32  ;;  %v8089_v44 = vmul.f32 %v7918_v10, %v1303_v32  ;;  %v1668_v27 = vmul.f32 %v6503_v9, %v7905_v42 }
 0x26e   : > { %v2463_v63 = vmax.f32 %v2431_v49, 0.0  ;;  %v1223_v20 = vsel %vm1150_vm2, %v9599_v0, %v1222_v33  ;;  %v2482_v17 = vmax.f32 %v2462_v48, %v2464_v43  ;;  %v5634_v22 = vpack.i.bf16 %v8065_v55, %v7873_v37  ;;  %v1298_v43 = vpop.permute.xlu0 %1297  ;;  %5306 = vmatpush3.bf16.msra.mxu1 %v5765_v6 }
 0x26f   : > { %v2601_v58 = vrot.slane %v8065_v55, 1  ;;  %v9547_v41 = vrot.slane %v8067_v60, 1  ;;  %v1291_v33 = vadd.f32 %v1223_v20, %v1046_v13  ;;  %v1548_v49 = vrot.slane %v1424_v23, 1  ;;  %v1869_v13 = vpop.permute.xlu1 %1868 }
 0x270   : > { %v2481_v50 = vmax.f32 %v2461_v29, %v2463_v63  ;;  %2498 = vst.msk [vmem:[#allocation2 + $0x68] sm:$0xff] %vm379_vm0, %v2482_v17  ;;  %5635 = vrot.lane.b32.xlu0 %v5634_v22, %s6093_s8  ;;  %v9600_v29 = vrot.slane %v7873_v37, 1  ;;  %v8103_v52 = vmul.f32 %v6503_v9, %v8008_v53  ;;  %v8112_v48 = vmul.f32 %v6517_v19, %v1303_v32 }
 0x271   : > { %v8108_v39 = vsel %vm905_vm1, %v2601_v58, %v9547_v41  ;;  %v1337_v63 = vmul.f32 %v6497_v7, %v7905_v42  ;;  %v1550_v20 = vsel %vm905_vm1, %v1548_v49, %v9548_v40  ;;  %v2674_v22 = vrot.slane %v7585_v56, 2 }
 0x272   : > { %2497 = vst.msk [vmem:[#allocation2 + $0x60] sm:$0xff] %vm379_vm0, %v2481_v50  ;;  %v8097_v25 = vsel %vm905_vm1, %v9600_v29, %v2601_v58  ;;  %9602 = vst [vmem:[#allocation27_spill] sm:$0xff] %v8108_v39  ;;  %v8125_v50 = vrot.slane %v8122_v31, 2  ;;  %v8130_v58 = vrot.slane %v7593_v47, 2  ;;  %v1792_v6 = vrot.slane %v1668_v27, 2 }
 0x273   : > { %9601 = vst [vmem:[#allocation26_spill] sm:$0xff] %v8097_v25  ;;  %v5654_v23 = vpack.i.bf16 %v8108_v39, %v8097_v25  ;;  %v1369_v17 = vadd.f32 %v1337_v63, %v1291_v33  ;;  %v1793_v29 = vrot.slane %v8103_v52, 2  ;;  %v1339_v49 = vmul.f32 %v6497_v7, %v1298_v43 }
 0x274   : > { %v1427_v41 = vmul.f32 %v6500_v8, %v1298_v43  ;;  %v8138_v35 = vsel %vm1150_vm2, %v8125_v50, %v2674_v22  ;;  %v8142_v56 = vsel %vm1150_vm2, %v2674_v22, %v8130_v58  ;;  %v854_v47 = vmul.f32 %v6490_v2, %v7905_v42 }
 0x275   : > { %5655 = vrot.lane.b32.xlu1 %v5654_v23, %s6093_s8  ;;  %v1618_v0 = vadd.f32 %v1550_v20, %v1369_v17  ;;  %v1671_v33 = vmul.f32 %v6503_v9, %v1298_v43  ;;  %v1995_v27 = vmul.f32 %v6557_v16, %v1298_v43  ;;  %v5659_v52 = vpack.i.bf16 %v8142_v56, %v8138_v35 }
 0x276   : > { %v691_v63 = vmul.f32 %v6487_v1, %v7905_v42  ;;  %v1908_v23 = vmul.f32 %v6517_v19, %v1298_v43  ;;  %v1099_v20 = vmul.f32 %v6493_v3, %v7905_v42  ;;  %v855_v17 = vmul.f32 %v6490_v2, %v8008_v53 }
 0x277   : > { %v1100_v22 = vmul.f32 %v6493_v3, %v8008_v53  ;;  %v1794_v32 = vsel %vm1150_vm2, %v1792_v6, %v1793_v29  ;;  %v1553_v45 = vrot.slane %v1427_v41, 1  ;;  %v8161_v28 = vmul.f32 %v7918_v10, %v1298_v43  ;;  %v1376_v6 = vpop.permute.xlu0 %1375 }
 0x278   : > { %v1338_v40 = vmul.f32 %v6497_v7, %v8008_v53  ;;  %v1862_v51 = vadd.f32 %v1794_v32, %v1618_v0  ;;  %v981_v42 = vrot.slane %v854_v47, 1  ;;  %v982_v39 = vrot.slane %v855_v17, 1 }
 0x279   : > { %5660 = vrot.lane.b32.xlu1 %v5659_v52, %s6093_s8  ;;  %v1227_v25 = vrot.slane %v1100_v22, 2  ;;  %v2119_v2 = vrot.slane %v1995_v27, 1  ;;  %v723_v24 = vadd.f32 %v7923_v26, %v691_v63  ;;  %v1798_v3 = vrot.slane %v8086_v46, 2 }
 0x27a   : > { %v1370_v41 = vadd.f32 %v1338_v40, %v8026_v59  ;;  %v1226_v43 = vrot.slane %v1099_v20, 2  ;;  %v983_v36 = vsel %vm905_vm1, %v981_v42, %v982_v39  ;;  %v1797_v52 = vrot.slane %v1671_v33, 2 }
 0x27b   : > { %v1998_v30 = vmul.f32 %v6557_v16, %v1869_v13  ;;  %v2363_v7 = vrot.slane %v8161_v28, 2  ;;  %v1048_v0 = vadd.f32 %v983_v36, %v723_v24  ;;  %v2242_v32 = vmul.f32 %v7918_v10, %v1869_v13 }
 0x27c   : > { %v9603_v47 = vrot.slane %v8032_v34, 1  ;;  %v9604_v27 = vrot.slane %v8061_v54, 1  ;;  %v1940_v17 = vadd.f32 %v1908_v23, %v1862_v51  ;;  %v1228_v59 = vsel %vm1150_vm2, %v1226_v43, %v1227_v25  ;;  %v1947_v23 = vpop.permute.xlu1 %1946 }
 0x27d   : > { %v1429_v20 = vmul.f32 %v6500_v8, %v1376_v6  ;;  %v1293_v33 = vadd.f32 %v1228_v59, %v1048_v0  ;;  %v9605_v22 = vrot.slane %v8070_v12, 1  ;;  %v8184_v24 = vmul.f32 %v6503_v9, %v1376_v6 }
 0x27e   : > { %v1552_v63 = vsel %vm905_vm1, %v9604_v27, %v9603_v47  ;;  %v1997_v36 = vmul.f32 %v6557_v16, %v1376_v6  ;;  %v1799_v34 = vsel %vm1150_vm2, %v1797_v52, %v1798_v3  ;;  %v1910_v51 = vmul.f32 %v6517_v19, %v1869_v13  ;;  %v1874_v47 = vpop.permute.xlu0 %1873 }
 0x27f   : > { %v1619_v40 = vadd.f32 %v1552_v63, %v1370_v41  ;;  %v1555_v28 = vsel %vm905_vm1, %v1553_v45, %v9605_v22  ;;  %v2124_v54 = vrot.slane %v1998_v30, 1  ;;  %v692_v8 = vmul.f32 %v6487_v1, %v8008_v53  ;;  %v2509_v63 = vld [vmem:[#allocation2 + $0x40] ss:$2 sm:$0xff]  ;;  %v2525_v1 = vld [vmem:[#allocation2 + $0x41] ss:$2 sm:$0xff] }
 0x280   : > { %v1371_v42 = vadd.f32 %v1339_v49, %v1293_v33  ;;  %v2368_v41 = vrot.slane %v2242_v32, 2  ;;  %v9606_v45 = vrot.slane %v8037_v4, 2  ;;  %v9607_v43 = vrot.slane %v8022_v5, 1 }
 0x281   : > { %v1556_v52 = vrot.slane %v1429_v20, 1  ;;  %v8200_v13 = vmul.f32 %v7918_v10, %v1376_v6  ;;  %v724_v30 = vadd.f32 %v7923_v26, %v692_v8  ;;  %v1800_v49 = vrot.slane %v8184_v24, 2 }
 0x282   : > { %v1796_v9 = vsel %vm1150_vm2, %v1793_v29, %v9606_v45  ;;  %v985_v0 = vsel %vm905_vm1, %v982_v39, %v9607_v43  ;;  %v1620_v53 = vadd.f32 %v1555_v28, %v1371_v42  ;;  %v2122_v4 = vrot.slane %v1997_v36, 1  ;;  %v2527_v42 = vld [vmem:[#allocation2 + $0x51] ss:$2 sm:$0xff] }
 0x283   : > { %v1863_v27 = vadd.f32 %v1796_v9, %v1619_v40  ;;  %v2000_v29 = vmul.f32 %v6557_v16, %v1947_v23  ;;  %v1049_v32 = vadd.f32 %v985_v0, %v724_v30  ;;  %v9608_v5 = vrot.slane %v8029_v21, 2  ;;  %v2511_v21 = vld [vmem:[#allocation2 + $0x50] ss:$2 sm:$0xff] }
 0x284   : > { %v9609_v59 = vrot.slane %v8073_v11, 1  ;;  %v1999_v40 = vmul.f32 %v6557_v16, %v1874_v47  ;;  %v1864_v26 = vadd.f32 %v1799_v34, %v1620_v53  ;;  %v2243_v33 = vmul.f32 %v7918_v10, %v1874_v47  ;;  %v8220_v34 = vld [vmem:[#allocation11 + $0x100] sm:$0xff]  }
 0x285   : > { %v1230_v39 = vsel %vm1150_vm2, %v1227_v25, %v9608_v5  ;;  %v2536_v22 = vmax.f32 %v2509_v63, %v2525_v1  ;;  %v1941_v28 = vadd.f32 %v8112_v48, %v1863_v27  ;;  %v2244_v24 = vmul.f32 %v7918_v10, %v1947_v23  ;;  %v5768_v48 = vld [vmem:[#allocation11 + $0x98] sm:$0xff]   ;;  %5397 = vmatprep.subr.bf16.mxu0 %v8220_v34 }
 0x286   : > { %v2121_v6 = vsel %vm905_vm1, %v2119_v2, %v9609_v59  ;;  %v1294_v36 = vadd.f32 %v1230_v39, %v1049_v32  ;;  %v2125_v8 = vrot.slane %v1999_v40, 1  ;;  %v1942_v25 = vadd.f32 %v1910_v51, %v1864_v26  ;;  %v2513_v27 = vld [vmem:[#allocation2 + $0x60] ss:$2 sm:$0xff]  ;;  %v5769_v39 = vld [vmem:[#allocation11 + $0xe0] sm:$0xff]  }
 0x287   : > { %v2189_v20 = vadd.f32 %v2121_v6, %v1940_v17  ;;  %v9610_v45 = vrot.slane %v8070_v12, 1  ;;  %v2369_v9 = vrot.slane %v2243_v33, 2  ;;  %2544 = vst.msk [vmem:[#allocation3 + $0x61] sm:$0xff] %vm379_vm0, %v2536_v22  ;;  %v2678_v16 = vrot.slane %v7744_v61, 2  ;;  %v5766_v17 = vld [vmem:[#allocation11 + $0xd8] sm:$0xff]  }
 0x288   : > { %v9611_v10 = vmov %v9609_v59  ;;  %v1372_v43 = vadd.f32 %v8057_v18, %v1294_v36  ;;  %v9612_v51 = vrot.slane %v8089_v44, 2  ;;  %v2126_v0 = vsel %vm905_vm1, %v2124_v54, %v2125_v8  ;;  %5307 = vmatprep.subr.bf16.mxu1 %v5766_v17  ;;  %v5770_v59 = vld [vmem:[#allocation11 + $0xa0] sm:$0xff]  }
 0x289   : > { %v1557_v2 = vsel %vm905_vm1, %v9610_v45, %v1556_v52  ;;  %v2123_v23 = vsel %vm905_vm1, %v9611_v10, %v2122_v4  ;;  %v2529_v52 = vld [vmem:[#allocation2 + $0x61] ss:$2 sm:$0xff]  ;;  %v2191_v63 = vadd.f32 %v2126_v0, %v1942_v25  ;;  %v2370_v1 = vsel %vm1150_vm2, %v2368_v41, %v2369_v9  ;;  %5308 = vmatpush3.bf16.msra.mxu1 %v5768_v48 }
 0x28a   : > { %v2365_v12 = vsel %vm1150_vm2, %v2363_v7, %v9612_v51  ;;  %v8235_v11 = vsel %vm1150_vm2, %v8130_v58, %v2678_v16  ;;  %v2366_v18 = vrot.slane %v8200_v13, 2  ;;  %v1621_v53 = vadd.f32 %v1557_v2, %v1372_v43  ;;  %5309 = vmatprep.subr.bf16.mxu1 %v5769_v39  ;;  %v5774_v0 = vld [vmem:[#allocation11 + $0xb0] sm:$0xff]  }
 0x28b   : > { %v2433_v30 = vadd.f32 %v2365_v12, %v2189_v20  ;;  %v8240_v7 = vpack.c.bf16 %v8235_v11, %v8130_v58  ;;  %v2537_v54 = vmax.f32 %v2511_v21, %v2527_v42  ;;  %v2127_v4 = vrot.slane %v2000_v29, 1 }
 0x28c   : > { %v1801_v41 = vsel %vm1150_vm2, %v1798_v3, %v1800_v49  ;;  %v2435_v32 = vadd.f32 %v2370_v1, %v2191_v63  ;;  %v2538_v5 = vmax.f32 %v2513_v27, %v2529_v52  ;;  %v2190_v6 = vadd.f32 %v2123_v23, %v1941_v28  ;;  %v5771_v28 = vld [vmem:[#allocation11 + $0xe8] sm:$0xff]   ;;  %v5773_v23 = vld [vmem:[#allocation11 + $0xf0] sm:$0xff]   ;;  %v8284_v63 = vld [vmem:[#allocation3 + $0x10] sm:$0xff] }
 0x28d   : > { %v1865_v13 = vadd.f32 %v1801_v41, %v1621_v53  ;;  %v1911_v40 = vmul.f32 %v6517_v19, %v1874_v47  ;;  %2545 = vst.msk [vmem:[#allocation3 + $0x71] sm:$0xff] %vm379_vm0, %v2537_v54  ;;  %v2371_v58 = vrot.slane %v2244_v24, 2  ;;  %v2465_v26 = vmax.f32 %v2433_v30, 0.0  ;;  %5310 = vmatpush3.bf16.msra.mxu1 %v5770_v59  ;;  %v5772_v24 = vld [vmem:[#allocation11 + $0xa8] sm:$0xff]   ;;  %v5606_v53 = vpop.permute.xlu0 %5605 }
 0x28e   : > { %v2467_v20 = vmax.f32 %v2435_v32, 0.0  ;;  %2546 = vst.msk [vmem:[#allocation3 + $0x81] sm:$0xff] %vm379_vm0, %v2538_v5  ;;  %v9613_v46 = vmov %v9612_v51  ;;  %v8252_v29 = vld [vmem:[#allocation3 + $0x60] sm:$0xff]  ;;  %v2128_v33 = vsel %vm905_vm1, %v2125_v8, %v2127_v4  ;;  %v8261_v42 = vld [vmem:[#allocation3 + $0x68] sm:$0xff]  ;;  %5311 = vmatprep.subr.bf16.mxu1 %v5771_v28  ;;  %v5649_v25 = vpack.i.bf16 %v8125_v50, %v7752_v62  ;;  %v5795_v32 = vld [vmem:[#allocation3 + $0x18] sm:$0xff] }
 0x28f   : > { %v2367_v3 = vsel %vm1150_vm2, %v9613_v46, %v2366_v18  ;;  %v1943_v49 = vadd.f32 %v1911_v40, %v1865_v13  ;;  %v5644_v19 = vpack.i.bf16 %v8252_v29, %v8067_v60  ;;  %v2605_v47 = vrot.slane %v8252_v29, 1  ;;  %v8293_v41 = vld [vmem:[#allocation3 + $0xa0] sm:$0xff]  ;;  %v5777_v13 = vld [vmem:[#allocation11 + $0xb8] sm:$0xff]  }
 0x290   : > { %v2483_v22 = vmax.f32 %v2465_v26, %v2467_v20  ;;  %v2434_v36 = vadd.f32 %v2367_v3, %v2190_v6  ;;  %v2372_v44 = vsel %vm1150_vm2, %v2369_v9, %v2371_v58  ;;  %v9614_v2 = vrot.slane %v8067_v60, 1 }
 0x291   : > { %v2192_v21 = vadd.f32 %v2128_v33, %v1943_v49  ;;  %5645 = vrot.lane.b32.xlu0 %v5644_v19, %s6093_s8  ;;  %5312 = vmatpush3.bf16.msra.mxu1 %v5772_v24  ;;  %v2680_v9 = vrot.slane %v7871_v38, 2  ;;  %v2682_v10 = vrot.slane %v7873_v37, 2  ;;  %v2607_v62 = vrot.slane %v8261_v42, 1  ;;  %v5775_v37 = vld [vmem:[#allocation11 + $0xf8] sm:$0xff]  }
 0x292   : > { %2499 = vst.msk [vmem:[#allocation2 + $0x70] sm:$0xff] %vm379_vm0, %v2483_v22  ;;  %v8270_v17 = vsel %vm905_vm1, %v9614_v2, %v2605_v47  ;;  %v2466_v43 = vmax.f32 %v2434_v36, 0.0  ;;  %v2684_v38 = vrot.slane %v8065_v55, 2  ;;  %v2686_v30 = vrot.slane %v8067_v60, 2  ;;  %5313 = vmatprep.subr.bf16.mxu1 %v5773_v23 }
 0x293   : > { %v2436_v8 = vadd.f32 %v2372_v44, %v2192_v21  ;;  %v2669_v1 = vrot.slane %v8284_v63, 2  ;;  %v5664_v54 = vpack.i.bf16 %v8261_v42, %v8235_v11  ;;  %v8291_v4 = vsel %vm1150_vm2, %v2680_v9, %v2682_v10 }
 0x294   : > { %v8265_v45 = vld [vmem:[#allocation3 + $0x70] sm:$0xff]  ;;  %v8273_v48 = vld [vmem:[#allocation3 + $0x78] sm:$0xff]  ;;  %v2670_v5 = vrot.slane %v5795_v32, 2  ;;  %v8297_v39 = vsel %vm905_vm1, %v2605_v47, %v2607_v62  ;;  %v8302_v59 = vsel %vm1150_vm2, %v2678_v16, %v2680_v9  ;;  %v8313_v58 = vsel %vm1150_vm2, %v2682_v10, %v2684_v38  ;;  %v8322_v16 = vld [vmem:[#allocation3 + $0xa8] sm:$0xff] }
 0x295   : > { %v2468_v51 = vmax.f32 %v2436_v8, 0.0  ;;  %v5669_v12 = vpack.i.bf16 %v8270_v17, %v8265_v45  ;;  %5650 = vrot.lane.b32.xlu0 %v5649_v25, %s6093_s8  ;;  %v2609_v27 = vrot.slane %v8265_v45, 1  ;;  %v2611_v52 = vrot.slane %v8273_v48, 1  ;;  %5314 = vmatpush3.bf16.msra.mxu1 %v5774_v0  ;;  %v8315_v26 = vld [vmem:[#allocation3 + $0x88] sm:$0xff]  ;;  %v8325_v3 = vld [vmem:[#allocation3 + $0x80] sm:$0xff] }
 0x296   : > { %5315 = vmatprep.subr.bf16.mxu1 %v5775_v37  ;;  %v5679_v6 = vpack.i.bf16 %v8273_v48, %v8291_v4  ;;  %v8320_v61 = vsel %vm1150_vm2, %v2684_v38, %v2686_v30  ;;  %v5608_v20 = vunpack.i.h.bf16 %v5606_v53  ;;  %v2795_v49 = vrot.slane %v8293_v41, 2 }
 0x297   : > { %v2484_v18 = vmax.f32 %v2466_v43, %v2468_v51  ;;  %5670 = vrot.lane.b32.xlu1 %v5669_v12, %s6093_s8  ;;  %v8310_v40 = vsel %vm905_vm1, %v2609_v27, %v2611_v52  ;;  %v5607_v33 = vunpack.i.l.bf16 %v5606_v53  ;;  %v2671_v22 = vsel %vm1150_vm2, %v2669_v1, %v2670_v5 }
 0x298   : > { %v5616_v46 = vpop.permute.xlu1 %5615  ;;  %v5674_v47 = vpack.i.bf16 %v8302_v59, %v8297_v39  ;;  %v2688_v28 = vrot.slane %v8252_v29, 2  ;;  %v2690_v24 = vrot.slane %v8261_v42, 2  ;;  %v2899_v36 = vsel %vm379_vm0, %v2671_v22, %v5608_v20 }
 0x299   : > { %2500 = vst.msk [vmem:[#allocation2 + $0x78] sm:$0xff] %vm379_vm0, %v2484_v18  ;;  %5665 = vrot.lane.b32.xlu0 %v5664_v54, %s6093_s8  ;;  %v5618_v19 = vunpack.i.h.bf16 %v5616_v46  ;;  %5316 = vmatpush3.bf16.msra.mxu1 %v5777_v13  ;;  %v5689_v21 = vpack.i.bf16 %v8313_v58, %v8310_v40  ;;  %v8337_v44 = vsel %vm905_vm1, %v2607_v62, %v2609_v27  ;;  %v9554_v25 = vrot.slane %v8322_v16, 2  ;;  %v2548_v27 = vld [vmem:[#allocation3 + $0x8] sm:$0xff] }
 0x29a   : > { %v5694_v8 = vpack.i.bf16 %v8315_v26, %v8320_v61  ;;  %v5684_v2 = vpack.i.bf16 %v8337_v44, %v8325_v3  ;;  %v2898_v9 = vsel %vm379_vm0, %v2669_v1, %v5607_v33  ;;  %v5617_v10 = vunpack.i.l.bf16 %v5616_v46 }
 0x29b   : > { %5680 = vrot.lane.b32.xlu1 %v5679_v6, %s6093_s8  ;;  %v2901_v23 = vsel %vm379_vm0, %v8138_v35, %v5618_v19  ;;  %v2673_v51 = vsel %vm1150_vm2, %v2670_v5, %v8125_v50  ;;  %v2939_v38 = vpack.c.bf16 %v2899_v36, %v2898_v9  ;;  %v2613_v37 = vrot.slane %v8325_v3, 1 }
 0x29c   : > { %v2900_v1 = vsel %vm379_vm0, %v2673_v51, %v5617_v10 }
 0x29d   : > { %5675 = vrot.lane.b32.xlu0 %v5674_v47, %s6093_s8  ;;  %v5621_v43 = vpop.permute.xlu1 %5620  ;;  %v2944_v50 = vpack.c.bf16 %v2901_v23, %v2900_v1  ;;  %v3076_v22 = vshrl.u32 %v2939_v38, 16  ;;  %v3079_v47 = vshll.u32 %v2939_v38, 16 }
 0x29e   : > { %v5623_v12 = vunpack.i.h.bf16 %v5621_v43  ;;  %v5622_v62 = vunpack.i.l.bf16 %v5621_v43  ;;  %v5611_v0 = vpop.permute.xlu0 %5610 }
 0x29f   : > { %5690 = vrot.lane.b32.xlu1 %v5689_v21, %s6093_s8  ;;  %v5613_v54 = vunpack.i.h.bf16 %v5611_v0  ;;  %v5612_v6 = vunpack.i.l.bf16 %v5611_v0  ;;  %v3084_v36 = vshrl.u32 %v2944_v50, 16  ;;  %v3087_v21 = vshll.u32 %v2944_v50, 16 }
 0x2a0   : > { %v2515_v18 = vld [vmem:[#allocation2 + $0x70] ss:$2 sm:$0xff]  ;;  %v2531_v53 = vld [vmem:[#allocation2 + $0x71] ss:$2 sm:$0xff]  ;;  %v2884_v13 = vsel %vm379_vm0, %v8122_v31, %v5623_v12  ;;  %v2883_v20 = vsel %vm379_vm0, %v5795_v32, %v5622_v62  ;;  %v2615_v31 = vrot.slane %v8315_v26, 1  ;;  %v3078_v9 = vrot.slane %v3076_v22, 3 }
 0x2a1   : > { %v2539_v35 = vmax.f32 %v2515_v18, %v2531_v53  ;;  %5685 = vrot.lane.b32.xlu0 %v5684_v2, %s6093_s8  ;;  %v2943_v5 = vpack.c.bf16 %v2884_v13, %v2883_v20  ;;  %v2882_v46 = vsel %vm379_vm0, %v8284_v63, %v5613_v54  ;;  %v2881_v33 = vsel %vm379_vm0, %v2548_v27, %v5612_v6 }
 0x2a2   : > { %v2938_v19 = vpack.c.bf16 %v2882_v46, %v2881_v33  ;;  %v3081_v23 = vrot.slane %v3079_v47, 4  ;;  %v3086_v2 = vrot.slane %v3084_v36, 3  ;;  %v3089_v43 = vrot.slane %v3087_v21, 4  ;;  %v5776_v21 = vld [vmem:[#allocation11 + $0x108] sm:$0xff]  }
 0x2a3   : > { %2547 = vst.msk [vmem:[#allocation3 + $0x91] sm:$0xff] %vm379_vm0, %v2539_v35  ;;  %v3067_v32 = vshrl.u32 %v2943_v5, 16  ;;  %v3070_v10 = vshll.u32 %v2943_v5, 16  ;;  %v8368_v18 = vsel %vm1150_vm2, %v2686_v30, %v2688_v28  ;;  %v8373_v54 = vsel %vm905_vm1, %v2613_v37, %v2615_v31 }
 0x2a4   : > { %v3059_v51 = vshrl.u32 %v2938_v19, 16  ;;  %v3062_v63 = vshll.u32 %v2938_v19, 16  ;;  %v3082_v0 = vor.u32 %v3081_v23, %v3078_v9  ;;  %v8363_v27 = vor.u32 %v3089_v43, %v3086_v2 }
 0x2a5   : > { %5695 = vrot.lane.b32.xlu0 %v5694_v8, %s6093_s8  ;;  %v3069_v12 = vrot.slane %v3067_v32, 3  ;;  %v3072_v62 = vrot.slane %v3070_v10, 4  ;;  %v8378_v8 = vsel %vm1150_vm2, %v2688_v28, %v2690_v24  ;;  %v2873_v6 = vsel %vm1150_vm2, %v2795_v49, %v9554_v25 }
 0x2a6   : > { %v3061_v38 = vrot.slane %v3059_v51, 3  ;;  %v3064_v53 = vrot.slane %v3062_v63, 4  ;;  %v3091_v30 = vsel %vm3057_vm5, %v3082_v0, %v8363_v27  ;;  %v8394_v13 = vsel %vm905_vm1, %v2611_v52, %v2613_v37 }
 0x2a7   : > { %v8370_v1 = vor.u32 %v3072_v62, %v3069_v12  ;;  %v2692_v20 = vrot.slane %v8265_v45, 2  ;;  %v2694_v50 = vrot.slane %v8273_v48, 2  ;;  %3714 = vmatprep.mubr.bf16.mxu0 %v3091_v30  ;;  %v2698_v52 = vrot.slane %v8315_v26, 2 }
 0x2a8   : > { %v3065_v5 = vor.u32 %v3064_v53, %v3061_v38  ;;  %v2849_v10 = vrot.slane %v8293_v41, 1  ;;  %v2851_v23 = vrot.slane %v8322_v16, 1  ;;  %v5704_v51 = vpack.i.bf16 %v8378_v8, %v8368_v18  ;;  %v5778_v53 = vld [vmem:[#allocation11 + $0x110] sm:$0xff]  }
 0x2a9   : > { %2647 = vrot.lane.b32.xlu0 %v8373_v54, %s6093_s8  ;;  %v2696_v63 = vrot.slane %v8325_v3, 2  ;;  %v8439_v0 = vsel %vm1150_vm2, %v2690_v24, %v2692_v20 }
 0x2aa   : > { %v8389_v35 = vld [vmem:[#allocation3 + $0x90] sm:$0xff]  ;;  %v8396_v28 = vld [vmem:[#allocation3 + $0x98] sm:$0xff]  ;;  %v3074_v36 = vsel %vm3057_vm5, %v3065_v5, %v8370_v1  ;;  %v2852_v30 = vsel %vm905_vm1, %v2849_v10, %v2851_v23 }
 0x2ab   : > { %v5699_v46 = vpack.i.bf16 %v8394_v13, %v8389_v35  ;;  %v5709_v33 = vpack.i.bf16 %v2615_v31, %v8396_v28  ;;  %v2771_v22 = vrot.slane %v8389_v35, 1  ;;  %v8405_v19 = vrot.slane %v8396_v28, 1  ;;  %3715 = vmatmul.mubr.bf16.vlgmr.msra.gmra.mrb[0].mxu0 %v3074_v36 }
 0x2ac   : > { %v2793_v37 = vrot.slane %v8396_v28, 2  ;;  %v2700_v47 = vrot.slane %v8389_v35, 2  ;;  %5398 = vmatpush3.bf16.msra.mxu0 %v8220_v34  ;;  %v8456_v36 = vsel %vm1150_vm2, %v2696_v63, %v2698_v52 }
 0x2ad   : > { %9615 = vst [vmem:[#allocation28_spill] sm:$0xff] %v8405_v19  ;;  %5700 = vrot.lane.b32.xlu1 %v5699_v46, %s6093_s8  ;;  %v8414_v9 = vsel %vm905_vm1, %v2615_v31, %v2771_v22  ;;  %v8418_v32 = vsel %vm905_vm1, %v2771_v22, %v8405_v19  ;;  %5710 = vrot.lane.b32.xlu0 %v5709_v33, %s6093_s8 }
 0x2ae   : > { %v5719_v2 = vpack.i.bf16 %v8418_v32, %v8414_v9  ;;  %v2796_v43 = vsel %vm1150_vm2, %v2793_v37, %v2795_v49  ;;  %v8429_v31 = vsel %vm1150_vm2, %v2698_v52, %v2700_v47  ;;  %v2794_v62 = vsel %vm1150_vm2, %v2700_v47, %v2793_v37  ;;  %5399 = vmatprep.subr.bf16.mxu0 %v5776_v21 }
 0x2af   : > { %v2972_v12 = vpack.c.bf16 %v2873_v6, %v2796_v43  ;;  %v8442_v49 = vsel %vm1150_vm2, %v2692_v20, %v2694_v50  ;;  %v2968_v38 = vpack.c.bf16 %v2794_v62, %v8429_v31  ;;  %v2850_v6 = vsel %vm905_vm1, %v8405_v19, %v2849_v10 }
 0x2b0   : > { %v5714_v20 = vpack.i.bf16 %v8442_v49, %v8439_v0  ;;  %v8453_v33 = vsel %vm1150_vm2, %v2694_v50, %v2696_v63  ;;  %5400 = vmatpush3.bf16.msra.mxu0 %v5776_v21  ;;  %v5729_v47 = vpack.i.bf16 %v2852_v30, %v2850_v6  ;;  %v5739_v6 = vpack.i.bf16 %v2796_v43, %v2851_v23  ;;  %v8478_v43 = vld [vmem:[#allocation3 + $0x28] sm:$0xff] }
 0x2b1   : > { %5705 = vrot.lane.b32.xlu1 %v5704_v51, %s6093_s8  ;;  %v3361_v34 = vshrl.u32 %v2972_v12, 16  ;;  %v3364_v5 = vshll.u32 %v2972_v12, 16  ;;  %5720 = vrot.lane.b32.xlu0 %v5719_v2, %s6093_s8  ;;  %v3325_v24 = vshrl.u32 %v2968_v38, 16  ;;  %v3328_v46 = vshll.u32 %v2968_v38, 16  ;;  %v5779_v12 = vld [vmem:[#allocation11 + $0x118] sm:$0xff]  }
 0x2b2   : > { %5401 = vmatprep.subr.bf16.mxu0 %v5778_v53  ;;  %v5631_v2 = vpop.permute.xlu1 %5630  ;;  %v5724_v21 = vpack.i.bf16 %v8456_v36, %v8453_v33 }
 0x2b3   : > { %v3363_v22 = vrot.slane %v3361_v34, 3  ;;  %v3366_v37 = vrot.slane %v3364_v5, 4  ;;  %v3327_v10 = vrot.slane %v3325_v24, 3  ;;  %v3330_v51 = vrot.slane %v3328_v46, 4  ;;  %v5796_v5 = vld [vmem:[#allocation3 + $0x30] sm:$0xff] }
 0x2b4   : > { %5402 = vmatpush3.bf16.msra.mxu0 %v5778_v53  ;;  %v5633_v63 = vunpack.i.h.bf16 %v5631_v2  ;;  %v5632_v30 = vunpack.i.l.bf16 %v5631_v2  ;;  %v5734_v34 = vpack.i.bf16 %v2794_v62, %v8429_v31 }
 0x2b5   : > { %5715 = vrot.lane.b32.xlu1 %v5714_v20, %s6093_s8  ;;  %5730 = vrot.lane.b32.xlu0 %v5729_v47, %s6093_s8  ;;  %v8460_v38 = vor.u32 %v3330_v51, %v3327_v10  ;;  %v8462_v50 = vor.u32 %v3366_v37, %v3363_v22 }
 0x2b6   : > { %5403 = vmatprep.subr.bf16.mxu0 %v5779_v12  ;;  %v8476_v23 = vsel %vm379_vm0, %v5796_v5, %v5633_v63  ;;  %v2885_v53 = vsel %vm379_vm0, %v8478_v43, %v5632_v30 }
 0x2b7   : > { %9616 = vst [vmem:[#allocation29_spill] sm:$0xff] %v8460_v38  ;;  %9617 = vst [vmem:[#allocation30_spill] sm:$0xff] %v8462_v50  ;;  %v8469_v52 = vsel %vm3057_vm5, %v8460_v38, %v8462_v50  ;;  %v2948_v24 = vpack.c.bf16 %v8476_v23, %v2885_v53 }
 0x2b8   : > { %9618 = vst [vmem:[#allocation31_spill] sm:$0xff] %v8469_v52  ;;  %5404 = vmatpush3.bf16.msra.mxu0 %v5779_v12 }
 0x2b9   : > { %5725 = vrot.lane.b32.xlu1 %v5724_v21, %s6093_s8  ;;  %5740 = vrot.lane.b32.xlu0 %v5739_v6, %s6093_s8  ;;  %v3144_v37 = vshrl.u32 %v2948_v24, 16  ;;  %v3147_v47 = vshll.u32 %v2948_v24, 16 }
 0x2bb   : > { %v3146_v12 = vrot.slane %v3144_v37, 3  ;;  %v3149_v2 = vrot.slane %v3147_v47, 4  ;;  %v5799_v47 = vld [vmem:[#allocation3 + $0x38] sm:$0xff] }
 0x2bd   : > { %5735 = vrot.lane.b32.xlu1 %v5734_v34, %s6093_s8  ;;  %v3150_v34 = vor.u32 %v3149_v2, %v3146_v12 }
 0x2bf   : > { %v3151_v24 = vsel %vm3057_vm5, %v8370_v1, %v3150_v34 }
 0x2c2   : > { %v5626_v46 = vpop.permute.xlu0 %5625 }
 0x2c3   : > { %v5628_v20 = vunpack.i.h.bf16 %v5626_v46  ;;  %v5627_v22 = vunpack.i.l.bf16 %v5626_v46 }
 0x2c5   : > { %v2903_v62 = vsel %vm379_vm0, %v8235_v11, %v5628_v20  ;;  %v2902_v10 = vsel %vm379_vm0, %v8142_v56, %v5627_v22  ;;  %v5641_v11 = vpop.permute.xlu1 %5640  ;;  %v8491_v20 = vld [vmem:[#allocation14] sm:$0xff]   ;;  %v5798_v22 = vld [vmem:[#allocation3 + $0x40] sm:$0xff] }
 0x2c6   : > { %v2949_v51 = vpack.c.bf16 %v2903_v62, %v2902_v10  ;;  %v5643_v46 = vunpack.i.h.bf16 %v5641_v11  ;;  %v5642_v56 = vunpack.i.l.bf16 %v5641_v11  ;;  %5421 = vmatprep.subr.bf16.mxu0 %v8491_v20  ;;  %5461 = vmatprep.subr.bf16.mxu1 %v8491_v20 }
 0x2c8   : > { %v3153_v21 = vshrl.u32 %v2949_v51, 16  ;;  %v3156_v6 = vshll.u32 %v2949_v51, 16  ;;  %v2888_v37 = vsel %vm379_vm0, %v5798_v22, %v5643_v46 }
 0x2ca   : > { %v3155_v63 = vrot.slane %v3153_v21, 3  ;;  %v3158_v30 = vrot.slane %v3156_v6, 4 }
 0x2cc   : > { %v3159_v5 = vor.u32 %v3158_v30, %v3155_v63 }
 0x2ce   : > { %v3160_v53 = vsel %vm3057_vm5, %v8363_v27, %v3159_v5  ;;  %v2887_v27 = vsel %vm379_vm0, %v5799_v47, %v5642_v56 }
 0x2cf   : > { %3722 = vmatprep.mubr.bf16.mxu0 %v3160_v53  ;;  %v2946_v62 = vpack.c.bf16 %v2888_v37, %v2887_v27 }
 0x2d0   : > { %3723 = vmatmul.mubr.bf16.gmra.mrb[4].mxu0 %v3151_v24 }
 0x2d1   : > { %v3118_v12 = vshrl.u32 %v2946_v62, 16  ;;  %v3121_v2 = vshll.u32 %v2946_v62, 16 }
 0x2d3   : > { %v3120_v30 = vrot.slane %v3118_v12, 3  ;;  %v3123_v53 = vrot.slane %v3121_v2, 4  ;;  %v5800_v12 = vld [vmem:[#allocation3 + $0x48] sm:$0xff] }
 0x2d5   : > { %v8501_v56 = vor.u32 %v3123_v53, %v3120_v30 }
 0x2d7   : > { %v3188_v27 = vsel %vm3057_vm5, %v3150_v34, %v8501_v56 }
 0x2e2   : > { %v5636_v10 = vpop.permute.xlu0 %5635 }
 0x2e3   : > { %v5638_v51 = vunpack.i.h.bf16 %v5636_v10  ;;  %v5637_v1 = vunpack.i.l.bf16 %v5636_v10 }
 0x2e5   : > { %v2905_v21 = vsel %vm379_vm0, %v8291_v4, %v5638_v51  ;;  %v2904_v6 = vsel %vm379_vm0, %v8302_v59, %v5637_v1 }
 0x2e6   : > { %v2953_v63 = vpack.c.bf16 %v2905_v21, %v2904_v6 }
 0x2e7   : > { %v5656_v62 = vpop.permute.xlu1 %5655 }
 0x2e8   : > { %v3190_v24 = vshrl.u32 %v2953_v63, 16  ;;  %v3193_v11 = vshll.u32 %v2953_v63, 16  ;;  %v5658_v10 = vunpack.i.h.bf16 %v5656_v62  ;;  %v5657_v51 = vunpack.i.l.bf16 %v5656_v62 }
 0x2ea   : > { %v3192_v46 = vrot.slane %v3190_v24, 3  ;;  %v3195_v22 = vrot.slane %v3193_v11, 4  ;;  %v2890_v1 = vsel %vm379_vm0, %v8065_v55, %v5658_v10  ;;  %v2889_v2 = vsel %vm379_vm0, %v5800_v12, %v5657_v51 }
 0x2eb   : > { %v2951_v21 = vpack.c.bf16 %v2890_v1, %v2889_v2  ;;  %v5661_v30 = vpop.permute.xlu1 %5660  ;;  %v8520_v51 = vpack.c.bf16 %v8291_v4, %v8302_v59 }
 0x2ec   : > { %v8503_v37 = vor.u32 %v3195_v22, %v3192_v46  ;;  %v5662_v62 = vunpack.i.l.bf16 %v5661_v30 }
 0x2ed   : > { %v3171_v6 = vshrl.u32 %v2951_v21, 16  ;;  %v3174_v63 = vshll.u32 %v2951_v21, 16 }
 0x2ee   : > { %v3197_v47 = vsel %vm3057_vm5, %v3159_v5, %v8503_v37  ;;  %v2952_v5 = vpack.c.bf16 %v8320_v61, %v8313_v58  ;;  %v2916_v4 = vsel %vm379_vm0, %v7635_v57, %v5662_v62 }
 0x2ef   : > { %3730 = vmatprep.mubr.bf16.mxu0 %v3197_v47  ;;  %v3173_v24 = vrot.slane %v3171_v6, 3  ;;  %v3176_v34 = vrot.slane %v3174_v63, 4 }
 0x2f0   : > { %3731 = vmatmul.mubr.bf16.gmra.mrb[8].mxu0 %v3188_v27  ;;  %v3180_v11 = vshrl.u32 %v2952_v5, 16  ;;  %v3183_v46 = vshll.u32 %v2952_v5, 16  ;;  %v5663_v27 = vunpack.i.h.bf16 %v5661_v30 }
 0x2f1   : > { %v8522_v2 = vor.u32 %v3176_v34, %v3173_v24 }
 0x2f2   : > { %v8524_v21 = vrot.slane %v3180_v11, 3  ;;  %v8526_v6 = vrot.slane %v3183_v46, 4 }
 0x303   : > { %v5646_v53 = vpop.permute.xlu0 %5645 }
 0x304   : > { %v5648_v22 = vunpack.i.h.bf16 %v5646_v53  ;;  %v5647_v47 = vunpack.i.l.bf16 %v5646_v53 }
 0x306   : > { %v2907_v55 = vsel %vm379_vm0, %v8320_v61, %v5648_v22  ;;  %v2906_v10 = vsel %vm379_vm0, %v8313_v58, %v5647_v47  ;;  %v2917_v58 = vsel %vm379_vm0, %v7765_v15, %v5663_v27 }
 0x307   : > { %v2957_v1 = vpack.c.bf16 %v2907_v55, %v2906_v10  ;;  %v5651_v12 = vpop.permute.xlu0 %5650  ;;  %v8541_v55 = vsel %vm3057_vm5, %v8501_v56, %v8522_v2 }
 0x308   : > { %v5653_v63 = vunpack.i.h.bf16 %v5651_v12  ;;  %v5652_v5 = vunpack.i.l.bf16 %v5651_v12 }
 0x309   : > { %v5671_v30 = vpop.permute.xlu1 %5670  ;;  %v3226_v22 = vshrl.u32 %v2957_v1, 16  ;;  %v3229_v25 = vshll.u32 %v2957_v1, 16 }
 0x30a   : > { %v5673_v53 = vunpack.i.h.bf16 %v5671_v30  ;;  %v5672_v61 = vunpack.i.l.bf16 %v5671_v30  ;;  %v2915_v59 = vsel %vm379_vm0, %v7614_v14, %v5653_v63  ;;  %v2932_v24 = vsel %vm379_vm0, %v8478_v43, %v5652_v5  ;;  %v9619_v5 = vld [vmem:[#allocation23_spill] sm:$0xff] }
 0x30b   : > { %v2940_v34 = vpack.c.bf16 %v2916_v4, %v2915_v59  ;;  %v5666_v11 = vpop.permute.xlu0 %5665  ;;  %v3228_v47 = vrot.slane %v3226_v22, 3  ;;  %v3231_v57 = vrot.slane %v3229_v25, 4  ;;  %v2941_v14 = vpack.c.bf16 %v8476_v23, %v2932_v24 }
 0x30c   : > { %v2909_v46 = vsel %vm379_vm0, %v8378_v8, %v5672_v61  ;;  %v5668_v15 = vunpack.i.h.bf16 %v5666_v11  ;;  %v5667_v27 = vunpack.i.l.bf16 %v5666_v11  ;;  %v2891_v43 = vsel %vm379_vm0, %v8067_v60, %v5673_v53 }
 0x30d   : > { %v5681_v62 = vpop.permute.xlu1 %5680  ;;  %v3093_v12 = vshrl.u32 %v2940_v34, 16  ;;  %v8550_v61 = vor.u32 %v3231_v57, %v3228_v47  ;;  %v3110_v22 = vshrl.u32 %v2941_v14, 16  ;;  %v3096_v24 = vshll.u32 %v2940_v34, 16 }
 0x30e   : > { %v5683_v10 = vunpack.i.h.bf16 %v5681_v62  ;;  %v5682_v1 = vunpack.i.l.bf16 %v5681_v62  ;;  %v2908_v63 = vsel %vm379_vm0, %v8368_v18, %v5668_v15  ;;  %v2918_v30 = vsel %vm379_vm0, %v9619_v5, %v5667_v27  ;;  %v9620_v15 = vld [vmem:[#allocation25_spill] sm:$0xff] }
 0x30f   : > { %v2945_v4 = vpack.c.bf16 %v2918_v30, %v2917_v58  ;;  %v2961_v25 = vpack.c.bf16 %v2909_v46, %v2908_v63  ;;  %v5676_v59 = vpop.permute.xlu0 %5675  ;;  %v3233_v11 = vsel %vm3057_vm5, %v8503_v37, %v8550_v61  ;;  %v3112_v47 = vrot.slane %v3110_v22, 3  ;;  %v9621_v63 = vld [vmem:[#allocation24_spill] sm:$0xff] }
 0x310   : > { %v2910_v23 = vsel %vm379_vm0, %v8439_v0, %v5683_v10  ;;  %v5678_v60 = vunpack.i.h.bf16 %v5676_v59  ;;  %v5677_v53 = vunpack.i.l.bf16 %v5676_v59  ;;  %v2920_v62 = vsel %vm379_vm0, %v9620_v15, %v5682_v1  ;;  %3738 = vmatprep.mubr.bf16.mxu0 %v3233_v11  ;;  %v9622_v11 = vld [vmem:[#allocation26_spill] sm:$0xff] }
 0x311   : > { %v5691_v27 = vpop.permute.xlu1 %5690  ;;  %v3113_v57 = vshll.u32 %v2941_v14, 16  ;;  %3739 = vmatmul.mubr.bf16.gmra.mrb[12].mxu0 %v8541_v55  ;;  %v3095_v10 = vrot.slane %v3093_v12, 3  ;;  %v3101_v30 = vshrl.u32 %v2945_v4, 16  ;;  %v3098_v1 = vrot.slane %v3096_v24, 4 }
 0x312   : > { %v5693_v58 = vunpack.i.h.bf16 %v5691_v27  ;;  %v5692_v46 = vunpack.i.l.bf16 %v5691_v27  ;;  %v2919_v5 = vsel %vm379_vm0, %v9621_v63, %v5678_v60  ;;  %v2892_v34 = vsel %vm379_vm0, %v8252_v29, %v5677_v53 }
 0x313   : > { %v2955_v37 = vpack.c.bf16 %v2892_v34, %v2891_v43  ;;  %v2950_v59 = vpack.c.bf16 %v2920_v62, %v2919_v5  ;;  %v3115_v50 = vrot.slane %v3113_v57, 4  ;;  %v5686_v15 = vpop.permute.xlu0 %5685  ;;  %v3103_v27 = vrot.slane %v3101_v30, 3 }
 0x314   : > { %v2921_v14 = vsel %vm379_vm0, %v9622_v11, %v5693_v58  ;;  %v2894_v22 = vsel %vm379_vm0, %v8265_v45, %v5692_v46  ;;  %v3104_v60 = vshll.u32 %v2945_v4, 16  ;;  %v5688_v52 = vunpack.i.h.bf16 %v5686_v15 }
 0x315   : > { %v3116_v63 = vor.u32 %v3115_v50, %v3112_v47  ;;  %v5687_v29 = vunpack.i.l.bf16 %v5686_v15  ;;  %v3262_v53 = vshrl.u32 %v2961_v25, 16  ;;  %v3265_v12 = vshll.u32 %v2961_v25, 16 }
 0x316   : > { %v3106_v38 = vrot.slane %v3104_v60, 4  ;;  %v3208_v19 = vshrl.u32 %v2955_v37, 16  ;;  %v3211_v43 = vshll.u32 %v2955_v37, 16  ;;  %v2893_v62 = vsel %vm379_vm0, %v8261_v42, %v5688_v52  ;;  %v9623_v60 = vld [vmem:[#allocation27_spill] sm:$0xff] }
 0x317   : > { %v3125_v24 = vsel %vm3057_vm5, %v3116_v63, %v8501_v56  ;;  %v2911_v57 = vsel %vm379_vm0, %v8442_v49, %v5687_v29  ;;  %v3264_v45 = vrot.slane %v3262_v53, 3  ;;  %v5696_v58 = vpop.permute.xlu0 %5695  ;;  %v3099_v50 = vor.u32 %v3098_v1, %v3095_v10 }
 0x318   : > { %3811 = vmatprep.mubr.bf16.mxu1 %v3125_v24  ;;  %v3107_v4 = vor.u32 %v3106_v38, %v3103_v27  ;;  %v2965_v47 = vpack.c.bf16 %v2911_v57, %v2910_v23  ;;  %v3267_v46 = vrot.slane %v3265_v12, 4  ;;  %v2959_v5 = vpack.c.bf16 %v2894_v22, %v2893_v62  ;;  %v8577_v38 = vld [vmem:[#allocation14 + $0x8] sm:$0xff]  }
 0x319   : > { %v3210_v25 = vrot.slane %v3208_v19, 3  ;;  %v3213_v34 = vrot.slane %v3211_v43, 4  ;;  %v5697_v30 = vunpack.i.l.bf16 %v5696_v58  ;;  %v3162_v15 = vshrl.u32 %v2950_v59, 16 }
 0x31a   : > { %v3108_v37 = vsel %vm3057_vm5, %v3099_v50, %v3107_v4  ;;  %v3268_v56 = vor.u32 %v3267_v46, %v3264_v45  ;;  %v3165_v11 = vshll.u32 %v2950_v59, 16  ;;  %v5698_v52 = vunpack.i.h.bf16 %v5696_v58  ;;  %v8593_v58 = vld [vmem:[#allocation14 + $0x10] sm:$0xff]  }
 0x31b   : > { %3812 = vmatmul.mubr.bf16.vlgmr.msra.gmra.mrb[0].mxu1 %v3108_v37  ;;  %v3214_v42 = vor.u32 %v3213_v34, %v3210_v25  ;;  %v2922_v63 = vsel %vm379_vm0, %v9623_v60, %v5697_v30  ;;  %v2648_v29 = vpop.permute.xlu0 %2647  ;;  %v3298_v10 = vshrl.u32 %v2965_v47, 16  ;;  %v3164_v1 = vrot.slane %v3162_v15, 3 }
 0x31c   : > { %3819 = vmatprep.mubr.bf16.mxu1 %v8541_v55  ;;  %v3269_v19 = vsel %vm3057_vm5, %v8550_v61, %v3268_v56  ;;  %v2954_v23 = vpack.c.bf16 %v2922_v63, %v2921_v14  ;;  %v3167_v22 = vrot.slane %v3165_v11, 4  ;;  %5469 = vmatpush3.bf16.msra.mxu1 %v8491_v20  ;;  %v8585_v59 = vpack.c.bf16 %v8378_v8, %v8368_v18 }
 0x31d   : > { %3746 = vmatprep.mubr.bf16.mxu0 %v3269_v19  ;;  %v3215_v27 = vsel %vm3057_vm5, %v8522_v2, %v3214_v42  ;;  %v3300_v53 = vrot.slane %v3298_v10, 3  ;;  %v3301_v12 = vshll.u32 %v2965_v47, 16  ;;  %5462 = vmatprep.subr.bf16.mxu1 %v8577_v38  ;;  %v3244_v14 = vshrl.u32 %v2959_v5, 16 }
 0x31e   : > { %3747 = vmatmul.mubr.bf16.gmra.mrb[16].mxu0 %v3215_v27  ;;  %v3168_v55 = vor.u32 %v3167_v22, %v3164_v1  ;;  %v3247_v43 = vshll.u32 %v2959_v5, 16  ;;  %v3127_v24 = vshrl.u32 %v8240_v7, 16  ;;  %v2912_v62 = vsel %vm379_vm0, %v8453_v33, %v5698_v52 }
 0x31f   : > { %v5701_v61 = vpop.permute.xlu1 %5700  ;;  %v5711_v57 = vpop.permute.xlu0 %5710  ;;  %v3303_v45 = vrot.slane %v3301_v12, 4  ;;  %v3246_v47 = vrot.slane %v3244_v14, 3  ;;  %v3199_v46 = vshrl.u32 %v2954_v23, 16  ;;  %v3202_v30 = vshll.u32 %v2954_v23, 16  ;;  %v8621_v12 = vld [vmem:[#allocation14 + $0x18] sm:$0xff]  }
 0x320   : > { %v5703_v18 = vunpack.i.h.bf16 %v5701_v61  ;;  %v5702_v8 = vunpack.i.l.bf16 %v5701_v61  ;;  %v3169_v2 = vsel %vm3057_vm5, %v3107_v4, %v3168_v55  ;;  %v5712_v50 = vunpack.i.l.bf16 %v5711_v57  ;;  %5470 = vmatpush3.bf16.msra.mxu1 %v8577_v38 }
 0x321   : > { %v8599_v25 = vor.u32 %v3303_v45, %v3300_v53  ;;  %v3249_v34 = vrot.slane %v3247_v43, 4  ;;  %5463 = vmatprep.subr.bf16.mxu1 %v8593_v58  ;;  %v8604_v37 = vpack.c.bf16 %v8442_v49, %v8439_v0  ;;  %v3130_v52 = vshll.u32 %v8240_v7, 16  ;;  %v8637_v45 = vld [vmem:[#allocation14 + $0x20] sm:$0xff]  }
 0x322   : > { %v2913_v5 = vsel %vm379_vm0, %v8456_v36, %v5702_v8  ;;  %v2895_v4 = vsel %vm379_vm0, %v8273_v48, %v5703_v18  ;;  %v5713_v60 = vunpack.i.h.bf16 %v5711_v57  ;;  %v8613_v19 = vrot.slane %v3127_v24, 3 }
 0x323   : > { %v2969_v15 = vpack.c.bf16 %v2913_v5, %v2912_v62  ;;  %v5706_v11 = vpop.permute.xlu1 %5705  ;;  %3820 = vmatmul.mubr.bf16.gmra.mrb[4].mxu1 %v3169_v2  ;;  %v3305_v63 = vsel %vm3057_vm5, %v3268_v56, %v8599_v25  ;;  %v8611_v10 = vor.u32 %v3249_v34, %v3246_v47  ;;  %v2896_v0 = vsel %vm379_vm0, %v8325_v3, %v2648_v29  ;;  %v5721_v7 = vpop.permute.xlu0 %5720 }
 0x324   : > { %3827 = vmatprep.mubr.bf16.mxu1 %v3215_v27  ;;  %v2914_v48 = vsel %vm379_vm0, %v8429_v31, %v5712_v50  ;;  %3754 = vmatprep.mubr.bf16.mxu0 %v3305_v63  ;;  %v5708_v49 = vunpack.i.h.bf16 %v5706_v11  ;;  %v5707_v23 = vunpack.i.l.bf16 %v5706_v11  ;;  %v2963_v1 = vpack.c.bf16 %v2896_v0, %v2895_v4 }
 0x325   : > { %v3251_v22 = vsel %vm3057_vm5, %v3214_v42, %v8611_v10  ;;  %v3201_v56 = vrot.slane %v3199_v46, 3  ;;  %v3204_v53 = vrot.slane %v3202_v30, 4  ;;  %5471 = vmatpush3.bf16.msra.mxu1 %v8593_v58  ;;  %v3334_v3 = vshrl.u32 %v2969_v15, 16 }
 0x326   : > { %3755 = vmatmul.mubr.bf16.gmra.mrb[20].mxu0 %v3251_v22  ;;  %v8624_v29 = vrot.slane %v3130_v52, 4  ;;  %v3135_v31 = vshrl.u32 %v8520_v51, 16  ;;  %v3138_v61 = vshll.u32 %v8520_v51, 16  ;;  %v2897_v14 = vsel %vm379_vm0, %v8315_v26, %v5713_v60  ;;  %5464 = vmatprep.subr.bf16.mxu1 %v8621_v12 }
 0x327   : > { %v5716_v27 = vpop.permute.xlu1 %5715  ;;  %v2974_v43 = vpack.c.bf16 %v2914_v48, %v2914_v48  ;;  %v5723_v42 = vunpack.i.h.bf16 %v5721_v7  ;;  %v8630_v24 = vor.u32 %v3204_v53, %v3201_v56  ;;  %v2924_v62 = vsel %vm379_vm0, %v8297_v39, %v5708_v49  ;;  %v5731_v4 = vpop.permute.xlu0 %5730  ;;  %v8652_v48 = vld [vmem:[#allocation14 + $0x28] sm:$0xff]  }
 0x328   : > { %v2923_v18 = vsel %vm379_vm0, %v8270_v17, %v5707_v23  ;;  %v5722_v8 = vunpack.i.l.bf16 %v5721_v7  ;;  %v5718_v57 = vunpack.i.h.bf16 %v5716_v27  ;;  %v5717_v2 = vunpack.i.l.bf16 %v5716_v27 }
 0x329   : > { %v3206_v51 = vsel %vm3057_vm5, %v3168_v55, %v8630_v24  ;;  %v3337_v50 = vshll.u32 %v2969_v15, 16  ;;  %v3280_v47 = vshrl.u32 %v2963_v1, 16  ;;  %5472 = vmatpush3.bf16.msra.mxu1 %v8621_v12  ;;  %v3336_v46 = vrot.slane %v3334_v3, 3 }
 0x32a   : > { %v3283_v5 = vshll.u32 %v2963_v1, 16  ;;  %v8642_v34 = vrot.slane %v3135_v31, 3  ;;  %v3217_v39 = vshrl.u32 %v8585_v59, 16  ;;  %5465 = vmatprep.subr.bf16.mxu1 %v8637_v45  ;;  %v2973_v17 = vpack.c.bf16 %v2897_v14, %v2897_v14 }
 0x32b   : > { %v2934_v30 = vsel %vm379_vm0, %v8389_v35, %v5723_v42  ;;  %3828 = vmatmul.mubr.bf16.gmra.mrb[8].mxu1 %v3206_v51  ;;  %v5726_v55 = vpop.permute.xlu1 %5725  ;;  %v3133_v15 = vor.u32 %v8624_v29, %v8613_v19  ;;  %v3140_v11 = vrot.slane %v3138_v61, 4  ;;  %v2958_v52 = vpack.c.bf16 %v2924_v62, %v2923_v18  ;;  %v8665_v42 = vld [vmem:[#allocation14 + $0x30] sm:$0xff]  }
 0x32c   : > { %v2933_v60 = vsel %vm379_vm0, %v8315_v26, %v5722_v8  ;;  %3835 = vmatprep.mubr.bf16.mxu1 %v3251_v22  ;;  %v3339_v63 = vrot.slane %v3337_v50, 4  ;;  %v3282_v0 = vrot.slane %v3280_v47, 3  ;;  %v2926_v49 = vsel %vm379_vm0, %v8310_v40, %v5718_v57 }
 0x32d   : > { %v2925_v35 = vsel %vm379_vm0, %v8337_v44, %v5717_v2  ;;  %v3285_v23 = vrot.slane %v3283_v5, 4  ;;  %v3379_v7 = vshrl.u32 %v2974_v43, 16  ;;  %5473 = vmatpush3.bf16.msra.mxu1 %v8637_v45  ;;  %v5733_v1 = vunpack.i.h.bf16 %v5731_v4 }
 0x32e   : > { %v5728_v56 = vunpack.i.h.bf16 %v5726_v55  ;;  %v3340_v53 = vor.u32 %v3339_v63, %v3336_v46  ;;  %v3220_v26 = vshll.u32 %v8585_v59, 16  ;;  %5466 = vmatprep.subr.bf16.mxu1 %v8652_v48  ;;  %v2967_v22 = vpack.c.bf16 %v2934_v30, %v2933_v60 }
 0x32f   : > { %v5732_v27 = vunpack.i.l.bf16 %v5731_v4  ;;  %v5727_v3 = vunpack.i.l.bf16 %v5726_v55  ;;  %v8661_v31 = vor.u32 %v3285_v23, %v3282_v0  ;;  %v2962_v40 = vpack.c.bf16 %v2926_v49, %v2925_v35  ;;  %v5736_v30 = vpop.permute.xlu1 %5735 }
 0x330   : > { %v3341_v44 = vsel %vm3057_vm5, %v8599_v25, %v3340_v53  ;;  %v3381_v61 = vrot.slane %v3379_v7, 3  ;;  %v3382_v14 = vshll.u32 %v2974_v43, 16  ;;  %v3235_v18 = vshrl.u32 %v2958_v52, 16 }
 0x331   : > { %3762 = vmatprep.mubr.bf16.mxu0 %v3341_v44  ;;  %v3287_v62 = vsel %vm3057_vm5, %v8611_v10, %v8661_v31  ;;  %v3238_v8 = vshll.u32 %v2958_v52, 16  ;;  %v3370_v57 = vshrl.u32 %v2973_v17, 16  ;;  %5474 = vmatpush3.bf16.msra.mxu1 %v8652_v48  ;;  %v2936_v51 = vsel %vm379_vm0, %v8293_v41, %v5733_v1  ;;  %v8678_v41 = vld [vmem:[#allocation14 + $0x38] sm:$0xff]  }
 0x332   : > { %v2928_v25 = vsel %vm379_vm0, %v8373_v54, %v5728_v56  ;;  %3763 = vmatmul.mubr.bf16.gmra.mrb[24].mxu0 %v3287_v62  ;;  %v3384_v43 = vrot.slane %v3382_v14, 4  ;;  %v3373_v2 = vshll.u32 %v2973_v17, 16  ;;  %5467 = vmatprep.subr.bf16.mxu1 %v8665_v42  ;;  %v2927_v50 = vsel %vm379_vm0, %v8394_v13, %v5727_v3  ;;  %v8683_v13 = vpop.permute.xlu0 %5740 }
 0x333   : > { %v3237_v10 = vrot.slane %v3235_v18, 3  ;;  %v3240_v47 = vrot.slane %v3238_v8, 4  ;;  %v3372_v46 = vrot.slane %v3370_v57, 3  ;;  %v3271_v55 = vshrl.u32 %v2962_v40, 16 }
 0x334   : > { %v3385_v5 = vor.u32 %v3384_v43, %v3381_v61  ;;  %v3375_v4 = vrot.slane %v3373_v2, 4  ;;  %v3274_v52 = vshll.u32 %v2962_v40, 16  ;;  %v2935_v54 = vsel %vm379_vm0, %v8396_v28, %v5732_v27  ;;  %v2569_v2 = vld [vmem:[#allocation3 + $0xb0] sm:$0xff] }
 0x335   : > { %v3241_v60 = vor.u32 %v3240_v47, %v3237_v10  ;;  %v3316_v17 = vshrl.u32 %v2967_v22, 16  ;;  %v3319_v63 = vshll.u32 %v2967_v22, 16  ;;  %5475 = vmatpush3.bf16.msra.mxu1 %v8665_v42  ;;  %v2966_v0 = vpack.c.bf16 %v2928_v25, %v2927_v50 }
 0x336   : > { %v3386_v49 = vsel %vm3057_vm5, %v3340_v53, %v3385_v5  ;;  %v3376_v35 = vor.u32 %v3375_v4, %v3372_v46  ;;  %v3141_v23 = vor.u32 %v3140_v11, %v8642_v34  ;;  %5468 = vmatprep.subr.bf16.mxu1 %v8678_v41  ;;  %v5738_v7 = vunpack.i.h.bf16 %v5736_v30 }
 0x337   : > { %3770 = vmatprep.mubr.bf16.mxu0 %v3386_v49  ;;  %v3242_v28 = vsel %vm3057_vm5, %v8630_v24, %v3241_v60  ;;  %v3273_v1 = vrot.slane %v3271_v55, 3  ;;  %v3276_v56 = vrot.slane %v3274_v52, 4  ;;  %v2971_v22 = vpack.c.bf16 %v2936_v51, %v2935_v54 }
 0x338   : > { %v5737_v27 = vunpack.i.l.bf16 %v5736_v30  ;;  %3836 = vmatmul.mubr.bf16.gmra.mrb[12].mxu1 %v3242_v28  ;;  %v3318_v3 = vrot.slane %v3316_v17, 3  ;;  %v3321_v40 = vrot.slane %v3319_v63, 4  ;;  %v5742_v44 = vunpack.i.l.bf16 %v8683_v13 }
 0x339   : > { %3843 = vmatprep.mubr.bf16.mxu1 %v3287_v62  ;;  %v3377_v34 = vsel %vm3057_vm5, %v8661_v31, %v3376_v35  ;;  %v3219_v11 = vrot.slane %v3217_v39, 3  ;;  %v3222_v53 = vrot.slane %v3220_v26, 4  ;;  %5476 = vmatpush3.bf16.msra.mxu1 %v8678_v41  ;;  %v2964_v24 = vpack.c.bf16 %v8456_v36, %v8453_v33 }
 0x33a   : > { %3771 = vmatmul.mubr.bf16.gmra.mrb[28].mxu0 %v3377_v34  ;;  %v3142_v61 = vsel %vm3057_vm5, %v3133_v15, %v3141_v23  ;;  %v3186_v14 = vor.u32 %v8526_v6, %v8524_v21  ;;  %v2930_v62 = vsel %vm379_vm0, %v8418_v32, %v5738_v7  ;;  %v3277_v59 = vor.u32 %v3276_v56, %v3273_v1 }
 0x33b   : > { %5405 = vmatprep.mubr.msk.bf16.mxu0 %vm379_vm0, %v3142_v61  ;;  %v3307_v39 = vshrl.u32 %v2966_v0, 16  ;;  %v3310_v26 = vshll.u32 %v2966_v0, 16  ;;  %v2929_v33 = vsel %vm379_vm0, %v8414_v9, %v5737_v27  ;;  %v3322_v36 = vor.u32 %v3321_v40, %v3318_v3 }
 0x33c   : > { %v3352_v18 = vshrl.u32 %v2971_v22, 16  ;;  %v3355_v8 = vshll.u32 %v2971_v22, 16  ;;  %v2937_v19 = vsel %vm379_vm0, %v8322_v16, %v5742_v44  ;;  %v3223_v29 = vor.u32 %v3222_v53, %v3219_v11 }
 0x33d   : > { %v3253_v21 = vshrl.u32 %v8604_v37, 16  ;;  %v3256_v6 = vshll.u32 %v8604_v37, 16  ;;  %v3289_v32 = vshrl.u32 %v2964_v24, 16  ;;  %v3292_v15 = vshll.u32 %v2964_v24, 16 }
 0x33e   : > { %v2970_v57 = vpack.c.bf16 %v2930_v62, %v2929_v33  ;;  %v3278_v51 = vsel %vm3057_vm5, %v3241_v60, %v3277_v59  ;;  %v3309_v25 = vrot.slane %v3307_v39, 3  ;;  %v3312_v43 = vrot.slane %v3310_v26, 4  ;;  %v9626_v26 = vld [vmem:[#allocation29_spill] sm:$0xff] }
 0x33f   : > { %v2976_v9 = vpack.c.bf16 %v2937_v19, %v2937_v19  ;;  %v3323_v50 = vsel %vm3057_vm5, %v8661_v31, %v3322_v36  ;;  %v3354_v10 = vrot.slane %v3352_v18, 3  ;;  %v3357_v47 = vrot.slane %v3355_v8, 4  ;;  %v9627_v19 = vld [vmem:[#allocation31_spill] sm:$0xff] }
 0x340   : > { %3844 = vmatmul.mubr.bf16.gmra.mrb[16].mxu1 %v3278_v51  ;;  %v3187_v46 = vsel %vm3057_vm5, %v3141_v23, %v3186_v14  ;;  %v3224_v37 = vsel %vm3057_vm5, %v3186_v14, %v3223_v29  ;;  %v3255_v5 = vrot.slane %v3253_v21, 3  ;;  %v3258_v30 = vrot.slane %v3256_v6, 4  ;;  %v9624_v23 = vld [vmem:[#allocation28_spill] sm:$0xff] }
 0x341   : > { %3851 = vmatprep.mubr.bf16.mxu1 %v3323_v50  ;;  %v5743_v4 = vunpack.i.h.bf16 %v8683_v13  ;;  %v3291_v55 = vrot.slane %v3289_v32, 3  ;;  %v3294_v52 = vrot.slane %v3292_v15, 4  ;;  %v2874_v54 = vrot.slane %v2569_v2, 2  ;;  %v5801_v6 = vld [vmem:[#allocation4] sm:$0xff]  ;;  %v9628_v15 = vld [vmem:[#allocation30_spill] sm:$0xff] }
 0x342   : > { %5406 = vmatmul.mubr.msk.bf16.vlgmr.msra.gmra.mrb[32].mxu0 %vm379_vm0, %v3187_v46  ;;  %v3313_v60 = vor.u32 %v3312_v43, %v3309_v25  ;;  %v3343_v31 = vshrl.u32 %v2970_v57, 16  ;;  %v3346_v17 = vshll.u32 %v2970_v57, 16  ;;  %v3358_v63 = vor.u32 %v3357_v47, %v3354_v10 }
 0x343   : > { %5409 = vmatprep.mubr.msk.bf16.mxu0 %vm379_vm0, %v3224_v37  ;;  %5422 = vmatpush3.bf16.msra.mxu0 %v8491_v20  ;;  %v3397_v0 = vshrl.u32 %v2976_v9, 16  ;;  %v3400_v49 = vshll.u32 %v2976_v9, 16  ;;  %v3259_v35 = vor.u32 %v3258_v30, %v3255_v5  ;;  %v2931_v13 = vsel %vm379_vm0, %v9624_v23, %v5743_v4 }
 0x344   : > { %5423 = vmatprep.subr.bf16.mxu0 %v8577_v38  ;;  %v3295_v7 = vor.u32 %v3294_v52, %v3291_v55  ;;  %v9625_v28 = vrot.slane %v8322_v16, 2  ;;  %v3314_v56 = vsel %vm3057_vm5, %v3277_v59, %v3313_v60  ;;  %v3345_v22 = vrot.slane %v3343_v31, 3 }
 0x345   : > { %v3348_v27 = vrot.slane %v3346_v17, 4  ;;  %v3359_v20 = vsel %vm3057_vm5, %v3322_v36, %v3358_v63  ;;  %v3399_v3 = vrot.slane %v3397_v0, 3  ;;  %v3402_v40 = vrot.slane %v3400_v49, 4  ;;  %v8762_v0 = vld [vmem:[#allocation13] ss:$0 sm:$0xff] }
 0x346   : > { %v2875_v1 = vsel %vm1150_vm2, %v9625_v28, %v2874_v54  ;;  %v2975_v44 = vpack.c.bf16 %v2931_v13, %v2931_v13  ;;  %v3260_v34 = vsel %vm3057_vm5, %v3223_v29, %v3259_v35  ;;  %v3296_v11 = vsel %vm3057_vm5, %v3259_v35, %v3295_v7 }
 0x347   : > { %5424 = vmatpush3.bf16.msra.mxu0 %v8577_v38  ;;  %v2977_v16 = vpack.c.bf16 %v2875_v1, %v2875_v1  ;;  %v3349_v53 = vor.u32 %v3348_v27, %v3345_v22  ;;  %v3403_v38 = vor.u32 %v3402_v40, %v3399_v3  ;;  %v3332_v33 = vsel %vm3057_vm5, %v3295_v7, %v9626_v26 }
 0x348   : > { %3852 = vmatmul.mubr.bf16.gmra.mrb[20].mxu1 %v3314_v56  ;;  %5425 = vmatprep.subr.bf16.mxu0 %v8593_v58  ;;  %v3388_v24 = vshrl.u32 %v2975_v44, 16  ;;  %v3391_v61 = vshll.u32 %v2975_v44, 16  ;;  %v8751_v32 = vpack.c.bf16 %v5801_v6, %v5801_v6 }
 0x349   : > { %3859 = vmatprep.mubr.bf16.mxu1 %v3359_v20  ;;  %v3406_v14 = vshrl.u32 %v2977_v16, 16  ;;  %v3409_v62 = vshll.u32 %v2977_v16, 16  ;;  %v3350_v59 = vsel %vm3057_vm5, %v3313_v60, %v3349_v53  ;;  %v3404_v39 = vsel %vm3057_vm5, %v3358_v63, %v3403_v38 }
 0x34a   : > { %5410 = vmatmul.mubr.msk.bf16.gmra.mrb[36].mxu0 %vm379_vm0, %v3260_v34  ;;  %v3393_v36 = vrot.slane %v3391_v61, 4 }
 0x34b   : > { %5413 = vmatprep.mubr.msk.bf16.mxu0 %vm379_vm0, %v3296_v11  ;;  %5426 = vmatpush3.bf16.msra.mxu0 %v8593_v58  ;;  %v3390_v58 = vrot.slane %v3388_v24, 3  ;;  %v3408_v18 = vrot.slane %v3406_v14, 3  ;;  %v3411_v8 = vrot.slane %v3409_v62, 4 }
 0x34c   : > { %5427 = vmatprep.subr.bf16.mxu0 %v8621_v12 }
 0x34d   : > { %v3412_v29 = vor.u32 %v3411_v8, %v3408_v18 }
 0x34f   : > { %5428 = vmatpush3.bf16.msra.mxu0 %v8621_v12  ;;  %v3394_v12 = vor.u32 %v3393_v36, %v3390_v58  ;;  %v3413_v57 = vsel %vm3057_vm5, %v9628_v15, %v3412_v29 }
 0x350   : > { %3860 = vmatmul.mubr.bf16.gmra.mrb[24].mxu1 %v3350_v59  ;;  %5429 = vmatprep.subr.bf16.mxu0 %v8637_v45 }
 0x351   : > { %3867 = vmatprep.mubr.bf16.mxu1 %v3404_v39  ;;  %v3395_v21 = vsel %vm3057_vm5, %v3349_v53, %v3394_v12 }
 0x352   : > { %5414 = vmatmul.mubr.msk.bf16.gmra.mrb[40].mxu0 %vm379_vm0, %v3332_v33 }
 0x353   : > { %5417 = vmatprep.mubr.msk.bf16.mxu0 %vm379_vm0, %v9627_v19  ;;  %5430 = vmatpush3.bf16.msra.mxu0 %v8637_v45 }
 0x354   : > { %5431 = vmatprep.subr.bf16.mxu0 %v8652_v48 }
 0x357   : > { %5432 = vmatpush3.bf16.msra.mxu0 %v8652_v48 }
 0x358   : > { %3868 = vmatmul.mubr.bf16.gmra.mrb[28].mxu1 %v3395_v21  ;;  %5433 = vmatprep.subr.bf16.mxu0 %v8665_v42 }
 0x35a   : > { %5418 = vmatmul.mubr.msk.bf16.gmra.mrb[44].mxu0 %vm379_vm0, %v3413_v57 }
 0x35b   : > { %5434 = vmatpush3.bf16.msra.mxu0 %v8665_v42  ;;  %5437 = vmatprep.mubr.bf16.mxu0 %v8751_v32 }
 0x35c   : > { %5435 = vmatprep.subr.bf16.mxu0 %v8678_v41 }
 0x35f   : > { %5436 = vmatpush3.bf16.msra.mxu0 %v8678_v41 }
 0x362   : > { %5438 = vmatmul.mubr.bf16.vlgmr.msra.gmra.mrb[48].mxu0 %v8751_v32 }
 0x37e   : > { %v5253_v45 = vpop.f32.mrb[0].mxu0 }
 0x37f   : > { %v5254_v48 = vpop.f32.mrb[1].mxu0 }
 0x380   : > { %v5255_v51 = vadd.f32 %v5254_v48, %v5253_v45  ;;  %v5256_v25 = vpop.f32.mrb[2].mxu0 }
 0x381   : > { %v5257_v43 = vpop.f32.mrb[3].mxu0 }
 0x382   : > { %v5258_v2 = vadd.f32 %v5257_v43, %v5256_v25  ;;  %v3717_v23 = vadd.f32 %v5255_v51, %v8762_v0 }
 0x384   : > { %v3720_v56 = vadd.f32 %v5258_v2, %v8762_v0 }
 0x3a3   : > { %v5259_v9 = vpop.f32.mrb[4].mxu0 }
 0x3a4   : > { %v5260_v50 = vpop.f32.mrb[5].mxu0 }
 0x3a5   : > { %v5261_v10 = vadd.f32 %v5260_v50, %v5259_v9  ;;  %v5262_v47 = vpop.f32.mrb[6].mxu0 }
 0x3a6   : > { %v5263_v46 = vpop.f32.mrb[7].mxu0 }
 0x3a7   : > { %v5264_v42 = vadd.f32 %v5263_v46, %v5262_v47  ;;  %v3725_v38 = vadd.f32 %v5261_v10, %v8762_v0 }
 0x3a9   : > { %v3728_v59 = vadd.f32 %v5264_v42, %v8762_v0 }
 0x3c3   : > { %v5265_v37 = vpop.f32.mrb[8].mxu0 }
 0x3c4   : > { %v5266_v5 = vpop.f32.mrb[9].mxu0 }
 0x3c5   : > { %v5267_v30 = vadd.f32 %v5266_v5, %v5265_v37  ;;  %v5268_v4 = vpop.f32.mrb[10].mxu0 }
 0x3c6   : > { %v5269_v55 = vpop.f32.mrb[11].mxu0 }
 0x3c7   : > { %v5270_v41 = vadd.f32 %v5269_v55, %v5268_v4  ;;  %v3733_v21 = vadd.f32 %v5267_v30, %v8762_v0 }
 0x3c9   : > { %v3736_v45 = vadd.f32 %v5270_v41, %v8762_v0 }
 0x3e4   : > { %v5271_v52 = vpop.f32.mrb[12].mxu0 }
 0x3e5   : > { %v5272_v54 = vpop.f32.mrb[13].mxu0 }
 0x3e6   : > { %v5273_v60 = vadd.f32 %v5272_v54, %v5271_v52  ;;  %v5274_v31 = vpop.f32.mrb[14].mxu0 }
 0x3e7   : > { %v5275_v17 = vpop.f32.mrb[15].mxu0 }
 0x3e8   : > { %v5276_v63 = vadd.f32 %v5275_v17, %v5274_v31  ;;  %v3741_v37 = vadd.f32 %v5273_v60, %v8762_v0 }
 0x3ea   : > { %v3744_v52 = vadd.f32 %v5276_v63, %v8762_v0 }
 0x3ee   : > { %v5317_v49 = vpop.f32.mrb[0].mxu1 }
 0x3ef   : > { %v5318_v35 = vpop.f32.mrb[1].mxu1 }
 0x3f0   : > { %v5319_v13 = vadd.f32 %v5318_v35, %v5317_v49  ;;  %v5320_v7 = vpop.f32.mrb[2].mxu1 }
 0x3f1   : > { %v5321_v28 = vpop.f32.mrb[3].mxu1  ;;  %v5277_v1 = vpop.f32.mrb[16].mxu0 }
 0x3f2   : > { %v5322_v22 = vadd.f32 %v5321_v28, %v5320_v7  ;;  %v5278_v27 = vpop.f32.mrb[17].mxu0  ;;  %v8766_v20 = vadd.f32 %v5319_v13, %v3717_v23 }
 0x3f3   : > { %v5279_v3 = vadd.f32 %v5278_v27, %v5277_v1  ;;  %v5280_v40 = vpop.f32.mrb[18].mxu0 }
 0x3f4   : > { %v5281_v44 = vpop.f32.mrb[19].mxu0  ;;  %v8768_v34 = vadd.f32 %v5322_v22, %v3720_v56 }
 0x3f5   : > { %v5282_v16 = vadd.f32 %v5281_v44, %v5280_v40  ;;  %v3749_v60 = vadd.f32 %v5279_v3, %v8762_v0 }
 0x3f6   : > { %v5323_v11 = vpop.f32.mrb[4].mxu1 }
 0x3f7   : > { %v5324_v53 = vpop.f32.mrb[5].mxu1  ;;  %v3752_v63 = vadd.f32 %v5282_v16, %v8762_v0 }
 0x3f8   : > { %v5325_v24 = vadd.f32 %v5324_v53, %v5323_v11  ;;  %v5326_v61 = vpop.f32.mrb[6].mxu1 }
 0x3f9   : > { %v5327_v14 = vpop.f32.mrb[7].mxu1  ;;  %v5283_v62 = vpop.f32.mrb[20].mxu0 }
 0x3fa   : > { %v5328_v39 = vadd.f32 %v5327_v14, %v5326_v61  ;;  %v5284_v26 = vpop.f32.mrb[21].mxu0  ;;  %v3822_v33 = vadd.f32 %v5325_v24, %v3725_v38 }
 0x3fb   : > { %v8772_v58 = vadd.f32 %v5284_v26, %v5283_v62  ;;  %v5286_v36 = vpop.f32.mrb[22].mxu0 }
 0x3fc   : > { %v5287_v18 = vpop.f32.mrb[23].mxu0  ;;  %v3825_v8 = vadd.f32 %v5328_v39, %v3728_v59 }
 0x3fd   : > { %v8774_v19 = vadd.f32 %v5287_v18, %v5286_v36  ;;  %v3757_v16 = vadd.f32 %v8772_v58, %v8762_v0 }
 0x3fe   : > { %v5329_v12 = vpop.f32.mrb[8].mxu1 }
 0x3ff   : > { %v5330_v29 = vpop.f32.mrb[9].mxu1 }
 0x400   : > { %v5331_v6 = vadd.f32 %v5330_v29, %v5329_v12  ;;  %v5332_v15 = vpop.f32.mrb[10].mxu1 }
 0x401   : > { %v5333_v57 = vpop.f32.mrb[11].mxu1 }
 0x402   : > { %v5334_v48 = vadd.f32 %v5333_v57, %v5332_v15  ;;  %v3830_v51 = vadd.f32 %v5331_v6, %v3733_v21 }
 0x404   : > { %v8778_v25 = vadd.f32 %v5334_v48, %v3736_v45 }
 0x405   : > { %v5289_v43 = vpop.f32.mrb[24].mxu0 }
 0x406   : > { %v5290_v2 = vpop.f32.mrb[25].mxu0 }
 0x407   : > { %v8780_v9 = vadd.f32 %v5290_v2, %v5289_v43  ;;  %v5292_v50 = vpop.f32.mrb[26].mxu0 }
 0x408   : > { %v5293_v10 = vpop.f32.mrb[27].mxu0 }
 0x409   : > { %v8782_v47 = vadd.f32 %v5293_v10, %v5292_v50 }
 0x40b   : > { %v5335_v46 = vpop.f32.mrb[12].mxu1 }
 0x40c   : > { %v5336_v42 = vpop.f32.mrb[13].mxu1 }
 0x40d   : > { %v5337_v5 = vadd.f32 %v5336_v42, %v5335_v46  ;;  %v5338_v30 = vpop.f32.mrb[14].mxu1  ;;  %v5295_v4 = vpop.f32.mrb[28].mxu0 }
 0x40e   : > { %v5339_v55 = vpop.f32.mrb[15].mxu1  ;;  %v5296_v41 = vpop.f32.mrb[29].mxu0 }
 0x40f   : > { %v5340_v54 = vadd.f32 %v5339_v55, %v5338_v30  ;;  %v8786_v31 = vadd.f32 %v5296_v41, %v5295_v4  ;;  %v5298_v17 = vpop.f32.mrb[30].mxu0  ;;  %v3838_v49 = vadd.f32 %v5337_v5, %v3741_v37 }
 0x410   : > { %v5299_v35 = vpop.f32.mrb[31].mxu0 }
 0x411   : > { %v8788_v23 = vadd.f32 %v5299_v35, %v5298_v17  ;;  %v3841_v13 = vadd.f32 %v5340_v54, %v3744_v52 }
 0x413   : > { %v5341_v7 = vpop.f32.mrb[16].mxu1 }
 0x414   : > { %v5342_v28 = vpop.f32.mrb[17].mxu1 }
 0x415   : > { %v5343_v1 = vadd.f32 %v5342_v28, %v5341_v7  ;;  %v5344_v56 = vpop.f32.mrb[18].mxu1  ;;  %v5407_v22 = vpop.f32.mrb[32].mxu0  ;;  %v3768_v28 = vadd.f32 %v8782_v47, %v8762_v0 }
 0x416   : > { %v5345_v27 = vpop.f32.mrb[19].mxu1  ;;  %v3919_v40 = vadd.f32 %v5407_v22, %v3822_v33  ;;  %v3910_v44 = vpop.f32.mrb[33].mxu0 }
 0x417   : > { %v5346_v11 = vadd.f32 %v5345_v27, %v5344_v56  ;;  %v3911_v53 = vadd.f32 %v3910_v44, %v8766_v20  ;;  %v5408_v38 = vpop.f32.mrb[34].mxu0  ;;  %v3846_v24 = vadd.f32 %v5343_v1, %v3749_v60 }
 0x418   : > { %v3975_v61 = vmax.f32 %v3919_v40, 0.0  ;;  %v3922_v14 = vadd.f32 %v5408_v38, %v3825_v8  ;;  %v3913_v62 = vpop.f32.mrb[35].mxu0 }
 0x419   : > { %v3973_v59 = vmax.f32 %v3911_v53, 0.0  ;;  %v3914_v39 = vadd.f32 %v3913_v62, %v8768_v34  ;;  %v3849_v3 = vadd.f32 %v5346_v11, %v3752_v63  ;;  %v3760_v34 = vadd.f32 %v8774_v19, %v8762_v0 }
 0x41a   : > { %3991 = vst [vmem:[#allocation4 + $0x30] sm:$0xfe] %v3975_v61  ;;  %v3976_v26 = vmax.f32 %v3922_v14, 0.0 }
 0x41b   : > { %3989 = vst [vmem:[#allocation4 + $0x20] sm:$0xfe] %v3973_v59  ;;  %v5347_v36 = vpop.f32.mrb[20].mxu1  ;;  %v3974_v33 = vmax.f32 %v3914_v39, 0.0  ;;  %v3773_v59 = vadd.f32 %v8786_v31, %v8762_v0 }
 0x41c   : > { %3992 = vst [vmem:[#allocation4 + $0x38] sm:$0x1] %v3976_v26  ;;  %v5348_v18 = vpop.f32.mrb[21].mxu1 }
 0x41d   : > { %3990 = vst [vmem:[#allocation4 + $0x28] sm:$0x1] %v3974_v33  ;;  %v5349_v20 = vadd.f32 %v5348_v18, %v5347_v36  ;;  %v5350_v12 = vpop.f32.mrb[22].mxu1  ;;  %v5411_v29 = vpop.f32.mrb[36].mxu0 }
 0x41e   : > { %v5351_v8 = vpop.f32.mrb[23].mxu1  ;;  %v3935_v21 = vadd.f32 %v5411_v29, %v3838_v49  ;;  %v3926_v6 = vpop.f32.mrb[37].mxu0 }
 0x41f   : > { %v5352_v15 = vadd.f32 %v5351_v8, %v5350_v12  ;;  %v3927_v57 = vadd.f32 %v3926_v6, %v3830_v51  ;;  %v5412_v45 = vpop.f32.mrb[38].mxu0  ;;  %v3854_v48 = vadd.f32 %v5349_v20, %v3757_v16  ;;  %v3765_v51 = vadd.f32 %v8780_v9, %v8762_v0 }
 0x420   : > { %v3979_v43 = vmax.f32 %v3935_v21, 0.0  ;;  %v3938_v2 = vadd.f32 %v5412_v45, %v3841_v13  ;;  %v3929_v50 = vpop.f32.mrb[39].mxu0  ;;  %v3776_v12 = vadd.f32 %v8788_v23, %v8762_v0 }
 0x421   : > { %v3977_v10 = vmax.f32 %v3927_v57, 0.0  ;;  %v3930_v58 = vadd.f32 %v3929_v50, %v8778_v25  ;;  %v3857_v46 = vadd.f32 %v5352_v15, %v3760_v34  ;;  %v4011_v25 = vld [vmem:[#allocation4 + $0x30] sm:$0xff] }
 0x422   : > { %3995 = vst [vmem:[#allocation4 + $0x50] sm:$0xfe] %v3979_v43  ;;  %v3980_v42 = vmax.f32 %v3938_v2, 0.0  ;;  %v4009_v19 = vld [vmem:[#allocation4 + $0x20] sm:$0xff] }
 0x423   : > { %3993 = vst [vmem:[#allocation4 + $0x40] sm:$0xfe] %v3977_v10  ;;  %v5353_v37 = vpop.f32.mrb[24].mxu1  ;;  %v3978_v5 = vmax.f32 %v3930_v58, 0.0  ;;  %v4012_v30 = vld [vmem:[#allocation4 + $0x38] sm:$0xff] }
 0x424   : > { %3996 = vst [vmem:[#allocation4 + $0x58] sm:$0x1] %v3980_v42  ;;  %v5354_v4 = vpop.f32.mrb[25].mxu1  ;;  %v4010_v55 = vld [vmem:[#allocation4 + $0x28] sm:$0xff]  ;;  %v4032_v7 = vpack.c.bf16 %v4012_v30, %v4011_v25 }
 0x425   : > { %3994 = vst [vmem:[#allocation4 + $0x48] sm:$0x1] %v3978_v5  ;;  %v5355_v41 = vadd.f32 %v5354_v4, %v5353_v37  ;;  %v5356_v52 = vpop.f32.mrb[26].mxu1  ;;  %v5415_v54 = vpop.f32.mrb[40].mxu0  ;;  %v4031_v17 = vpack.c.bf16 %v4010_v55, %v4009_v19 }
 0x426   : > { %v5357_v49 = vpop.f32.mrb[27].mxu1  ;;  %v3951_v35 = vadd.f32 %v5415_v54, %v3854_v48  ;;  %v3942_v13 = vpop.f32.mrb[41].mxu0 }
 0x427   : > { %v5358_v60 = vadd.f32 %v5357_v49, %v5356_v52  ;;  %v3943_v1 = vadd.f32 %v3942_v13, %v3846_v24  ;;  %v5416_v56 = vpop.f32.mrb[42].mxu0  ;;  %5441 = vmatprep.mubr.bf16.mxu1 %v4031_v17  ;;  %v3862_v22 = vadd.f32 %v5355_v41, %v3765_v51 }
 0x428   : > { %v3983_v27 = vmax.f32 %v3951_v35, 0.0  ;;  %v3954_v9 = vadd.f32 %v5416_v56, %v3857_v46  ;;  %v3945_v40 = vpop.f32.mrb[43].mxu0  ;;  %5442 = vmatmul.mubr.bf16.vlgmr.msra.gmra.mrb[32].mxu1 %v4032_v7 }
 0x429   : > { %v3981_v44 = vmax.f32 %v3943_v1, 0.0  ;;  %v3946_v63 = vadd.f32 %v3945_v40, %v3849_v3  ;;  %v3865_v11 = vadd.f32 %v5358_v60, %v3768_v28  ;;  %v4015_v3 = vld [vmem:[#allocation4 + $0x50] sm:$0xff] }
 0x42a   : > { %3999 = vst [vmem:[#allocation4 + $0x70] sm:$0xfe] %v3983_v27  ;;  %v3984_v53 = vmax.f32 %v3954_v9, 0.0  ;;  %v4013_v62 = vld [vmem:[#allocation4 + $0x40] sm:$0xff] }
 0x42b   : > { %3997 = vst [vmem:[#allocation4 + $0x60] sm:$0xfe] %v3981_v44  ;;  %v5359_v38 = vpop.f32.mrb[28].mxu1  ;;  %v3982_v61 = vmax.f32 %v3946_v63, 0.0  ;;  %v4016_v14 = vld [vmem:[#allocation4 + $0x58] sm:$0xff] }
 0x42c   : > { %4000 = vst [vmem:[#allocation4 + $0x78] sm:$0x1] %v3984_v53  ;;  %v5360_v47 = vpop.f32.mrb[29].mxu1  ;;  %v4014_v24 = vld [vmem:[#allocation4 + $0x48] sm:$0xff]  ;;  %v4034_v20 = vpack.c.bf16 %v4016_v14, %v4015_v3 }
 0x42d   : > { %3998 = vst [vmem:[#allocation4 + $0x68] sm:$0x1] %v3982_v61  ;;  %v5361_v39 = vadd.f32 %v5360_v47, %v5359_v38  ;;  %v5362_v26 = vpop.f32.mrb[30].mxu1  ;;  %v5419_v36 = vpop.f32.mrb[44].mxu0  ;;  %v4033_v33 = vpack.c.bf16 %v4014_v24, %v4013_v62 }
 0x42e   : > { %v5363_v18 = vpop.f32.mrb[31].mxu1  ;;  %v3958_v16 = vpop.f32.mrb[45].mxu0 }
 0x42f   : > { %v5364_v29 = vadd.f32 %v5363_v18, %v5362_v26  ;;  %v3870_v8 = vadd.f32 %v5361_v39, %v3773_v59  ;;  %v3959_v21 = vadd.f32 %v3958_v16, %v3862_v22  ;;  %v5420_v6 = vpop.f32.mrb[46].mxu0  ;;  %5445 = vmatprep.mubr.bf16.mxu1 %v4033_v33 }
 0x430   : > { %v3961_v34 = vpop.f32.mrb[47].mxu0  ;;  %5446 = vmatmul.mubr.bf16.gmra.mrb[36].mxu1 %v4034_v20 }
 0x431   : > { %v3967_v31 = vadd.f32 %v5419_v36, %v3870_v8  ;;  %v3985_v15 = vmax.f32 %v3959_v21, 0.0  ;;  %v3873_v57 = vadd.f32 %v5364_v29, %v3776_v12  ;;  %v3962_v45 = vadd.f32 %v3961_v34, %v3865_v11  ;;  %v4019_v46 = vld [vmem:[#allocation4 + $0x70] sm:$0xff] }
 0x432   : > { %v4017_v10 = vld [vmem:[#allocation4 + $0x60] sm:$0xff] }
 0x433   : > { %v3987_v48 = vmax.f32 %v3967_v31, 0.0  ;;  %4001 = vst [vmem:[#allocation4 + $0x80] sm:$0xfe] %v3985_v15  ;;  %v3970_v43 = vadd.f32 %v5420_v6, %v3873_v57  ;;  %v3986_v2 = vmax.f32 %v3962_v45, 0.0  ;;  %v4020_v50 = vld [vmem:[#allocation4 + $0x78] sm:$0xff] }
 0x434   : > { %v4018_v58 = vld [vmem:[#allocation4 + $0x68] sm:$0xff]  ;;  %v4036_v37 = vpack.c.bf16 %v4020_v50, %v4019_v46 }
 0x435   : > { %4003 = vst [vmem:[#allocation4 + $0x90] sm:$0xfe] %v3987_v48  ;;  %v3988_v0 = vmax.f32 %v3970_v43, 0.0  ;;  %4002 = vst [vmem:[#allocation4 + $0x88] sm:$0x1] %v3986_v2  ;;  %v4035_v23 = vpack.c.bf16 %v4018_v58, %v4017_v10  ;;  %v8807_v42 = vpop.f32.mrb[48].mxu0 }
 0x436   : > { %v4248_v5 = vrot.slane %v8807_v42, 1  ;;  %v4348_v30 = vrot.slane %v8807_v42, 2  ;;  %v4139_v4 = vpop.f32.mrb[49].mxu0 }
 0x437   : > { %4004 = vst [vmem:[#allocation4 + $0x98] sm:$0x1] %v3988_v0  ;;  %5449 = vmatprep.mubr.bf16.mxu1 %v4035_v23  ;;  %v8811_v19 = vpop.f32.mrb[50].mxu0 }
 0x438   : > { %5450 = vmatmul.mubr.bf16.gmra.mrb[40].mxu1 %v4036_v37  ;;  %4279 = vrot.lane.b32.xlu1 %v4248_v5, %s6094_s9  ;;  %v4249_v55 = vrot.slane %v8811_v19, 1  ;;  %v8815_v51 = vpop.f32.mrb[51].mxu0  ;;  %v4349_v41 = vrot.slane %v8811_v19, 2 }
 0x439   : > { %4381 = vrot.lane.b32.xlu0 %v4348_v30, %s6095_s20 }
 0x43a   : > { %v4250_v52 = vsel %vm905_vm1, %v4248_v5, %v4249_v55  ;;  %v4021_v54 = vld [vmem:[#allocation4 + $0x80] sm:$0xff]  ;;  %v4350_v49 = vsel %vm1150_vm2, %v4348_v30, %v4349_v41 }
 0x43c   : > { %v4022_v17 = vld [vmem:[#allocation4 + $0x88] sm:$0xff]  ;;  %4450 = vrot.lane.b32.xlu1 %v8811_v19, %s6096_s29  ;;  %v4023_v35 = vld [vmem:[#allocation4 + $0x90] sm:$0xff] }
 0x43d   : > { %v4037_v25 = vpack.c.bf16 %v4022_v17, %v4021_v54  ;;  %4281 = vrot.lane.b32.xlu0 %v4250_v52, %s6094_s9 }
 0x43e   : > { %v4024_v13 = vld [vmem:[#allocation4 + $0x98] sm:$0xff] }
 0x43f   : > { %5453 = vmatprep.mubr.bf16.mxu1 %v4037_v25  ;;  %v4038_v7 = vpack.c.bf16 %v4024_v13, %v4023_v35 }
 0x440   : > { %4383 = vrot.lane.b32.xlu1 %v4350_v49, %s6095_s20 }
 0x441   : > { %5454 = vmatmul.mubr.bf16.gmra.mrb[44].mxu1 %v4038_v7 }
 0x442   : > { %5457 = vmatprep.mubr.bf16.mxu1 %v8751_v32 }
 0x449   : > { %5458 = vmatmul.mubr.bf16.gmra.mrb[48].mxu1 %v8751_v32 }
 0x4fb   : > { %v8831_v28 = vpop.f32.mrb[32].mxu1 }
 0x4fc   : > { %4666 = vrot.lane.b32.xlu1 %v8831_v28, %s6097_s16  ;;  %4456 = vrot.lane.b32.xlu0 %v8831_v28, %s6096_s29  ;;  %v8837_v60 = vpop.f32.mrb[33].mxu1  ;;  %v4255_v22 = vrot.slane %v8831_v28, 1  ;;  %v4355_v27 = vrot.slane %v8831_v28, 2 }
 0x4fd   : > { %v8839_v1 = vpop.f32.mrb[34].mxu1  ;;  %v4251_v40 = vrot.slane %v8837_v60, 1  ;;  %v8849_v44 = vrot.slane %v8837_v60, 2 }
 0x4fe   : > { %v8841_v56 = vpop.f32.mrb[35].mxu1  ;;  %v4357_v32 = vrot.slane %v8839_v1, 2  ;;  %v4257_v9 = vrot.slane %v8839_v1, 1 }
 0x4ff   : > { %v4253_v63 = vrot.slane %v8841_v56, 1  ;;  %v4353_v11 = vrot.slane %v8841_v56, 2  ;;  %v4252_v43 = vsel %vm905_vm1, %v4249_v55, %v4251_v40 }
 0x500   : > { %4452 = vrot.lane.b32.xlu0 %v8837_v60, %s6096_s29  ;;  %4458 = vrot.lane.b32.xlu1 %v8839_v1, %s6096_s29  ;;  %v8858_v53 = vsel %vm1150_vm2, %v4355_v27, %v4357_v32  ;;  %v8861_v38 = vsel %vm905_vm1, %v4255_v22, %v4257_v9 }
 0x501   : > { %v8864_v61 = vsel %vm905_vm1, %v4253_v63, %v4255_v22  ;;  %v8868_v14 = vsel %vm1150_vm2, %v8849_v44, %v4353_v11  ;;  %v8871_v47 = vsel %vm905_vm1, %v4251_v40, %v4253_v63  ;;  %v8874_v62 = vsel %vm1150_vm2, %v4353_v11, %v4355_v27 }
 0x503   : > { %v8876_v24 = vpop.f32.mrb[36].mxu1 }
 0x504   : > { %4668 = vrot.lane.b32.xlu0 %v8839_v1, %s6097_s16  ;;  %4454 = vrot.lane.b32.xlu1 %v8841_v56, %s6096_s29  ;;  %v8882_v59 = vpop.f32.mrb[37].mxu1  ;;  %v4363_v3 = vrot.slane %v8876_v24, 2  ;;  %v4263_v16 = vrot.slane %v8876_v24, 1 }
 0x505   : > { %v8884_v39 = vpop.f32.mrb[38].mxu1  ;;  %v4359_v26 = vrot.slane %v8882_v59, 2  ;;  %v4259_v36 = vrot.slane %v8882_v59, 1 }
 0x506   : > { %9629 = vst [vmem:[#allocation23_spill] sm:$0xff] %v8884_v39  ;;  %v8888_v33 = vpop.f32.mrb[39].mxu1  ;;  %v4365_v18 = vrot.slane %v8884_v39, 2  ;;  %v4265_v20 = vrot.slane %v8884_v39, 1 }
 0x507   : > { %v8895_v12 = vsel %vm1150_vm2, %v4357_v32, %v4359_v26  ;;  %v8898_v29 = vsel %vm905_vm1, %v4257_v9, %v4259_v36  ;;  %v4261_v8 = vrot.slane %v8888_v33, 1  ;;  %v4361_v21 = vrot.slane %v8888_v33, 2 }
 0x508   : > { %4736 = vrot.lane.b32.xlu0 %v4255_v22, %s6098_s19  ;;  %4595 = vrot.lane.b32.xlu1 %v8849_v44, %s6099_s15  ;;  %v8906_v6 = vsel %vm1150_vm2, %v4363_v3, %v4365_v18  ;;  %v8909_v34 = vsel %vm905_vm1, %v4263_v16, %v4265_v20  ;;  %v4352_v32 = vsel %vm1150_vm2, %v4349_v41, %v8849_v44 }
 0x509   : > { %v8912_v31 = vsel %vm905_vm1, %v4259_v36, %v4261_v8  ;;  %v8915_v15 = vsel %vm905_vm1, %v4261_v8, %v4263_v16  ;;  %v8918_v57 = vsel %vm1150_vm2, %v4361_v21, %v4363_v3  ;;  %v8921_v45 = vsel %vm1150_vm2, %v4359_v26, %v4361_v21 }
 0x50b   : > { %v8923_v48 = vpop.f32.mrb[40].mxu1 }
 0x50c   : > { %9630 = vst [vmem:[#allocation25_spill] sm:$0xff] %v8923_v48  ;;  %4809 = vrot.lane.b32.xlu0 %v4355_v27, %s6100_s12  ;;  %4283 = vrot.lane.b32.xlu1 %v4252_v43, %s6094_s9  ;;  %v8930_v2 = vpop.f32.mrb[41].mxu1  ;;  %v4371_v23 = vrot.slane %v8923_v48, 2  ;;  %v4271_v37 = vrot.slane %v8923_v48, 1 }
 0x50d   : > { %9631 = vst [vmem:[#allocation24_spill] sm:$0xff] %v8930_v2  ;;  %v8932_v50 = vpop.f32.mrb[42].mxu1  ;;  %v4367_v10 = vrot.slane %v8930_v2, 2  ;;  %v4267_v58 = vrot.slane %v8930_v2, 1 }
 0x50e   : > { %9632 = vst [vmem:[#allocation26_spill] sm:$0xff] %v8932_v50  ;;  %v8936_v0 = vpop.f32.mrb[43].mxu1  ;;  %v4373_v46 = vrot.slane %v8932_v50, 2  ;;  %v4273_v5 = vrot.slane %v8932_v50, 1 }
 0x50f   : > { %9633 = vst [vmem:[#allocation27_spill] sm:$0xff] %v8936_v0  ;;  %v8943_v30 = vsel %vm1150_vm2, %v4365_v18, %v4367_v10  ;;  %v8946_v4 = vsel %vm905_vm1, %v4265_v20, %v4267_v58  ;;  %v4269_v55 = vrot.slane %v8936_v0, 1  ;;  %v4369_v52 = vrot.slane %v8936_v0, 2 }
 0x510   : > { %4522 = vrot.lane.b32.xlu0 %v4251_v40, %s6101_s1  ;;  %4391 = vrot.lane.b32.xlu1 %v8858_v53, %s6095_s20  ;;  %v8954_v54 = vsel %vm1150_vm2, %v4371_v23, %v4373_v46  ;;  %v8957_v17 = vsel %vm905_vm1, %v4271_v37, %v4273_v5 }
 0x511   : > { %v8960_v25 = vsel %vm905_vm1, %v4267_v58, %v4269_v55  ;;  %v8963_v49 = vsel %vm905_vm1, %v4269_v55, %v4271_v37  ;;  %v8966_v35 = vsel %vm1150_vm2, %v4369_v52, %v4371_v23  ;;  %v8969_v13 = vsel %vm1150_vm2, %v4367_v10, %v4369_v52 }
 0x514   : > { %v8971_v7 = vpop.f32.mrb[44].mxu1  ;;  %4664 = vrot.lane.b32.xlu0 %v8841_v56, %s6097_s16  ;;  %4528 = vrot.lane.b32.xlu1 %v8861_v38, %s6101_s1 }
 0x515   : > { %v8977_v22 = vpop.f32.mrb[45].mxu1  ;;  %v4379_v63 = vrot.slane %v8971_v7, 2  ;;  %v4518_v11 = vrot.slane %v8971_v7, 1 }
 0x516   : > { %v8979_v27 = vpop.f32.mrb[46].mxu1  ;;  %v4375_v9 = vrot.slane %v8977_v22, 2  ;;  %v4275_v40 = vrot.slane %v8977_v22, 1 }
 0x517   : > { %v8990_v26 = vrot.slane %v8979_v27, 1  ;;  %v4591_v36 = vrot.slane %v8979_v27, 2  ;;  %v8993_v3 = vpop.f32.mrb[47].mxu1 }
 0x518   : > { %4385 = vrot.lane.b32.xlu0 %v4352_v32, %s6095_s20  ;;  %4738 = vrot.lane.b32.xlu1 %v8861_v38, %s6098_s19  ;;  %v8999_v41 = vsel %vm1150_vm2, %v4373_v46, %v4375_v9  ;;  %v9002_v44 = vsel %vm905_vm1, %v4273_v5, %v4275_v40  ;;  %v9005_v18 = vrot.slane %v8993_v3, 1  ;;  %v4377_v16 = vrot.slane %v8993_v3, 2 }
 0x519   : > { %v9010_v20 = vsel %vm905_vm1, %v4518_v11, %v8990_v26  ;;  %v9013_v8 = vsel %vm1150_vm2, %v4379_v63, %v4591_v36 }
 0x51a   : > { %v9017_v21 = vsel %vm905_vm1, %v4275_v40, %v9005_v18  ;;  %v9020_v43 = vsel %vm1150_vm2, %v4375_v9, %v4377_v16  ;;  %v9023_v10 = vsel %vm1150_vm2, %v4377_v16, %v4379_v63  ;;  %v9027_v58 = vsel %vm905_vm1, %v9005_v18, %v4518_v11 }
 0x51c   : > { %v9029_v23 = vpop.f32.mrb[48].mxu1  ;;  %4289 = vrot.lane.b32.xlu0 %v8861_v38, %s6094_s9  ;;  %4811 = vrot.lane.b32.xlu1 %v8858_v53, %s6100_s12 }
 0x51d   : > { %v9035_v46 = vpop.f32.mrb[49].mxu1 }
 0x51e   : > { %v4593_v37 = vrot.slane %v9035_v46, 2  ;;  %v4732_v5 = vrot.slane %v9035_v46, 1  ;;  %v5460_v55 = vpop.f32.mrb[50].mxu1 }
 0x520   : > { %4601 = vrot.lane.b32.xlu0 %v8858_v53, %s6099_s15  ;;  %4287 = vrot.lane.b32.xlu1 %v8864_v61, %s6094_s9  ;;  %v9046_v38 = vsel %vm1150_vm2, %v4591_v36, %v4593_v37  ;;  %v9052_v52 = vsel %vm905_vm1, %v8990_v26, %v4732_v5  ;;  %v4280_v53 = vpop.permute.xlu1 %4279 }
 0x521   : > { %9634 = vst [vmem:[#allocation28_spill] sm:$0xff] %v9052_v52 }
 0x524   : > { %4387 = vrot.lane.b32.xlu1 %v8868_v14, %s6095_s20  ;;  %4285 = vrot.lane.b32.xlu0 %v8871_v47, %s6094_s9 }
 0x528   : > { %4524 = vrot.lane.b32.xlu1 %v8871_v47, %s6101_s1  ;;  %4389 = vrot.lane.b32.xlu0 %v8874_v62, %s6095_s20 }
 0x52c   : > { %4599 = vrot.lane.b32.xlu1 %v8874_v62, %s6099_s15  ;;  %4526 = vrot.lane.b32.xlu0 %v8864_v61, %s6101_s1  ;;  %v4382_v61 = vpop.permute.xlu0 %4381 }
 0x530   : > { %4597 = vrot.lane.b32.xlu0 %v8868_v14, %s6099_s15  ;;  %4674 = vrot.lane.b32.xlu1 %v8876_v24, %s6097_s16  ;;  %v4451_v14 = vpop.permute.xlu1 %4450  ;;  %v4282_v47 = vpop.permute.xlu0 %4281 }
 0x534   : > { %4464 = vrot.lane.b32.xlu0 %v8876_v24, %s6096_s29  ;;  %4670 = vrot.lane.b32.xlu1 %v8882_v59, %s6097_s16  ;;  %v9126_v62 = vpop.permute.xlu1 %4383 }
 0x538   : > { %4460 = vrot.lane.b32.xlu0 %v8882_v59, %s6096_s29  ;;  %4466 = vrot.lane.b32.xlu1 %v8884_v39, %s6096_s29 }
 0x53c   : > { %4676 = vrot.lane.b32.xlu1 %v8884_v39, %s6097_s16  ;;  %4672 = vrot.lane.b32.xlu0 %v8888_v33, %s6097_s16 }
 0x540   : > { %4393 = vrot.lane.b32.xlu0 %v8895_v12, %s6095_s20  ;;  %4462 = vrot.lane.b32.xlu1 %v8888_v33, %s6096_s29 }
 0x544   : > { %4530 = vrot.lane.b32.xlu0 %v8898_v29, %s6101_s1  ;;  %4291 = vrot.lane.b32.xlu1 %v8898_v29, %s6094_s9 }
 0x548   : > { %4740 = vrot.lane.b32.xlu0 %v8898_v29, %s6098_s19  ;;  %4603 = vrot.lane.b32.xlu1 %v8895_v12, %s6099_s15 }
 0x54c   : > { %4813 = vrot.lane.b32.xlu0 %v8895_v12, %s6100_s12  ;;  %4399 = vrot.lane.b32.xlu1 %v8906_v6, %s6095_s20  ;;  %v9132_v12 = vpop.f32.mrb[51].mxu1 }
 0x550   : > { %4297 = vrot.lane.b32.xlu0 %v8909_v34, %s6094_s9  ;;  %4536 = vrot.lane.b32.xlu1 %v8909_v34, %s6101_s1 }
 0x554   : > { %4609 = vrot.lane.b32.xlu0 %v8906_v6, %s6099_s15  ;;  %4746 = vrot.lane.b32.xlu1 %v8909_v34, %s6098_s19 }
 0x558   : > { %4819 = vrot.lane.b32.xlu1 %v8906_v6, %s6100_s12  ;;  %4293 = vrot.lane.b32.xlu0 %v8912_v31, %s6094_s9 }
 0x55c   : > { %4295 = vrot.lane.b32.xlu1 %v8915_v15, %s6094_s9  ;;  %4397 = vrot.lane.b32.xlu0 %v8918_v57, %s6095_s20 }
 0x560   : > { %4395 = vrot.lane.b32.xlu1 %v8921_v45, %s6095_s20  ;;  %4534 = vrot.lane.b32.xlu0 %v8915_v15, %s6101_s1 }
 0x564   : > { %4532 = vrot.lane.b32.xlu1 %v8912_v31, %s6101_s1  ;;  %4605 = vrot.lane.b32.xlu0 %v8921_v45, %s6099_s15 }
 0x568   : > { %4607 = vrot.lane.b32.xlu1 %v8918_v57, %s6099_s15  ;;  %4742 = vrot.lane.b32.xlu0 %v8912_v31, %s6098_s19 }
 0x56c   : > { %4744 = vrot.lane.b32.xlu1 %v8915_v15, %s6098_s19  ;;  %4817 = vrot.lane.b32.xlu0 %v8918_v57, %s6100_s12  ;;  %v9558_v15 = vrot.slane %v9132_v12, 1 }
 0x56e   : > { %v9134_v29 = vpop.permute.xlu1 %4666  ;;  %v9136_v6 = vpop.permute.xlu0 %4456  ;;  %v9163_v9 = vsel %vm905_vm1, %v4732_v5, %v9558_v15  ;;  %v4807_v5 = vrot.slane %v9029_v23, 2 }
 0x56f   : > { %9635 = vst [vmem:[#allocation29_spill] sm:$0xff] %v9163_v9 }
 0x570   : > { %4815 = vrot.lane.b32.xlu1 %v8921_v45, %s6100_s12  ;;  %4472 = vrot.lane.b32.xlu0 %v8923_v48, %s6096_s29  ;;  %v4805_v45 = vrot.slane %v9132_v12, 2 }
 0x572   : > { %v4453_v34 = vpop.permute.xlu0 %4452  ;;  %v9142_v31 = vpop.permute.xlu1 %4458  ;;  %v9172_v11 = vsel %vm1150_vm2, %v4593_v37, %v4805_v45 }
 0x573   : > { %9636 = vst [vmem:[#allocation31_spill] sm:$0xff] %v9172_v11 }
 0x574   : > { %4682 = vrot.lane.b32.xlu1 %v8923_v48, %s6097_s16  ;;  %4468 = vrot.lane.b32.xlu0 %v8930_v2, %s6096_s29  ;;  %v4330_v48 = vadd.f32 %v4280_v53, %v8815_v51 }
 0x576   : > { %v9149_v57 = vpop.permute.xlu0 %4668  ;;  %v9151_v32 = vpop.permute.xlu1 %4454 }
 0x578   : > { %4678 = vrot.lane.b32.xlu1 %v8930_v2, %s6097_s16  ;;  %4684 = vrot.lane.b32.xlu0 %v8932_v50, %s6097_s16  ;;  %v9188_v2 = vsel %vm1150_vm2, %v4805_v45, %v4807_v5  ;;  %v4432_v5 = vadd.f32 %v4382_v61, %v4330_v48  ;;  %v4331_v61 = vadd.f32 %v8807_v42, %v4282_v47 }
 0x579   : > { %9637 = vst [vmem:[#allocation30_spill] sm:$0xff] %v9188_v2 }
 0x57a   : > { %v4737_v40 = vpop.permute.xlu0 %4736  ;;  %v4596_v63 = vpop.permute.xlu1 %4595  ;;  %v4501_v51 = vadd.f32 %v4451_v14, %v4432_v5 }
 0x57c   : > { %4474 = vrot.lane.b32.xlu1 %v8932_v50, %s6096_s29  ;;  %4680 = vrot.lane.b32.xlu0 %v8936_v0, %s6097_s16 }
 0x57e   : > { %v4810_v36 = vpop.permute.xlu0 %4809  ;;  %v4284_v16 = vpop.permute.xlu1 %4283 }
 0x580   : > { %4401 = vrot.lane.b32.xlu0 %v8943_v30, %s6095_s20  ;;  %4470 = vrot.lane.b32.xlu1 %v8936_v0, %s6096_s29 }
 0x582   : > { %v4523_v55 = vpop.permute.xlu0 %4522  ;;  %v9179_v15 = vpop.permute.xlu1 %4391 }
 0x584   : > { %4538 = vrot.lane.b32.xlu0 %v8946_v4, %s6101_s1  ;;  %4299 = vrot.lane.b32.xlu1 %v8946_v4, %s6094_s9 }
 0x586   : > { %v4665_v37 = vpop.permute.xlu0 %4664  ;;  %v9185_v50 = vpop.permute.xlu1 %4528 }
 0x588   : > { %4748 = vrot.lane.b32.xlu0 %v8946_v4, %s6098_s19  ;;  %4611 = vrot.lane.b32.xlu1 %v8943_v30, %s6099_s15 }
 0x58a   : > { %v4386_v23 = vpop.permute.xlu0 %4385  ;;  %v4739_v0 = vpop.permute.xlu1 %4738 }
 0x58c   : > { %4821 = vrot.lane.b32.xlu0 %v8943_v30, %s6100_s12  ;;  %4407 = vrot.lane.b32.xlu1 %v8954_v54, %s6095_s20  ;;  %v4573_v30 = vadd.f32 %v4523_v55, %v4501_v51 }
 0x58e   : > { %v9199_v11 = vpop.permute.xlu0 %4289  ;;  %v4812_v45 = vpop.permute.xlu1 %4811  ;;  %v4646_v14 = vadd.f32 %v4596_v63, %v4573_v30 }
 0x590   : > { %4305 = vrot.lane.b32.xlu0 %v8957_v17, %s6094_s9  ;;  %4544 = vrot.lane.b32.xlu1 %v8957_v17, %s6101_s1  ;;  %v4715_v55 = vadd.f32 %v4665_v37, %v4646_v14  ;;  %v9236_v37 = vld [vmem:[#allocation16] ss:$0 sm:$0xff] }
 0x592   : > { %v9205_v4 = vpop.permute.xlu0 %4601  ;;  %v4288_v2 = vpop.permute.xlu1 %4287  ;;  %v4787_v42 = vadd.f32 %v4737_v40, %v4715_v55 }
 0x594   : > { %4617 = vrot.lane.b32.xlu0 %v8954_v54, %s6099_s15  ;;  %4754 = vrot.lane.b32.xlu1 %v8957_v17, %s6098_s19  ;;  %v4433_v17 = vadd.f32 %v9126_v62, %v4331_v61  ;;  %v4860_v62 = vadd.f32 %v4810_v36, %v4787_v42 }
 0x596   : > { %v9211_v53 = vpop.permute.xlu1 %4387  ;;  %v9213_v48 = vpop.permute.xlu0 %4285 }
 0x598   : > { %4827 = vrot.lane.b32.xlu1 %v8954_v54, %s6100_s12  ;;  %4301 = vrot.lane.b32.xlu0 %v8960_v25, %s6094_s9  ;;  %v4502_v54 = vadd.f32 %v4453_v34, %v4433_v17  ;;  %v4884_v17 = vadd.f32 %v9236_v37, %v4860_v62 }
 0x59a   : > { %v4525_v5 = vpop.permute.xlu1 %4524  ;;  %v4390_v9 = vpop.permute.xlu0 %4389 }
 0x59b   : > { %v4574_v47 = vadd.f32 %v4525_v5, %v4502_v54  ;;  %v4332_v5 = vadd.f32 %v8811_v19, %v4284_v16 }
 0x59c   : > { %4303 = vrot.lane.b32.xlu1 %v8963_v49, %s6094_s9  ;;  %4405 = vrot.lane.b32.xlu0 %v8966_v35, %s6095_s20 }
 0x59e   : > { %v4600_v51 = vpop.permute.xlu1 %4599  ;;  %v4527_v39 = vpop.permute.xlu0 %4526 }
 0x5a0   : > { %4403 = vrot.lane.b32.xlu1 %v8969_v13, %s6095_s20  ;;  %4542 = vrot.lane.b32.xlu0 %v8963_v49, %s6101_s1 }
 0x5a2   : > { %v4598_v63 = vpop.permute.xlu0 %4597  ;;  %v9229_v30 = vpop.permute.xlu1 %4674 }
 0x5a3   : > { %v4647_v52 = vadd.f32 %v4598_v63, %v4574_v47 }
 0x5a4   : > { %4540 = vrot.lane.b32.xlu1 %v8960_v25, %s6101_s1  ;;  %4613 = vrot.lane.b32.xlu0 %v8969_v13, %s6099_s15 }
 0x5a5   : > { %v4716_v34 = vadd.f32 %v9134_v29, %v4647_v52  ;;  %v4434_v29 = vadd.f32 %v4386_v23, %v4332_v5 }
 0x5a6   : > { %v9238_v61 = vpop.permute.xlu0 %4464  ;;  %v9240_v14 = vpop.permute.xlu1 %4670 }
 0x5a7   : > { %v4788_v40 = vadd.f32 %v4739_v0, %v4716_v34  ;;  %v4919_v0 = vrot.slane %v4884_v17, 7  ;;  %v4503_v42 = vadd.f32 %v9151_v32, %v4434_v29 }
 0x5a8   : > { %4615 = vrot.lane.b32.xlu1 %v8966_v35, %s6099_s15  ;;  %4752 = vrot.lane.b32.xlu0 %v8963_v49, %s6098_s19 }
 0x5a9   : > { %v4861_v36 = vadd.f32 %v4812_v45, %v4788_v40  ;;  %v4334_v45 = vadd.f32 %v4288_v2, %v8841_v56 }
 0x5aa   : > { %v9248_v55 = vpop.permute.xlu0 %4460  ;;  %v9250_v52 = vpop.permute.xlu1 %4466 }
 0x5ab   : > { %v4885_v54 = vadd.f32 %v9236_v37, %v4861_v36 }
 0x5ac   : > { %4750 = vrot.lane.b32.xlu1 %v8960_v25, %s6098_s19  ;;  %4825 = vrot.lane.b32.xlu0 %v8966_v35, %s6100_s12  ;;  %v4436_v25 = vadd.f32 %v4390_v9, %v4334_v45  ;;  %v4575_v35 = vadd.f32 %v4527_v39, %v4503_v42 }
 0x5ad   : > { %v4920_v49 = vrot.slane %v4885_v54, 7 }
 0x5ae   : > { %v9257_v19 = vpop.permute.xlu1 %4676  ;;  %v9259_v16 = vpop.permute.xlu0 %4672  ;;  %v4648_v56 = vadd.f32 %v4600_v51, %v4575_v35  ;;  %v4505_v2 = vadd.f32 %v9142_v31, %v4436_v25 }
 0x5af   : > { %v4921_v23 = vsel %vm4918_vm6, %v4919_v0, %v4920_v49 }
 0x5b0   : > { %4823 = vrot.lane.b32.xlu1 %v8969_v13, %s6100_s12  ;;  %4480 = vrot.lane.b32.xlu0 %v8971_v7, %s6096_s29 }
 0x5b2   : > { %v4394_v47 = vpop.permute.xlu0 %4393  ;;  %v4463_v63 = vpop.permute.xlu1 %4462 }
 0x5b4   : > { %4690 = vrot.lane.b32.xlu1 %v8971_v7, %s6097_s16  ;;  %4476 = vrot.lane.b32.xlu0 %v8977_v22, %s6096_s29  ;;  %v4717_v7 = vadd.f32 %v9149_v57, %v4648_v56  ;;  %v4333_v56 = vadd.f32 %v9213_v48, %v8837_v60  ;;  %v4335_v48 = vadd.f32 %v8831_v28, %v9199_v11 }
 0x5b6   : > { %v4531_v32 = vpop.permute.xlu0 %4530  ;;  %v4292_v62 = vpop.permute.xlu1 %4291 }
 0x5b7   : > { %v4577_v34 = vadd.f32 %v4531_v32, %v4505_v2  ;;  %v4336_v13 = vadd.f32 %v8839_v1, %v4292_v62  ;;  %v4435_v32 = vadd.f32 %v9211_v53, %v4333_v56 }
 0x5b8   : > { %4686 = vrot.lane.b32.xlu1 %v8977_v22, %s6097_s16  ;;  %4692 = vrot.lane.b32.xlu0 %v8979_v27, %s6097_s16 }
 0x5b9   : > { %v4438_v39 = vadd.f32 %v4394_v47, %v4336_v13  ;;  %v4437_v13 = vadd.f32 %v9179_v15, %v4335_v48 }
 0x5ba   : > { %v4741_v9 = vpop.permute.xlu0 %4740  ;;  %v4604_v40 = vpop.permute.xlu1 %4603 }
 0x5bb   : > { %v4789_v5 = vadd.f32 %v4741_v9, %v4717_v7  ;;  %v9279_v51 = vadd.f32 %v4604_v40, %v4577_v34  ;;  %v4507_v31 = vadd.f32 %v4463_v63, %v4438_v39  ;;  %v4952_v63 = vrot.slane %v4921_v23, 1 }
 0x5bc   : > { %4482 = vrot.lane.b32.xlu1 %v8979_v27, %s6096_s29  ;;  %4688 = vrot.lane.b32.xlu0 %v8993_v3, %s6097_s16  ;;  %v4504_v23 = vadd.f32 %v9136_v6, %v4435_v32 }
 0x5be   : > { %v4814_v1 = vpop.permute.xlu0 %4813  ;;  %v4400_v17 = vpop.permute.xlu1 %4399 }
 0x5bf   : > { %v4862_v36 = vadd.f32 %v4814_v1, %v4789_v5 }
 0x5c0   : > { %4409 = vrot.lane.b32.xlu0 %v8999_v41, %s6095_s20  ;;  %4478 = vrot.lane.b32.xlu1 %v8993_v3, %s6096_s29  ;;  %s6000_s29 = scalar_lea.vmem %s9485_s18, 32 }
 0x5c1   : > { %v9290_v57 = vadd.f32 %v9236_v37, %v4862_v36  ;;  %p6001_p0 = scmp.ne.s32.totalorder %s9485_s18, %s6000_s29 }
 0x5c2   : > { %v4298_v29 = vpop.permute.xlu0 %4297  ;;  %v4537_v54 = vpop.permute.xlu1 %4536 }
 0x5c3   : > { %v4922_v0 = vrot.slane %v9290_v57, 7  ;;  %v4339_v27 = vadd.f32 %v8876_v24, %v4298_v29  ;;  %p6002_p10 = pnand %p6001_p0, %p9648_p5 }
 0x5c4   : > { %4546 = vrot.lane.b32.xlu0 %v9002_v44, %s6101_s1  ;;  %4307 = vrot.lane.b32.xlu1 %v9002_v44, %s6094_s9 }
 0x5c5   : > { %v4923_v45 = vsel %vm4918_vm6, %v4920_v49, %v4922_v0  ;;  %v9301_v42 = vadd.f32 %v4400_v17, %v4339_v27  ;;  %p6003_p1 = pneg %p6002_p10 }
 0x5c6   : > { %v4953_v25 = vrot.slane %v4923_v45, 1  ;;  %v4610_v35 = vpop.permute.xlu0 %4609  ;;  %v4747_v47 = vpop.permute.xlu1 %4746 }
 0x5c8   : > { %4554 = vrot.lane.b32.xlu0 %v8990_v26, %s6101_s1  ;;  %4619 = vrot.lane.b32.xlu1 %v8999_v41, %s6099_s15  ;;  %v9310_v24 = vsel %vm905_vm1, %v4952_v63, %v4953_v25 }
 0x5ca   : > { %v4820_v2 = vpop.permute.xlu1 %4819  ;;  %v4294_v49 = vpop.permute.xlu0 %4293 }
 0x5cb   : > { %v4337_v62 = vadd.f32 %v4294_v49, %v8882_v59 }
 0x5cc   : > { %4756 = vrot.lane.b32.xlu0 %v9002_v44, %s6098_s19  ;;  %4311 = vrot.lane.b32.xlu1 %v9005_v18, %s6094_s9  ;;  %v4576_v18 = vadd.f32 %v9185_v50, %v4504_v23 }
 0x5ce   : > { %v4296_v60 = vpop.permute.xlu1 %4295  ;;  %v4398_v26 = vpop.permute.xlu0 %4397  ;;  %v4649_v7 = vadd.f32 %v9205_v4, %v4576_v18  ;;  %v4719_v4 = vadd.f32 %v9259_v16, %v9279_v51 }
 0x5cf   : > { %v4338_v34 = vadd.f32 %v4296_v60, %v8888_v33  ;;  %v4506_v33 = vadd.f32 %v9248_v55, %v4437_v13 }
 0x5d0   : > { %4829 = vrot.lane.b32.xlu0 %v8999_v41, %s6100_s12  ;;  %4552 = vrot.lane.b32.xlu1 %v9010_v20, %s6101_s1  ;;  %v4718_v15 = vadd.f32 %v9240_v14, %v4649_v7 }
 0x5d1   : > { %v9326_v59 = vadd.f32 %v4398_v26, %v4338_v34 }
 0x5d2   : > { %v4396_v44 = vpop.permute.xlu1 %4395  ;;  %v4535_v53 = vpop.permute.xlu0 %4534 }
 0x5d3   : > { %v4439_v39 = vadd.f32 %v4396_v44, %v4337_v62  ;;  %v4579_v28 = vadd.f32 %v4535_v53, %v4507_v31  ;;  %v9639_v53 = vld [vmem:[#allocation23_spill] sm:$0xff] }
 0x5d4   : > { %4625 = vrot.lane.b32.xlu0 %v9013_v8, %s6099_s15  ;;  %4762 = vrot.lane.b32.xlu1 %v9010_v20, %s6098_s19 }
 0x5d5   : > { %v4508_v41 = vadd.f32 %v9238_v61, %v4439_v39 }
 0x5d6   : > { %v4533_v6 = vpop.permute.xlu1 %4532  ;;  %v4606_v11 = vpop.permute.xlu0 %4605 }
 0x5d7   : > { %v4578_v9 = vadd.f32 %v4533_v6, %v4506_v33  ;;  %v4580_v50 = vadd.f32 %v4537_v54, %v4508_v41  ;;  %v9641_v6 = vrot.slane %v9132_v12, 1 }
 0x5d8   : > { %4835 = vrot.lane.b32.xlu1 %v9013_v8, %s6100_s12  ;;  %4309 = vrot.lane.b32.xlu0 %v9017_v21, %s6094_s9  ;;  %s9483_s9 = scalar_lea.hbm %s9534_s7, %s5234_s13 }
 0x5d9   : > { %v4651_v40 = vadd.f32 %v4606_v11, %v4578_v9  ;;  %v9342_v20 = vadd.f32 %v4610_v35, %v4580_v50  ;;  %v9642_v11 = vld [vmem:[#allocation31_spill] sm:$0xff] }
 0x5da   : > { %v4608_v55 = vpop.permute.xlu1 %4607  ;;  %v4743_v5 = vpop.permute.xlu0 %4742 }
 0x5db   : > { %v4720_v61 = vadd.f32 %v9229_v30, %v4651_v40  ;;  %v4652_v31 = vadd.f32 %v4608_v55, %v4579_v28  ;;  %v4790_v1 = vadd.f32 %v4743_v5, %v4718_v15  ;;  %v9643_v15 = vld [vmem:[#allocation30_spill] sm:$0xff] }
 0x5dc   : > { %4411 = vrot.lane.b32.xlu1 %v9020_v43, %s6095_s20  ;;  %4413 = vrot.lane.b32.xlu0 %v9023_v10, %s6095_s20  ;;  %s5019_s20 = scalar_lea.sflag [#allocation7], %s6394_s17 }
 0x5dd   : > { %v4792_v8 = vadd.f32 %v4747_v47, %v4720_v61  ;;  %v4721_v33 = vadd.f32 %v9257_v19, %v4652_v31  ;;  %v9644_v61 = vld [vmem:[#allocation25_spill] sm:$0xff] }
 0x5de   : > { %v4745_v14 = vpop.permute.xlu1 %4744  ;;  %v4818_v17 = vpop.permute.xlu0 %4817 }
 0x5df   : > { %v4865_v36 = vadd.f32 %v4820_v2, %v4792_v8  ;;  %v4791_v29 = vadd.f32 %v4745_v14, %v4719_v4 }
 0x5e0   : > { %4548 = vrot.lane.b32.xlu1 %v9017_v21, %s6101_s1  ;;  %4550 = vrot.lane.b32.xlu0 %v9027_v58, %s6101_s1 }
 0x5e1   : > { %v4889_v30 = vadd.f32 %v9236_v37, %v4865_v36  ;;  %v4864_v54 = vadd.f32 %v4818_v17, %v4791_v29 }
 0x5e2   : > { %v4816_v27 = vpop.permute.xlu1 %4815  ;;  %v9356_v45 = vpop.permute.xlu0 %4472 }
 0x5e3   : > { %v4888_v25 = vadd.f32 %v9236_v37, %v4864_v54  ;;  %v4863_v35 = vadd.f32 %v4816_v27, %v4790_v1  ;;  %v4928_v16 = vrot.slane %v4889_v30, 7  ;;  %v9645_v54 = vld [vmem:[#allocation24_spill] sm:$0xff] }
 0x5e4   : > { %4623 = vrot.lane.b32.xlu1 %v9023_v10, %s6099_s15  ;;  %4621 = vrot.lane.b32.xlu0 %v9020_v43, %s6099_s15 }
 0x5e5   : > { %v4926_v51 = vrot.slane %v4888_v25, 7  ;;  %v4887_v47 = vadd.f32 %v9236_v37, %v4863_v35 }
 0x5e6   : > { %v9364_v63 = vpop.permute.xlu1 %4682  ;;  %v4469_v56 = vpop.permute.xlu0 %4468 }
 0x5e7   : > { %v4929_v2 = vsel %vm4918_vm6, %v4926_v51, %v4928_v16  ;;  %v4924_v49 = vrot.slane %v4887_v47, 7  ;;  %v9368_v32 = vadd.f32 %v4469_v56, %v9301_v42 }
 0x5e8   : > { %4758 = vrot.lane.b32.xlu1 %v9017_v21, %s6098_s19  ;;  %4760 = vrot.lane.b32.xlu0 %v9027_v58, %s6098_s19  ;;  %v4958_v8 = vrot.slane %v4929_v2, 1 }
 0x5e9   : > { %v4925_v62 = vsel %vm4918_vm6, %v4922_v0, %v4924_v49  ;;  %v4927_v60 = vsel %vm4918_vm6, %v4924_v49, %v4926_v51  ;;  %v9646_v51 = vld [vmem:[#allocation27_spill] sm:$0xff] }
 0x5ea   : > { %v4955_v26 = vrot.slane %v4925_v62, 1  ;;  %v4956_v48 = vrot.slane %v4927_v60, 1  ;;  %v9378_v23 = vpop.permute.xlu1 %4678  ;;  %v9380_v34 = vpop.permute.xlu0 %4684 }
 0x5ec   : > { %4831 = vrot.lane.b32.xlu1 %v9020_v43, %s6100_s12  ;;  %4833 = vrot.lane.b32.xlu0 %v9023_v10, %s6100_s12  ;;  %v9387_v21 = vsel %vm905_vm1, %v4955_v26, %v4956_v48  ;;  %v9638_v43 = vld [vmem:[#allocation28_spill] sm:$0xff] }
 0x5ee   : > { %v4475_v58 = vpop.permute.xlu1 %4474  ;;  %v4681_v57 = vpop.permute.xlu0 %4680 }
 0x5f0   : > { %4694 = vrot.lane.b32.xlu1 %v9035_v46, %s6097_s16  ;;  %4696 = vrot.lane.b32.xlu0 %v9132_v12, %s6097_s16  ;;  %v9640_v46 = vld [vmem:[#allocation29_spill] sm:$0xff]  ;;  %s6004_s16 = sshll.u32 %s6102_s30, 4  ;;  %s6005_s16 = int_to_ptr.vmem [resolvable:$false] %s6004_s16 }
 0x5f1   : > { %p6007_p11 = scmp.lt.s32.totalorder %s9485_s18, %s6005_s16 }
 0x5f2   : > { %v4402_v0 = vpop.permute.xlu0 %4401  ;;  %v4471_v42 = vpop.permute.xlu1 %4470 }
 0x5f4   : > { %4627 = vrot.lane.b32.xlu1 %v9046_v38, %s6099_s15  ;;  %4764 = vrot.lane.b32.xlu0 %v9638_v43, %s6098_s19 }
 0x5f6   : > { %v4539_v10 = vpop.permute.xlu0 %4538  ;;  %v4300_v44 = vpop.permute.xlu1 %4299 }
 0x5f7   : > { %v4340_v18 = vadd.f32 %v9639_v53, %v4300_v44 }
 0x5f8   : > { %4837 = vrot.lane.b32.xlu0 %v9046_v38, %s6100_s12  ;;  %4766 = vrot.lane.b32.xlu1 %v9640_v46, %s6098_s19 }
 0x5f9   : > { %v4442_v13 = vadd.f32 %v4402_v0, %v4340_v18 }
 0x5fa   : > { %v4749_v39 = vpop.permute.xlu0 %4748  ;;  %v4612_v28 = vpop.permute.xlu1 %4611 }
 0x5fb   : > { %v4511_v41 = vadd.f32 %v4471_v42, %v4442_v13  ;;  %v4793_v7 = vadd.f32 %v4749_v39, %v4721_v33 }
 0x5fc   : > { %4768 = vrot.lane.b32.xlu0 %v9641_v6, %s6098_s19  ;;  %4839 = vrot.lane.b32.xlu1 %v9642_v11, %s6100_s12  ;;  %s6006_s19 = scalar_lea.vmem %s6005_s16, 64 }
 0x5fd   : > { %p6008_p12 = scmp.lt.s32.totalorder %s6006_s19, %s6000_s29 }
 0x5fe   : > { %v4822_v9 = vpop.permute.xlu0 %4821  ;;  %v4408_v50 = vpop.permute.xlu1 %4407 }
 0x5ff   : > { %v4866_v38 = vadd.f32 %v4822_v9, %v4793_v7  ;;  %p6009_p13 = por %p6008_p12, %p6007_p11 }
 0x600   : > { %4841 = vrot.lane.b32.xlu0 %v9643_v15, %s6100_s12 }
 0x601   : > { %v9411_v40 = vadd.f32 %v9236_v37, %v4866_v38  ;;  %p6010_p8 = pnand %p6009_p13, %p6003_p1 }
 0x602   : > { %v4306_v55 = vpop.permute.xlu0 %4305  ;;  %v4545_v19 = vpop.permute.xlu1 %4544 }
 0x603   : > { %v4930_v5 = vrot.slane %v9411_v40, 7  ;;  %v4343_v12 = vadd.f32 %v9644_v61, %v4306_v55 }
 0x605   : > { %v4931_v31 = vsel %vm4918_vm6, %v4928_v16, %v4930_v5  ;;  %v9416_v1 = vadd.f32 %v4408_v50, %v4343_v12  ;;  %v4509_v16 = vadd.f32 %v9250_v52, %v9326_v59 }
 0x606   : > { %v4959_v4 = vrot.slane %v4931_v31, 1  ;;  %v4618_v14 = vpop.permute.xlu0 %4617  ;;  %v4755_v17 = vpop.permute.xlu1 %4754 }
 0x607   : > { %v4581_v26 = vadd.f32 %v4539_v10, %v4509_v16 }
 0x608   : > { %v4960_v36 = vsel %vm905_vm1, %v4958_v8, %v4959_v4 }
 0x609   : > { %v4654_v43 = vadd.f32 %v4612_v28, %v4581_v26 }
 0x60a   : > { %v4828_v29 = vpop.permute.xlu1 %4827  ;;  %v4302_v30 = vpop.permute.xlu0 %4301 }
 0x60b   : > { %v4341_v27 = vadd.f32 %v4302_v30, %v9645_v54 }
 0x60e   : > { %v4304_v25 = vpop.permute.xlu1 %4303  ;;  %v4406_v35 = vpop.permute.xlu0 %4405 }
 0x60f   : > { %v4342_v47 = vadd.f32 %v4304_v25, %v9646_v51 }
 0x611   : > { %v4444_v56 = vadd.f32 %v4406_v35, %v4342_v47 }
 0x612   : > { %v4404_v49 = vpop.permute.xlu1 %4403  ;;  %v4543_v62 = vpop.permute.xlu0 %4542 }
 0x613   : > { %v4443_v2 = vadd.f32 %v4404_v49, %v4341_v27  ;;  %v9423_v60 = vadd.f32 %v4475_v58, %v4444_v56  ;;  %v4583_v18 = vadd.f32 %v4543_v62, %v4511_v41  ;;  %v4723_v58 = vadd.f32 %v4681_v57, %v4654_v43 }
 0x615   : > { %v4512_v48 = vadd.f32 %v9356_v45, %v4443_v2 }
 0x616   : > { %v4541_v0 = vpop.permute.xlu1 %4540  ;;  %v4614_v42 = vpop.permute.xlu0 %4613 }
 0x617   : > { %v4582_v44 = vadd.f32 %v4541_v0, %v9368_v32  ;;  %v4584_v53 = vadd.f32 %v4545_v19, %v4512_v48  ;;  %v4722_v32 = vadd.f32 %v9378_v23, %v9342_v20 }
 0x619   : > { %v4655_v46 = vadd.f32 %v4614_v42, %v4582_v44  ;;  %v9427_v13 = vadd.f32 %v4618_v14, %v4584_v53 }
 0x61a   : > { %v4616_v39 = vpop.permute.xlu1 %4615  ;;  %v4753_v33 = vpop.permute.xlu0 %4752 }
 0x61b   : > { %v4724_v52 = vadd.f32 %v9364_v63, %v4655_v46  ;;  %v4656_v59 = vadd.f32 %v4616_v39, %v4583_v18  ;;  %v4795_v10 = vadd.f32 %v4753_v33, %v4723_v58 }
 0x61d   : > { %v4796_v6 = vadd.f32 %v4755_v17, %v4724_v52  ;;  %v4725_v45 = vadd.f32 %v9380_v34, %v4656_v59 }
 0x61e   : > { %v4751_v11 = vpop.permute.xlu1 %4750  ;;  %v4826_v7 = vpop.permute.xlu0 %4825 }
 0x61f   : > { %v4869_v28 = vadd.f32 %v4828_v29, %v4796_v6  ;;  %v4868_v41 = vadd.f32 %v4826_v7, %v4795_v10  ;;  %v4794_v50 = vadd.f32 %v4751_v11, %v4722_v32 }
 0x621   : > { %v4893_v9 = vadd.f32 %v9236_v37, %v4869_v28  ;;  %v4892_v38 = vadd.f32 %v9236_v37, %v4868_v41  ;;  %v9647_v28 = vld [vmem:[#allocation26_spill] sm:$0xff] }
 0x622   : > { %v4824_v15 = vpop.permute.xlu1 %4823  ;;  %v4481_v63 = vpop.permute.xlu0 %4480 }
 0x623   : > { %v4936_v40 = vrot.slane %v4893_v9, 7  ;;  %v4934_v57 = vrot.slane %v4892_v38, 7  ;;  %v4867_v55 = vadd.f32 %v4824_v15, %v4794_v50 }
 0x625   : > { %v4937_v19 = vsel %vm4918_vm6, %v4934_v57, %v4936_v40  ;;  %v4891_v34 = vadd.f32 %v9236_v37, %v4867_v55  ;;  %4984 = vxpose.xlu1.b32.start [1/8] (short) (narrow) %v9310_v24, 8 }
 0x626   : > { %v4691_v61 = vpop.permute.xlu1 %4690  ;;  %v4477_v20 = vpop.permute.xlu0 %4476  ;;  %v4964_v42 = vrot.slane %v4937_v19, 1 }
 0x627   : > { %v4932_v23 = vrot.slane %v4891_v34, 7  ;;  %v4514_v10 = vadd.f32 %v4477_v20, %v9416_v1 }
 0x629   : > { %v4933_v12 = vsel %vm4918_vm6, %v4930_v5, %v4932_v23  ;;  %v4935_v31 = vsel %vm4918_vm6, %v4932_v23, %v4934_v57  ;;  %4985 = vxpose.xlu1.b32.cont [2/8] (short) (narrow) %v9387_v21, 8 }
 0x62a   : > { %v4961_v8 = vrot.slane %v4933_v12, 1  ;;  %v4962_v4 = vrot.slane %v4935_v31, 1  ;;  %v4687_v14 = vpop.permute.xlu1 %4686  ;;  %v9441_v17 = vpop.permute.xlu0 %4692 }
 0x62c   : > { %v4963_v29 = vsel %vm905_vm1, %v4961_v8, %v4962_v4 }
 0x62d   : > { %4986 = vxpose.xlu1.b32.cont [3/8] (short) (narrow) %v4960_v36, 8 }
 0x62e   : > { %v9444_v30 = vpop.permute.xlu1 %4482  ;;  %v4689_v24 = vpop.permute.xlu0 %4688 }
 0x631   : > { %4987 = vxpose.xlu1.b32.cont [4/8] (short) (narrow) %v4963_v29, 8 }
 0x632   : > { %v4410_v54 = vpop.permute.xlu0 %4409  ;;  %v4479_v27 = vpop.permute.xlu1 %4478 }
 0x636   : > { %v4547_v25 = vpop.permute.xlu0 %4546  ;;  %v4308_v5 = vpop.permute.xlu1 %4307 }
 0x637   : > { %v4344_v41 = vadd.f32 %v9647_v28, %v4308_v5 }
 0x639   : > { %v4446_v57 = vadd.f32 %v4410_v54, %v4344_v41 }
 0x63a   : > { %v9446_v35 = vpop.permute.xlu0 %4554  ;;  %v4620_v51 = vpop.permute.xlu1 %4619 }
 0x63b   : > { %v4515_v12 = vadd.f32 %v4479_v27, %v4446_v57 }
 0x63e   : > { %v4757_v21 = vpop.permute.xlu0 %4756  ;;  %v4312_v47 = vpop.permute.xlu1 %4311 }
 0x63f   : > { %v4797_v56 = vadd.f32 %v4757_v21, %v4725_v45  ;;  %v4585_v45 = vadd.f32 %v4547_v25, %v9423_v60  ;;  %v4346_v60 = vadd.f32 %v4312_v47, %v8993_v3 }
 0x641   : > { %v4658_v9 = vadd.f32 %v4620_v51, %v4585_v45 }
 0x642   : > { %v4830_v49 = vpop.permute.xlu0 %4829  ;;  %v4553_v62 = vpop.permute.xlu1 %4552 }
 0x643   : > { %v4870_v16 = vadd.f32 %v4830_v49, %v4797_v56  ;;  %v4727_v55 = vadd.f32 %v4689_v24, %v4658_v9 }
 0x645   : > { %v4894_v2 = vadd.f32 %v9236_v37, %v4870_v16 }
 0x646   : > { %v9449_v36 = vpop.permute.xlu0 %4625  ;;  %v4763_v26 = vpop.permute.xlu1 %4762 }
 0x647   : > { %v4938_v48 = vrot.slane %v4894_v2, 7 }
 0x649   : > { %v4939_v0 = vsel %vm4918_vm6, %v4936_v40, %v4938_v48  ;;  %v4726_v40 = vadd.f32 %v4687_v14, %v9427_v13 }
 0x64a   : > { %v4965_v43 = vrot.slane %v4939_v0, 1  ;;  %v4836_v44 = vpop.permute.xlu1 %4835  ;;  %v4310_v53 = vpop.permute.xlu0 %4309 }
 0x64b   : > { %v4345_v46 = vadd.f32 %v4310_v53, %v8977_v22 }
 0x64c   : > { %v4966_v18 = vsel %vm905_vm1, %v4964_v42, %v4965_v43 }
 0x64d   : > { %4988 = vxpose.xlu1.b32.cont [5/8] (short) (narrow) %v4966_v18, 8 }
 0x64e   : > { %v4412_v39 = vpop.permute.xlu1 %4411  ;;  %v4414_v33 = vpop.permute.xlu0 %4413 }
 0x64f   : > { %v4447_v52 = vadd.f32 %v4412_v39, %v4345_v46 }
 0x651   : > { %v4516_v59 = vadd.f32 %v4481_v63, %v4447_v52 }
 0x652   : > { %v4549_v58 = vpop.permute.xlu1 %4548  ;;  %v4551_v6 = vpop.permute.xlu0 %4550 }
 0x653   : > { %v4586_v11 = vadd.f32 %v4549_v58, %v4514_v10  ;;  %v4587_v29 = vadd.f32 %v4551_v6, %v4515_v12  ;;  %v4588_v49 = vadd.f32 %v4553_v62, %v4516_v59 }
 0x656   : > { %v4624_v7 = vpop.permute.xlu1 %4623  ;;  %v4622_v32 = vpop.permute.xlu0 %4621 }
 0x657   : > { %v4659_v50 = vadd.f32 %v4622_v32, %v4586_v11  ;;  %v4660_v54 = vadd.f32 %v4624_v7, %v4587_v29 }
 0x659   : > { %v4728_v38 = vadd.f32 %v4691_v61, %v4659_v50  ;;  %v4448_v61 = vadd.f32 %v4414_v33, %v4346_v60  ;;  %v4729_v42 = vadd.f32 %v9441_v17, %v4660_v54 }
 0x65a   : > { %v4759_v22 = vpop.permute.xlu1 %4758  ;;  %v4761_v15 = vpop.permute.xlu0 %4760 }
 0x65b   : > { %v4800_v63 = vadd.f32 %v4763_v26, %v4728_v38  ;;  %v4798_v34 = vadd.f32 %v4759_v22, %v4726_v40  ;;  %v4799_v1 = vadd.f32 %v4761_v15, %v4727_v55  ;;  %v4517_v3 = vadd.f32 %v9444_v30, %v4448_v61 }
 0x65d   : > { %v4873_v19 = vadd.f32 %v4836_v44, %v4800_v63  ;;  %v4661_v44 = vadd.f32 %v9449_v36, %v4588_v49  ;;  %v4589_v53 = vadd.f32 %v9446_v35, %v4517_v3 }
 0x65e   : > { %v4832_v20 = vpop.permute.xlu1 %4831  ;;  %v4834_v23 = vpop.permute.xlu0 %4833 }
 0x65f   : > { %v4897_v31 = vadd.f32 %v9236_v37, %v4873_v19  ;;  %v4871_v8 = vadd.f32 %v4832_v20, %v4798_v34  ;;  %v4872_v4 = vadd.f32 %v4834_v23, %v4799_v1 }
 0x661   : > { %v4895_v25 = vadd.f32 %v9236_v37, %v4871_v8  ;;  %v4896_v13 = vadd.f32 %v9236_v37, %v4872_v4  ;;  %v4944_v5 = vrot.slane %v4897_v31, 7 }
 0x662   : > { %v4695_v14 = vpop.permute.xlu1 %4694  ;;  %v4697_v24 = vpop.permute.xlu0 %4696 }
 0x663   : > { %v4940_v51 = vrot.slane %v4895_v25, 7  ;;  %v4942_v21 = vrot.slane %v4896_v13, 7  ;;  %v4730_v46 = vadd.f32 %v4695_v14, %v4661_v44 }
 0x665   : > { %v4941_v27 = vsel %vm4918_vm6, %v4938_v48, %v4940_v51  ;;  %v4943_v47 = vsel %vm4918_vm6, %v4940_v51, %v4942_v21  ;;  %v4945_v56 = vsel %vm4918_vm6, %v4942_v21, %v4944_v5 }
 0x666   : > { %v4967_v16 = vrot.slane %v4941_v27, 1  ;;  %v4968_v2 = vrot.slane %v4943_v47, 1  ;;  %v4628_v26 = vpop.permute.xlu1 %4627  ;;  %v4765_v0 = vpop.permute.xlu0 %4764  ;;  %v4970_v11 = vrot.slane %v4945_v56, 1 }
 0x667   : > { %v4801_v30 = vadd.f32 %v4765_v0, %v4729_v42  ;;  %v4662_v39 = vadd.f32 %v4628_v26, %v4589_v53 }
 0x668   : > { %v4969_v43 = vsel %vm905_vm1, %v4967_v16, %v4968_v2 }
 0x669   : > { %4989 = vxpose.xlu1.b32.cont [6/8] (short) (narrow) %v4969_v43, 8  ;;  %v4731_v17 = vadd.f32 %v4697_v24, %v4662_v39 }
 0x66a   : > { %v4838_v48 = vpop.permute.xlu0 %4837  ;;  %v4767_v18 = vpop.permute.xlu1 %4766 }
 0x66b   : > { %v4874_v33 = vadd.f32 %v4838_v48, %v4801_v30  ;;  %v4802_v52 = vadd.f32 %v4767_v18, %v4730_v46 }
 0x66d   : > { %v4898_v62 = vadd.f32 %v9236_v37, %v4874_v33 }
 0x66e   : > { %v4769_v59 = vpop.permute.xlu0 %4768  ;;  %v4840_v58 = vpop.permute.xlu1 %4839 }
 0x66f   : > { %v4946_v6 = vrot.slane %v4898_v62, 7  ;;  %v4875_v10 = vadd.f32 %v4840_v58, %v4802_v52  ;;  %v4803_v36 = vadd.f32 %v4769_v59, %v4731_v17 }
 0x671   : > { %v4947_v45 = vsel %vm4918_vm6, %v4944_v5, %v4946_v6  ;;  %v4899_v35 = vadd.f32 %v9236_v37, %v4875_v10 }
 0x672   : > { %v4971_v7 = vrot.slane %v4947_v45, 1  ;;  %v4842_v32 = vpop.permute.xlu0 %4841 }
 0x673   : > { %v4948_v28 = vrot.slane %v4899_v35, 7  ;;  %v4876_v41 = vadd.f32 %v4842_v32, %v4803_v36 }
 0x674   : > { %v4972_v9 = vsel %vm905_vm1, %v4970_v11, %v4971_v7 }
 0x675   : > { %v4949_v50 = vsel %vm4918_vm6, %v4946_v6, %v4948_v28  ;;  %v4900_v38 = vadd.f32 %v9236_v37, %v4876_v41  ;;  %4990 = vxpose.xlu1.b32.cont [7/8] (short) (narrow) %v4972_v9, 8 }
 0x676   : > { %v4973_v40 = vrot.slane %v4949_v50, 1 }
 0x677   : > { %v4950_v22 = vrot.slane %v4900_v38, 7 }
 0x679   : > { %v4951_v15 = vsel %vm4918_vm6, %v4948_v28, %v4950_v22 }
 0x67a   : > { %v4974_v57 = vrot.slane %v4951_v15, 1 }
 0x67c   : > { %v4975_v63 = vsel %vm905_vm1, %v4973_v40, %v4974_v57 }
 0x67d   : > { %4991 = vxpose.xlu1.b32.end [8/8] (short) (narrow) %v4975_v63, 8 }
 0x6e1   : > { %v5000_v37 = vpop.trf.xlu1 }
 0x6e2   : > { %5017 = vst.msk [vmem:[%s377_s21] sm:$0x3] %vm5016_vm7, %v5000_v37 }
 0x6e3   : > { %6013 = shalt.err (!%p6010_p8)
}
 0x6e4   : > { %s6014_s17 = scalar_lea.hbm %s9483_s9, 32  ;;  %s6018_s1 = scalar_lea.hbm %s9534_s7, 64 }
 0x6e5   : > { %p6015_p7 = scmp.ne.s32.totalorder %s9483_s9, %s6014_s17  ;;  %p6019_p3 = scmp.lt.u32.totalorder %s9483_s9, %s9534_s7 }
 0x6e6   : > { %p6020_p6 = scmp.lt.u32.totalorder %s6018_s1, %s6014_s17  ;;  %p6022_p0 = scmp.lt.u32.totalorder %s6014_s17, %s9483_s9 }
 0x6e7   : > { %p6016_p9 = pnand %p6015_p7, %p9648_p5 }
 0x6e8   : > { %p6021_p2 = por %p6020_p6, %p6019_p3 }
 0x6e9   : > { %p6017_p4 = pneg %p6016_p9 }
 0x6ea   : > { %p6023_p10 = por %p6022_p0, %p6021_p2 }
 0x6ec   : > { %p6024_p1 = pnand %p6023_p10, %p6017_p4 }
 0x6ee   : > { %6027 = shalt.err (!%p6024_p1)
}
 0x6ef   : > { %5506 = dma.vmem_to_hbm [thread:$0]  (%p9648_p5), %s9485_s18, 32, %s9483_s9, %s5019_s20  }
 0x6f0 PF: > { %s5044_s21 = sand.u32 1, %s6066_s24   ;;  %p9649_p11 = scmp.ne.s32.totalorder %s9572_s14, 0 }
 0x6f1   : > { %p9650_p12 = scmp.ge.s32.totalorder %s6078_s27, 2  ;;  %s5045_s23 = scalar_lea.sflag [#allocation7], %s5044_s21 }
 0x6f3   : > { %p5532_p13 = pnand %p9650_p12, %p9649_p11 }
 0x6f5   : > { %6061 = dma.done.wait (!%p5532_p13), %s5045_s23, 32  }
 0x6f6   : > { %6063 = vsyncadd (!%p5532_p13), %s5045_s23, 4294967264  ;;  %p23_p8 = scmp.ge.s32.totalorder %s6318_s11, 4   ;;  %s9651_s24 = smov %s6070_s25 }
 0x6f7   : > { %s9652_s25 = smov %s6074_s26  ;;  %s9653_s26 = smov %s6329_s22 }
 0x6f8   : > { %s9654_s27 = smov %s6318_s11  ;;  %25 = sbr.rel (!%p23_p8) target bundleno = 10 (0xa), region = 136 }
 0x6ff   :  { %5050 = vsyncpa [#allocation6], 1 }
 0x700   :  { %5052 = vsyncpa [#allocation6 + $0x1], 1 }
 0x701   :  { %5053 = vsyncpa [#allocation9], 1 }
 0x702   :  { %5054 = vsyncpa [#allocation12], 1 }
 0x703   :  { %5055 = vsyncpa [#allocation15], 1 }
 0x704   :  { %5056 = vsyncpa [#allocation7], 1 }
 0x705   :  { %5058 = vsyncpa [#allocation7 + $0x1], 1 }

</bundles_post_ra>
